<compile_context>
chip_gen: v7x
topology: tpu7x:2x2x1
jax: 0.10.0
libtpu: 0.0.40
codegen_flags: <defaults>
</compile_context>

<pallas_src>
import numpy as np
import jax
import jax.numpy as jnp
from jax.experimental import pallas as pl
from jax.experimental.pallas import tpu as pltpu


# ---------------------------------------------------------------------------
# Host-side operator matrices (plain numpy glue)
# ---------------------------------------------------------------------------
def adaptive_pool_matrix(out_size, in_size):
    """P[i, y] s.t. pooled = P @ x reproduces nn.AdaptiveAvgPool2d along one axis."""
    P = np.zeros((out_size, in_size), np.float32)
    for i in range(out_size):
        start = (i * in_size) // out_size
        end = -((-(i + 1) * in_size) // out_size)      # ceil((i+1)*in/out)
        P[i, start:end] = 1.0 / (end - start)
    return P


def bilinear_matrix(out_size, in_size):
    """U[h, i] s.t. up = U @ x reproduces F.interpolate(bilinear, align_corners=True)."""
    U = np.zeros((out_size, in_size), np.float32)
    if in_size == 1:
        U[:, 0] = 1.0
        return U
    if out_size == 1:
        U[0, 0] = 1.0
        return U
    for h in range(out_size):
        src = h * (in_size - 1) / (out_size - 1)
        i0 = min(int(np.floor(src)), in_size - 2)
        frac = src - i0
        U[h, i0] += 1.0 - frac
        U[h, i0 + 1] += frac
    return U


def _round_up(x, m):
    return ((x + m - 1) // m) * m


def _build_psp_operators(H, W, HWp, pool_sizes):
    """PT (HWp, B2): pooled = x2d @ PT.   UT (B2, HWp): up = y @ UT."""
    HW = H * W
    pts, uts = [], []
    for b in pool_sizes:
        ph = adaptive_pool_matrix(b, H)
        pw = adaptive_pool_matrix(b, W)
        uh = bilinear_matrix(H, b)
        uw = bilinear_matrix(W, b)
        P2 = np.kron(ph, pw)                 # (b*b, HW)
        U2 = np.kron(uh, uw)                 # (HW, b*b)
        pts.append(P2.T)
        uts.append(U2.T)
    PT = np.concatenate(pts, axis=1)         # (HW, B2)
    UT = np.concatenate(uts, axis=0)         # (B2, HW)
    PT = np.pad(PT, ((0, HWp - HW), (0, 0))) # padded HW rows/cols are zero
    UT = np.pad(UT, ((0, 0), (0, HWp - HW)))
    return PT.astype(np.float32), UT.astype(np.float32)


def _build_stage_mask(pool_sizes, Co, B2, Nb):
    """0/1 mask selecting, for each stage's output rows, only that stage's bins."""
    S = len(pool_sizes)
    m = np.zeros((S * Co, B2), np.float32)
    off = 0
    for s, b in enumerate(pool_sizes):
        m[s * Co:(s + 1) * Co, off:off + b * b] = 1.0
        off += b * b
    return np.tile(m, (Nb, 1))               # (Nb*S*Co, B2)


def _build_tap_masks(H, W, HWp):
    """tmask[t, h*W+w] = 1 iff the (dy,dx) neighbour of (h,w) is inside the image."""
    HW = H * W
    hh = np.repeat(np.arange(H), W)
    ww = np.tile(np.arange(W), H)
    tm = np.zeros((9, HWp), np.float32)
    for t in range(9):
        dy, dx = divmod(t, 3)
        ok = ((hh + dy - 1 >= 0) & (hh + dy - 1 < H)
              & (ww + dx - 1 >= 0) & (ww + dx - 1 < W))
        tm[t, :HW] = ok.astype(np.float32)
    return tm


def _build_batched_tap_weights(w_bottleneck, Nb, C, SCo):
    """Per-tap bottleneck weights, replicated block-diagonally per image and laid out
    to match the kernel's batch-major concat [all images' x | all images' up]."""
    wb = np.asarray(w_bottleneck, np.float32)          # (Co2, Ci, 3, 3), OIHW
    Co2, Ci = wb.shape[0], wb.shape[1]
    assert Ci == C + SCo
    Wt = np.zeros((9, Nb * Co2, Nb * Ci), np.float32)
    for t in range(9):
        dy, dx = divmod(t, 3)
        w2 = wb[:, :, dy, dx]                          # (Co2, Ci)
        for n in range(Nb):
            Wt[t, n * Co2:(n + 1) * Co2, n * C:(n + 1) * C] = w2[:, :C]
            Wt[t, n * Co2:(n + 1) * Co2,
               Nb * C + n * SCo:Nb * C + (n + 1) * SCo] = w2[:, C:]
    return Wt


# ---------------------------------------------------------------------------
# Fused Pallas kernel: pooling + 1x1 convs + ReLU + upsample + concat + 3x3 conv
# ---------------------------------------------------------------------------
def _make_psp_kernel(W, HWp, compute_dtype):
    def kernel(x_ref, pt_ref, wst_ref, smask_ref, ut_ref, tmask_ref, wtaps_ref,
               o_ref):
        x2d = x_ref[...]                                           # (Nb*C, HWp)

        # (1) adaptive average pooling of ALL stages & images: one MXU matmul.
        pooled = jnp.dot(x2d, pt_ref[...],
                         preferred_element_type=jnp.float32)       # (Nb*C, B2)

        # (2) all per-stage 1x1 convs fused into ONE block-diagonal matmul + ReLU,
        #     then the 0/1 stage mask (post-ReLU; relu(x)*m == relu(x*m) for m in {0,1}).
        y = jnp.dot(wst_ref[...], pooled.astype(compute_dtype),
                    preferred_element_type=jnp.float32)            # (Nb*S*Co, B2)
        y = jnp.maximum(y, 0.0) * smask_ref[...]

        # (3) bilinear upsample (align_corners=True) of all stages & images: one matmul.
        up = jnp.dot(y.astype(compute_dtype), ut_ref[...],
                     preferred_element_type=jnp.float32)           # (Nb*S*Co, HWp)

        # (4) channel concat, batch-major ([all images' x | all images' up]);
        #     the tap weights were laid out host-side to match, so no reordering.
        #     Kept in f32: the taps are rolled in f32 and cast to the MXU operand
        #     dtype right at each dot.
        cat = jnp.concatenate([x2d.astype(jnp.float32), up], axis=0)  # (Nb*Ci, HWp)

        # (5) 3x3 / pad=1 bottleneck conv as 9 roll-and-accumulate taps (no im2col
        #     buffer).  The boundary mask commutes with the channel contraction, so
        #     it is applied to the small (Nb*Co2, HWp) tap result; the centre tap
        #     never crosses a boundary and is not masked.
        acc = None
        for t in range(9):
            dy, dx = divmod(t, 3)
            delta = (dy - 1) * W + (dx - 1)
            if delta == 0:
                shifted = cat
            else:
                shifted = pltpu.roll(cat, shift=(-delta) % HWp, axis=1)
            term = jnp.dot(wtaps_ref[t], shifted.astype(compute_dtype),
                           preferred_element_type=jnp.float32)     # (Nb*Co2, HWp)
            if not (dy == 1 and dx == 1):
                term = term * tmask_ref[pl.ds(t, 1), :]
            acc = term if acc is None else acc + term

        o_ref[...] = acc.astype(o_ref.dtype)

    return kernel


# ---------------------------------------------------------------------------
# Wrapper
# ---------------------------------------------------------------------------
def _pick_batch_block(N, C, Co2):
    target = max(1, -(-128 // C))            # aim at Nb*C >= 128 (MXU M occupancy)
    nb = min(N, target)
    if N >= 2:
        nb = min(nb, (N + 1) // 2)           # keep >= 2 grid steps (v7x: 2 TCs)
    nb = max(nb, 1)
    while (nb * C) % 8 or (nb * Co2) % 8:    # sublane-aligned blocks
        nb += 1
    return nb


def psp_module_nobn(features, stage_weights, pool_sizes, w_bottleneck, *,
                    compute_dtype=jnp.bfloat16, batch_block=None):
    """Forward pass of _PSPModulenobn.

    features      : (N, C, H, W) f32
    stage_weights : list of (C//len(pool_sizes), C) squeezed 1x1 conv weights
    w_bottleneck  : (C//2, C + (C//len(pool_sizes))*len(pool_sizes), 3, 3)
    """
    N, C, H, W = features.shape
    HW = H * W
    HWp = _round_up(HW, 128)                 # lane-dense flattened-HW axis
    S = len(pool_sizes)
    Co = C // S
    SCo = S * Co
    Ci = C + SCo
    Co2 = w_bottleneck.shape[0]

    Nb = batch_block if batch_block is not None else _pick_batch_block(N, C, Co2)
    Np = _round_up(N, Nb)
    G = Np // Nb

    # host-side operators / weights (batch replication is block-diagonal => exact)
    PT, UT = _build_psp_operators(H, W, HWp, pool_sizes)
    B2 = PT.shape[1]
    wcs = np.concatenate([np.asarray(w, np.float32) for w in stage_weights], axis=0)
    Wst = np.kron(np.eye(Nb, dtype=np.float32), wcs)               # (Nb*SCo, Nb*C)
    smask = _build_stage_mask(pool_sizes, Co, B2, Nb)              # (Nb*SCo, B2)
    tmask = _build_tap_masks(H, W, HWp)                            # (9, HWp)
    Wtaps = _build_batched_tap_weights(w_bottleneck, Nb, C, SCo)   # (9, Nb*Co2, Nb*Ci)

    # input: (N,C,H,W) -> zero-padded, lane-dense (Np*C, HWp) in the operand dtype
    x = features.reshape(N, C, HW)
    x = jnp.pad(x, ((0, Np - N), (0, 0), (0, HWp - HW)))
    x = x.reshape(Np * C, HWp).astype(compute_dtype)

    kernel = _make_psp_kernel(W, HWp, compute_dtype)

    # Only raise the scoped-VMEM limit when per-step blocks actually get large.
    opb = jnp.dtype(compute_dtype).itemsize
    est = (2 * Nb * C * HWp * opb + 2 * Nb * Co2 * HWp * 4
           + 2 * (PT.size + UT.size + Wst.size + Wtaps.size) * opb
           + 2 * (smask.size + tmask.size) * 4
           + 3 * Nb * Ci * HWp * 4)
    vmem_limit = int(min(1.5 * est, 96 * 2**20)) if est > 8 * 2**20 else None

    out_flat = pl.pallas_call(
        kernel,
        out_shape=jax.ShapeDtypeStruct((Np * Co2, HWp), jnp.float32),
        grid=(G,),
        in_specs=[
            pl.BlockSpec((Nb * C, HWp), lambda n: (n, 0)),             # x block
            pl.BlockSpec((HWp, B2), lambda n: (0, 0)),                 # PT
            pl.BlockSpec((Nb * SCo, Nb * C), lambda n: (0, 0)),        # Wst
            pl.BlockSpec((Nb * SCo, B2), lambda n: (0, 0)),            # stage mask
            pl.BlockSpec((B2, HWp), lambda n: (0, 0)),                 # UT
            pl.BlockSpec((9, HWp), lambda n: (0, 0)),                  # tap masks
            pl.BlockSpec((9, Nb * Co2, Nb * Ci), lambda n: (0, 0, 0)), # tap weights
        ],
        out_specs=pl.BlockSpec((Nb * Co2, HWp), lambda n: (n, 0)),
        compiler_params=pltpu.CompilerParams(
            dimension_semantics=("parallel",),
            vmem_limit_bytes=vmem_limit),
    )(x,
      jnp.asarray(PT, compute_dtype),
      jnp.asarray(Wst, compute_dtype),
      jnp.asarray(smask, jnp.float32),
      jnp.asarray(UT, compute_dtype),
      jnp.asarray(tmask, jnp.float32),
      jnp.asarray(Wtaps, compute_dtype))

    out = out_flat.reshape(Np, Co2, HWp)[:N, :, :HW].reshape(N, Co2, H, W)
    return out


# ---------------------------------------------------------------------------
# Pure-JAX reference (same math, for checking the Pallas kernel)
# ---------------------------------------------------------------------------
def reference(features, stage_weights, pool_sizes, w_bottleneck):
    N, C, H, W = features.shape
    pyramids = [features]
    for bin_sz, wc in zip(pool_sizes, stage_weights):
        ph = jnp.asarray(adaptive_pool_matrix(bin_sz, H))
        pw = jnp.asarray(adaptive_pool_matrix(bin_sz, W))
        uh = jnp.asarray(bilinear_matrix(H, bin_sz))
        uw = jnp.asarray(bilinear_matrix(W, bin_sz))
        pooled = jnp.einsum('iy,ncyx,jx->ncij', ph, features, pw,
                            precision='highest')
        y = jax.nn.relu(jnp.einsum('oc,ncij->noij', wc, pooled,
                                   precision='highest'))
        up = jnp.einsum('hi,noij,wj->nohw', uh, y, uw, precision='highest')
        pyramids.append(up)
    cat = jnp.concatenate(pyramids, axis=1)
    return jax.lax.conv_general_dilated(
        cat, jnp.asarray(w_bottleneck), window_strides=(1, 1),
        padding=((1, 1), (1, 1)),
        dimension_numbers=('NCHW', 'OIHW', 'NCHW'),
        precision=jax.lax.Precision.HIGHEST)


# ---------------------------------------------------------------------------
if __name__ == "__main__":
    # Module config: in_channels=16, pool_sizes=(1,2,3,6); H*W=256 (lane-dense)
    in_channels = 16
    pool_sizes = (1, 2, 3, 6)
    S = len(pool_sizes)
    out_channels = in_channels // S                       # 4
    cat_channels = in_channels + out_channels * S         # 32
    out_channelsn = in_channels // 2                      # 8
    N, H, W = 8, 16, 16                                   # -> Nb=4, grid=(2,)

    key = jax.random.PRNGKey(0)
    keys = jax.random.split(key, 2 + S)
    features = jax.random.normal(keys[0], (N, in_channels, H, W), jnp.float32)
    stage_weights = [
        jax.random.normal(keys[1 + i], (out_channels, in_channels), jnp.float32) * 0.1
        for i in range(S)
    ]
    w_bottleneck = jax.random.normal(
        keys[-1], (out_channelsn, cat_channels, 3, 3), jnp.float32) * 0.1

    ref = jax.block_until_ready(
        reference(features, stage_weights, pool_sizes, w_bottleneck))

    # (a) f32-operand path: tight structural/numerical check of the fused kernel.
    out_f32 = jax.block_until_ready(
        psp_module_nobn(features, stage_weights, pool_sizes, w_bottleneck,
                        compute_dtype=jnp.float32))
    assert out_f32.shape == (N, out_channelsn, H, W), out_f32.shape
    assert jnp.allclose(out_f32, ref, rtol=2e-3, atol=2e-3), \
        float(jnp.max(jnp.abs(out_f32 - ref)))

    # (b) bf16-operand / f32-accumulate path (default perf configuration);
    #     tolerance relaxed accordingly (accumulation stays f32).
    out_bf16 = jax.block_until_ready(
        psp_module_nobn(features, stage_weights, pool_sizes, w_bottleneck))
    assert out_bf16.shape == (N, out_channelsn, H, W), out_bf16.shape
    assert jnp.allclose(out_bf16, ref, rtol=3e-2, atol=8e-2), \
        float(jnp.max(jnp.abs(out_bf16 - ref)))

    print("KERNEL_OK")
</pallas_src>

<mosaic_0001>
module attributes {stable_mosaic.version = 11 : i64} {
  func.func @kernel(%arg0: i32, %arg1: memref<64x256xf32, #tpu.memory_space<vmem>>, %arg2: memref<256x50xf32, #tpu.memory_space<vmem>>, %arg3: memref<64x64xf32, #tpu.memory_space<vmem>>, %arg4: memref<64x50xf32, #tpu.memory_space<vmem>>, %arg5: memref<50x256xf32, #tpu.memory_space<vmem>>, %arg6: memref<9x256xf32, #tpu.memory_space<vmem>>, %arg7: memref<9x32x128xf32, #tpu.memory_space<vmem>>, %arg8: memref<32x256xf32, #tpu.memory_space<vmem>>) attributes {dimension_semantics = [#tpu.dimension_semantics<parallel>], iteration_bounds = array<i64: 2>, scalar_prefetch = 0 : i64, scratch_operands = 0 : i64, tpu.core_type = #tpu.core_type<tc>, window_params = [{transform_indices = @transform_0, window_bounds = array<i64: 64, 256>}, {pipeline_mode = #tpu.pipeline_mode<synchronous>, transform_indices = @transform_1, window_bounds = array<i64: 256, 50>}, {pipeline_mode = #tpu.pipeline_mode<synchronous>, transform_indices = @transform_2, window_bounds = array<i64: 64, 64>}, {pipeline_mode = #tpu.pipeline_mode<synchronous>, transform_indices = @transform_3, window_bounds = array<i64: 64, 50>}, {pipeline_mode = #tpu.pipeline_mode<synchronous>, transform_indices = @transform_4, window_bounds = array<i64: 50, 256>}, {pipeline_mode = #tpu.pipeline_mode<synchronous>, transform_indices = @transform_5, window_bounds = array<i64: 9, 256>}, {pipeline_mode = #tpu.pipeline_mode<synchronous>, transform_indices = @transform_6, window_bounds = array<i64: 9, 32, 128>}, {transform_indices = @transform_7, window_bounds = array<i64: 32, 256>}]} {
    %c0 = arith.constant 0 : index
    %c0_0 = arith.constant 0 : index
    %0 = vector.load %arg1[%c0, %c0_0] : memref<64x256xf32, #tpu.memory_space<vmem>>, vector<64x256xf32>
    %c0_1 = arith.constant 0 : index
    %c0_2 = arith.constant 0 : index
    %1 = vector.load %arg2[%c0_1, %c0_2] : memref<256x50xf32, #tpu.memory_space<vmem>>, vector<256x50xf32>
    %cst = arith.constant dense<0.000000e+00> : vector<64x50xf32>
    %2 = tpu.matmul %0, %1, %cst {dimension_numbers = #tpu.dot_dimension_numbers<[1], [0], [0], [1], [0, 0, 1, 1], [], []>} : vector<64x256xf32>, vector<256x50xf32>, vector<64x50xf32> -> vector<64x50xf32>
    %c0_3 = arith.constant 0 : index
    %c0_4 = arith.constant 0 : index
    %3 = vector.load %arg3[%c0_3, %c0_4] : memref<64x64xf32, #tpu.memory_space<vmem>>, vector<64x64xf32>
    %cst_5 = arith.constant dense<0.000000e+00> : vector<64x50xf32>
    %4 = tpu.matmul %3, %2, %cst_5 {dimension_numbers = #tpu.dot_dimension_numbers<[1], [0], [0], [1], [0, 0, 1, 1], [], []>} : vector<64x64xf32>, vector<64x50xf32>, vector<64x50xf32> -> vector<64x50xf32>
    %cst_6 = arith.constant 0.000000e+00 : f32
    %5 = vector.broadcast %cst_6 : f32 to vector<64x50xf32>
    %6 = arith.maximumf %4, %5 : vector<64x50xf32>
    %c0_7 = arith.constant 0 : index
    %c0_8 = arith.constant 0 : index
    %7 = vector.load %arg4[%c0_7, %c0_8] : memref<64x50xf32, #tpu.memory_space<vmem>>, vector<64x50xf32>
    %8 = arith.mulf %6, %7 : vector<64x50xf32>
    %c0_9 = arith.constant 0 : index
    %c0_10 = arith.constant 0 : index
    %9 = vector.load %arg5[%c0_9, %c0_10] : memref<50x256xf32, #tpu.memory_space<vmem>>, vector<50x256xf32>
    %cst_11 = arith.constant dense<0.000000e+00> : vector<64x256xf32>
    %10 = tpu.matmul %8, %9, %cst_11 {dimension_numbers = #tpu.dot_dimension_numbers<[1], [0], [0], [1], [0, 0, 1, 1], [], []>} : vector<64x50xf32>, vector<50x256xf32>, vector<64x256xf32> -> vector<64x256xf32>
    %11 = tpu.concatenate %0, %10 in 0 : vector<64x256xf32>, vector<64x256xf32> -> vector<128x256xf32>
    %c17_i32 = arith.constant 17 : i32
    %12 = tpu.dynamic_rotate %11 by %c17_i32 dim 1 : vector<128x256xf32>, i32 -> vector<128x256xf32>
    %c0_12 = arith.constant 0 : index
    %c0_13 = arith.constant 0 : index
    %c0_14 = arith.constant 0 : index
    %13 = vector.load %arg7[%c0_12, %c0_13, %c0_14] : memref<9x32x128xf32, #tpu.memory_space<vmem>>, vector<1x32x128xf32>
    %14 = vector.shape_cast %13 : vector<1x32x128xf32> to vector<32x128xf32>
    %cst_15 = arith.constant dense<0.000000e+00> : vector<32x256xf32>
    %15 = tpu.matmul %14, %12, %cst_15 {dimension_numbers = #tpu.dot_dimension_numbers<[1], [0], [0], [1], [0, 0, 1, 1], [], []>} : vector<32x128xf32>, vector<128x256xf32>, vector<32x256xf32> -> vector<32x256xf32>
    %c0_16 = arith.constant 0 : index
    %c0_17 = arith.constant 0 : index
    %16 = vector.load %arg6[%c0_16, %c0_17] : memref<9x256xf32, #tpu.memory_space<vmem>>, vector<1x256xf32>
    %17 = vector.broadcast %16 : vector<1x256xf32> to vector<32x256xf32>
    %18 = arith.mulf %15, %17 : vector<32x256xf32>
    %c16_i32 = arith.constant 16 : i32
    %19 = tpu.dynamic_rotate %11 by %c16_i32 dim 1 : vector<128x256xf32>, i32 -> vector<128x256xf32>
    %c1 = arith.constant 1 : index
    %c0_18 = arith.constant 0 : index
    %c0_19 = arith.constant 0 : index
    %20 = vector.load %arg7[%c1, %c0_18, %c0_19] : memref<9x32x128xf32, #tpu.memory_space<vmem>>, vector<1x32x128xf32>
    %21 = vector.shape_cast %20 : vector<1x32x128xf32> to vector<32x128xf32>
    %cst_20 = arith.constant dense<0.000000e+00> : vector<32x256xf32>
    %22 = tpu.matmul %21, %19, %cst_20 {dimension_numbers = #tpu.dot_dimension_numbers<[1], [0], [0], [1], [0, 0, 1, 1], [], []>} : vector<32x128xf32>, vector<128x256xf32>, vector<32x256xf32> -> vector<32x256xf32>
    %c1_21 = arith.constant 1 : index
    %c0_22 = arith.constant 0 : index
    %23 = vector.load %arg6[%c1_21, %c0_22] : memref<9x256xf32, #tpu.memory_space<vmem>>, vector<1x256xf32>
    %24 = vector.broadcast %23 : vector<1x256xf32> to vector<32x256xf32>
    %25 = arith.mulf %22, %24 : vector<32x256xf32>
    %26 = arith.addf %18, %25 : vector<32x256xf32>
    %c15_i32 = arith.constant 15 : i32
    %27 = tpu.dynamic_rotate %11 by %c15_i32 dim 1 : vector<128x256xf32>, i32 -> vector<128x256xf32>
    %c2 = arith.constant 2 : index
    %c0_23 = arith.constant 0 : index
    %c0_24 = arith.constant 0 : index
    %28 = vector.load %arg7[%c2, %c0_23, %c0_24] : memref<9x32x128xf32, #tpu.memory_space<vmem>>, vector<1x32x128xf32>
    %29 = vector.shape_cast %28 : vector<1x32x128xf32> to vector<32x128xf32>
    %cst_25 = arith.constant dense<0.000000e+00> : vector<32x256xf32>
    %30 = tpu.matmul %29, %27, %cst_25 {dimension_numbers = #tpu.dot_dimension_numbers<[1], [0], [0], [1], [0, 0, 1, 1], [], []>} : vector<32x128xf32>, vector<128x256xf32>, vector<32x256xf32> -> vector<32x256xf32>
    %c2_26 = arith.constant 2 : index
    %c0_27 = arith.constant 0 : index
    %31 = vector.load %arg6[%c2_26, %c0_27] : memref<9x256xf32, #tpu.memory_space<vmem>>, vector<1x256xf32>
    %32 = vector.broadcast %31 : vector<1x256xf32> to vector<32x256xf32>
    %33 = arith.mulf %30, %32 : vector<32x256xf32>
    %34 = arith.addf %26, %33 : vector<32x256xf32>
    %c1_i32 = arith.constant 1 : i32
    %35 = tpu.dynamic_rotate %11 by %c1_i32 dim 1 : vector<128x256xf32>, i32 -> vector<128x256xf32>
    %c3 = arith.constant 3 : index
    %c0_28 = arith.constant 0 : index
    %c0_29 = arith.constant 0 : index
    %36 = vector.load %arg7[%c3, %c0_28, %c0_29] : memref<9x32x128xf32, #tpu.memory_space<vmem>>, vector<1x32x128xf32>
    %37 = vector.shape_cast %36 : vector<1x32x128xf32> to vector<32x128xf32>
    %cst_30 = arith.constant dense<0.000000e+00> : vector<32x256xf32>
    %38 = tpu.matmul %37, %35, %cst_30 {dimension_numbers = #tpu.dot_dimension_numbers<[1], [0], [0], [1], [0, 0, 1, 1], [], []>} : vector<32x128xf32>, vector<128x256xf32>, vector<32x256xf32> -> vector<32x256xf32>
    %c3_31 = arith.constant 3 : index
    %c0_32 = arith.constant 0 : index
    %39 = vector.load %arg6[%c3_31, %c0_32] : memref<9x256xf32, #tpu.memory_space<vmem>>, vector<1x256xf32>
    %40 = vector.broadcast %39 : vector<1x256xf32> to vector<32x256xf32>
    %41 = arith.mulf %38, %40 : vector<32x256xf32>
    %42 = arith.addf %34, %41 : vector<32x256xf32>
    %c4 = arith.constant 4 : index
    %c0_33 = arith.constant 0 : index
    %c0_34 = arith.constant 0 : index
    %43 = vector.load %arg7[%c4, %c0_33, %c0_34] : memref<9x32x128xf32, #tpu.memory_space<vmem>>, vector<1x32x128xf32>
    %44 = vector.shape_cast %43 : vector<1x32x128xf32> to vector<32x128xf32>
    %cst_35 = arith.constant dense<0.000000e+00> : vector<32x256xf32>
    %45 = tpu.matmul %44, %11, %cst_35 {dimension_numbers = #tpu.dot_dimension_numbers<[1], [0], [0], [1], [0, 0, 1, 1], [], []>} : vector<32x128xf32>, vector<128x256xf32>, vector<32x256xf32> -> vector<32x256xf32>
    %46 = arith.addf %42, %45 : vector<32x256xf32>
    %c255_i32 = arith.constant 255 : i32
    %47 = tpu.dynamic_rotate %11 by %c255_i32 dim 1 : vector<128x256xf32>, i32 -> vector<128x256xf32>
    %c5 = arith.constant 5 : index
    %c0_36 = arith.constant 0 : index
    %c0_37 = arith.constant 0 : index
    %48 = vector.load %arg7[%c5, %c0_36, %c0_37] : memref<9x32x128xf32, #tpu.memory_space<vmem>>, vector<1x32x128xf32>
    %49 = vector.shape_cast %48 : vector<1x32x128xf32> to vector<32x128xf32>
    %cst_38 = arith.constant dense<0.000000e+00> : vector<32x256xf32>
    %50 = tpu.matmul %49, %47, %cst_38 {dimension_numbers = #tpu.dot_dimension_numbers<[1], [0], [0], [1], [0, 0, 1, 1], [], []>} : vector<32x128xf32>, vector<128x256xf32>, vector<32x256xf32> -> vector<32x256xf32>
    %c5_39 = arith.constant 5 : index
    %c0_40 = arith.constant 0 : index
    %51 = vector.load %arg6[%c5_39, %c0_40] : memref<9x256xf32, #tpu.memory_space<vmem>>, vector<1x256xf32>
    %52 = vector.broadcast %51 : vector<1x256xf32> to vector<32x256xf32>
    %53 = arith.mulf %50, %52 : vector<32x256xf32>
    %54 = arith.addf %46, %53 : vector<32x256xf32>
    %c241_i32 = arith.constant 241 : i32
    %55 = tpu.dynamic_rotate %11 by %c241_i32 dim 1 : vector<128x256xf32>, i32 -> vector<128x256xf32>
    %c6 = arith.constant 6 : index
    %c0_41 = arith.constant 0 : index
    %c0_42 = arith.constant 0 : index
    %56 = vector.load %arg7[%c6, %c0_41, %c0_42] : memref<9x32x128xf32, #tpu.memory_space<vmem>>, vector<1x32x128xf32>
    %57 = vector.shape_cast %56 : vector<1x32x128xf32> to vector<32x128xf32>
    %cst_43 = arith.constant dense<0.000000e+00> : vector<32x256xf32>
    %58 = tpu.matmul %57, %55, %cst_43 {dimension_numbers = #tpu.dot_dimension_numbers<[1], [0], [0], [1], [0, 0, 1, 1], [], []>} : vector<32x128xf32>, vector<128x256xf32>, vector<32x256xf32> -> vector<32x256xf32>
    %c6_44 = arith.constant 6 : index
    %c0_45 = arith.constant 0 : index
    %59 = vector.load %arg6[%c6_44, %c0_45] : memref<9x256xf32, #tpu.memory_space<vmem>>, vector<1x256xf32>
    %60 = vector.broadcast %59 : vector<1x256xf32> to vector<32x256xf32>
    %61 = arith.mulf %58, %60 : vector<32x256xf32>
    %62 = arith.addf %54, %61 : vector<32x256xf32>
    %c240_i32 = arith.constant 240 : i32
    %63 = tpu.dynamic_rotate %11 by %c240_i32 dim 1 : vector<128x256xf32>, i32 -> vector<128x256xf32>
    %c7 = arith.constant 7 : index
    %c0_46 = arith.constant 0 : index
    %c0_47 = arith.constant 0 : index
    %64 = vector.load %arg7[%c7, %c0_46, %c0_47] : memref<9x32x128xf32, #tpu.memory_space<vmem>>, vector<1x32x128xf32>
    %65 = vector.shape_cast %64 : vector<1x32x128xf32> to vector<32x128xf32>
    %cst_48 = arith.constant dense<0.000000e+00> : vector<32x256xf32>
    %66 = tpu.matmul %65, %63, %cst_48 {dimension_numbers = #tpu.dot_dimension_numbers<[1], [0], [0], [1], [0, 0, 1, 1], [], []>} : vector<32x128xf32>, vector<128x256xf32>, vector<32x256xf32> -> vector<32x256xf32>
    %c7_49 = arith.constant 7 : index
    %c0_50 = arith.constant 0 : index
    %67 = vector.load %arg6[%c7_49, %c0_50] : memref<9x256xf32, #tpu.memory_space<vmem>>, vector<1x256xf32>
    %68 = vector.broadcast %67 : vector<1x256xf32> to vector<32x256xf32>
    %69 = arith.mulf %66, %68 : vector<32x256xf32>
    %70 = arith.addf %62, %69 : vector<32x256xf32>
    %c239_i32 = arith.constant 239 : i32
    %71 = tpu.dynamic_rotate %11 by %c239_i32 dim 1 : vector<128x256xf32>, i32 -> vector<128x256xf32>
    %c8 = arith.constant 8 : index
    %c0_51 = arith.constant 0 : index
    %c0_52 = arith.constant 0 : index
    %72 = vector.load %arg7[%c8, %c0_51, %c0_52] : memref<9x32x128xf32, #tpu.memory_space<vmem>>, vector<1x32x128xf32>
    %73 = vector.shape_cast %72 : vector<1x32x128xf32> to vector<32x128xf32>
    %cst_53 = arith.constant dense<0.000000e+00> : vector<32x256xf32>
    %74 = tpu.matmul %73, %71, %cst_53 {dimension_numbers = #tpu.dot_dimension_numbers<[1], [0], [0], [1], [0, 0, 1, 1], [], []>} : vector<32x128xf32>, vector<128x256xf32>, vector<32x256xf32> -> vector<32x256xf32>
    %c8_54 = arith.constant 8 : index
    %c0_55 = arith.constant 0 : index
    %75 = vector.load %arg6[%c8_54, %c0_55] : memref<9x256xf32, #tpu.memory_space<vmem>>, vector<1x256xf32>
    %76 = vector.broadcast %75 : vector<1x256xf32> to vector<32x256xf32>
    %77 = arith.mulf %74, %76 : vector<32x256xf32>
    %78 = arith.addf %70, %77 : vector<32x256xf32>
    %c0_56 = arith.constant 0 : index
    %c0_57 = arith.constant 0 : index
    %79 = vector.load %arg8[%c0_56, %c0_57] : memref<32x256xf32, #tpu.memory_space<vmem>>, vector<32x256xf32>
    tpu.vector_store %arg8[%c0_56, %c0_57], %78 {strides = array<i32>} : memref<32x256xf32, #tpu.memory_space<vmem>>, vector<32x256xf32>,
    return
  }
  func.func @transform_0(%arg0: i32) -> (i32, i32) {
    %c0_i32 = arith.constant 0 : i32
    %c0_i32_0 = arith.constant 0 : i32
    return %arg0, %c0_i32 : i32, i32
  }
  func.func @transform_1(%arg0: i32) -> (i32, i32) {
    %c0_i32 = arith.constant 0 : i32
    %c0_i32_0 = arith.constant 0 : i32
    %c0_i32_1 = arith.constant 0 : i32
    return %c0_i32, %c0_i32_0 : i32, i32
  }
  func.func @transform_2(%arg0: i32) -> (i32, i32) {
    %c0_i32 = arith.constant 0 : i32
    %c0_i32_0 = arith.constant 0 : i32
    %c0_i32_1 = arith.constant 0 : i32
    return %c0_i32, %c0_i32_0 : i32, i32
  }
  func.func @transform_3(%arg0: i32) -> (i32, i32) {
    %c0_i32 = arith.constant 0 : i32
    %c0_i32_0 = arith.constant 0 : i32
    %c0_i32_1 = arith.constant 0 : i32
    return %c0_i32, %c0_i32_0 : i32, i32
  }
  func.func @transform_4(%arg0: i32) -> (i32, i32) {
    %c0_i32 = arith.constant 0 : i32
    %c0_i32_0 = arith.constant 0 : i32
    %c0_i32_1 = arith.constant 0 : i32
    return %c0_i32, %c0_i32_0 : i32, i32
  }
  func.func @transform_5(%arg0: i32) -> (i32, i32) {
    %c0_i32 = arith.constant 0 : i32
    %c0_i32_0 = arith.constant 0 : i32
    %c0_i32_1 = arith.constant 0 : i32
    return %c0_i32, %c0_i32_0 : i32, i32
  }
  func.func @transform_6(%arg0: i32) -> (i32, i32, i32) {
    %c0_i32 = arith.constant 0 : i32
    %c0_i32_0 = arith.constant 0 : i32
    %c0_i32_1 = arith.constant 0 : i32
    %c0_i32_2 = arith.constant 0 : i32
    return %c0_i32, %c0_i32_0, %c0_i32_1 : i32, i32, i32
  }
  func.func @transform_7(%arg0: i32) -> (i32, i32) {
    %c0_i32 = arith.constant 0 : i32
    %c0_i32_0 = arith.constant 0 : i32
    return %arg0, %c0_i32 : i32, i32
  }
}

</mosaic_0001>

<bundles_post_ra>
// kernel: tpu_custom_call.1
= control target key start
LH: loop header
LB: loop body
LE: loop exit
PB: predicated region body
PF: predicated region fallthrough
CT: control target
= control target key end

     0   :  { %12 = vsyncpa [#allocation3], 0  ;;  %s6266_s0 = inlined_call_operand.hbm [shape: f32[128,256], index: 0, kind: input, shape index: {}]   ;;  %s6267_s1 = inlined_call_operand.vmem [shape: f32[256,50], index: 1, kind: input, shape index: {}]   ;;  %s6268_s2 = inlined_call_operand.vmem [shape: f32[64,64], index: 2, kind: input, shape index: {}]   ;;  %s6269_s3 = inlined_call_operand.vmem [shape: f32[64,50], index: 3, kind: input, shape index: {}]   ;;  %s6270_s4 = inlined_call_operand.vmem [shape: f32[50,256], index: 4, kind: input, shape index: {}]   ;;  %s6271_s5 = inlined_call_operand.vmem [shape: f32[9,256], index: 5, kind: input, shape index: {}]   ;;  %s6272_s6 = inlined_call_operand.vmem [shape: f32[9,32,128], index: 6, kind: input, shape index: {}]   ;;  %s6273_s7 = inlined_call_operand.hbm [shape: f32[64,256], index: 7, kind: output, shape index: {}]  }
   0x1   :  { %14 = vsyncpa [#allocation3 + $0x1], 0 }
   0x2   :  { %15 = vsyncpa [#allocation4], 0 }
   0x3   :  { %17 = vsyncpa [#allocation4 + $0x1], 0  ;;  %s4131_s24 = smov 0   ;;  %s4133_s25 = smov 0  }
   0x4   :  { %s4135_s26 = smov 0   ;;  %s4137_s27 = smov 0  }
   0x5 LB: > { %s4152_s28 = sadd.s32 4294967295, %s4075_s27   ;;  %s2724_s29 = sadd.s32 4294967294, %s4075_s27   ;;  %s4075_s27 = sphi %s4137_s27, %s6433_s27   ;;  %s4071_s26 = sphi %s4135_s26, %s6432_s26   ;;  %s4067_s25 = sphi %s4133_s25, %s6431_s25   ;;  %s4063_s24 = sphi %s4131_s24, %s6430_s24  }
   0x6   : > { %s4156_s30 = sadd.s32 1, %s4075_s27   ;;  %s30_s8 = sadd.s32 1, %s4071_s26 }
   0x7   : > { %s27_s9 = ssub.s32 %s4075_s27, %s4156_s30  ;;  %p37_p0 = scmp.ne.s32.totalorder %s4071_s26, %s4067_s25 }
   0x8   : > { %p28_p1 = scmp.eq.s32.totalorder %s27_s9, 0  ;;  %p38_p2 = scmp.eq.s32.totalorder %s4075_s27, 0 }
   0x9   : > { %p43_p3 = scmp.ne.s32.totalorder %s4067_s25, %s4063_s24  ;;  %p44_p4 = scmp.eq.s32.totalorder %s4152_s28, 0 }
   0xa   : > { %s4168_s10 = scalar_select %p28_p1, %s4071_s26, %s30_s8  }
   0xb   : > { %p4170_p5 = por %p38_p2, %p37_p0  ;;  %p4174_p6 = por %p44_p4, %p43_p3 }
   0xc   : > { %p193_p7 = scmp.eq.s32.totalorder %s4152_s28, 1  ;;  %p199_p8 = scmp.eq.s32.totalorder %s2724_s29, 1 }
   0xd   : > { %p3277_p10 = scmp.lt.s32.totalorder %s4075_s27, 2  ;;  %s237_s15 = sand.u32 1, %s4071_s26  }
   0xe   : > { %p4181_p11 = por %p193_p7, %p37_p0  ;;  %p4185_p12 = por %p199_p8, %p43_p3 }
   0xf   : > { %s2798_s16 = sshll.u32 %s4075_s27, 11  ;;  %s2727_s17 = sshll.u32 %s237_s15, 7 }
  0x10   : > { %s6322_s13 = scalar_select %p4181_p11, 1, 0 }
  0x11   : > { %s6323_s14 = scalar_select %p4185_p12, 1, 0 }
  0x12   : > { %s4194_s20 = scalar_lea.hbm %s6266_s0, %s2798_s16  ;;  %s241_s21 = scalar_lea.vmem [#allocation2], %s2727_s17 }
  0x13   : > { %s249_s22 = sshll.u32 %s241_s21, 4  ;;  %p4198_p13 = pnand %p3277_p10, %p4170_p5  ;;  %s4202_s22 = int_to_ptr.vmem [resolvable:$true] %s249_s22 }
  0x14   : > { %s4204_s29 = scalar_lea.sflag [#allocation3], %s237_s15  ;;  %s3979_s8 = scalar_lea.hbm %s4194_s20, 2048 }
  0x15   : > { %p3980_p0 = scmp.ne.s32.totalorder %s4194_s20, %s3979_s8  ;;  %p3981_p1 = pneg %p4198_p13 }
  0x16   : > { %s3984_s16 = scalar_lea.hbm %s6266_s0, 4096  ;;  %p3985_p4 = scmp.lt.u32.totalorder %s4194_s20, %s6266_s0 }
  0x17   : > { %p3982_p2 = pnand %p3981_p1, %p3980_p0  ;;  %p3986_p5 = scmp.lt.u32.totalorder %s3984_s16, %s3979_s8 }
  0x18   : > { %p3988_p8 = scmp.lt.u32.totalorder %s3979_s8, %s4194_s20 }
  0x19   : > { %p3983_p3 = pneg %p3982_p2  ;;  %p3987_p7 = por %p3986_p5, %p3985_p4 }
  0x1b   : > { %p3989_p10 = por %p3988_p8, %p3987_p7 }
  0x1d   : > { %p3990_p9 = pnand %p3989_p10, %p3983_p3 }
  0x1f   : > { %3993 = shalt.err (!%p3990_p9)
}
  0x20   : > { %s3994_s15 = scalar_lea.vmem %s4202_s22, 2048  ;;  %s4077_s19 = smov [#allocation2]  }
  0x21   : > { %p3995_p0 = scmp.ne.s32.totalorder %s4202_s22, %s3994_s15  ;;  %s3999_s21 = sshll.u32 %s4077_s19, 4  ;;  %s4000_s21 = int_to_ptr.vmem [resolvable:$false] %s3999_s21 }
  0x22   : > { %s4001_s9 = scalar_lea.vmem %s4000_s21, 4096  ;;  %p4002_p11 = scmp.lt.s32.totalorder %s4202_s22, %s4000_s21 }
  0x23   : > { %p3997_p2 = pnand %p3995_p0, %p3981_p1  ;;  %p4003_p4 = scmp.lt.s32.totalorder %s4001_s9, %s3994_s15 }
  0x25   : > { %p3998_p12 = pneg %p3997_p2  ;;  %p4004_p5 = por %p4003_p4, %p4002_p11 }
  0x27   : > { %p4005_p7 = pnand %p4004_p5, %p3998_p12 }
  0x29   : > { %4008 = shalt.err (!%p4005_p7)
}
  0x2a   : > { %s4078_s8 = smov 256   ;;  %s4079_s11 = smov 16  }
  0x2b   : > { %3272 = dma.hbm_to_vmem [thread:$0]  (!%p4198_p13), %s4194_s20, 2048, %s4202_s22, %s4204_s29, %s4078_s8, %s4078_s8, %s4079_s11  }
  0x2c   : > { %p2731_p9 = scmp.ge.s32.totalorder %s4075_s27, 1  ;;  %p257_p1 = scmp.lt.s32.totalorder %s4075_s27, 3 }
  0x2e   : > { %p258_p3 = pnand %p2731_p9, %p257_p1 }
  0x30   : > { %261 = sbr.rel (%p258_p3) target bundleno = 1323 (0x52b), region = 48 }
  0x37   : > { %s4235_s16 = sand.u32 1, %s4067_s25  }
  0x38   : > { %s2732_s17 = sshll.u32 %s4235_s16, 7  ;;  %s264_s18 = scalar_lea.sflag [#allocation3], %s4235_s16 }
  0x39   : > { %s4239_s15 = scalar_lea.vmem [#allocation2], %s2732_s17 }
  0x3a   : > { %4054 = dma.done.wait (%p4174_p6), %s264_s18, 2048  }
  0x3b   : > { %4056 = vsyncadd (%p4174_p6), %s264_s18, 4294965248  ;;  %v332_v0 = vld [vmem:[%s6267_s1 + $0x80] sm:$0xff]  ;;  %v333_v1 = vld [vmem:[%s6267_s1 + $0x88] sm:$0xff]  ;;  %vm461_vm0 = vcmask 523264   ;;  %vm654_vm1 = vcmask 1041408   ;;  %s4081_s20 = smov 17  }
  0x3c   : > { %v316_v2 = vld [vmem:[%s6267_s1] sm:$0xff]  ;;  %v2901_v3 = vpack.c.bf16 %v333_v1, %v332_v0  ;;  %v317_v4 = vld [vmem:[%s6267_s1 + $0x8] sm:$0xff]  ;;  %v334_v5 = vld [vmem:[%s6267_s1 + $0x90] sm:$0xff]  ;;  %s4082_s22 = smov 16   ;;  %s4083_s23 = smov 15   ;;  %vm629_vm2 = vcmask 408576  }
  0x3d   : > { %v335_v6 = vld [vmem:[%s6267_s1 + $0x98] sm:$0xff]  ;;  %v2903_v7 = vpack.c.bf16 %v317_v4, %v316_v2  ;;  %v318_v9 = vld [vmem:[%s6267_s1 + $0x10] sm:$0xff]  ;;  %v336_v11 = vld [vmem:[%s6267_s1 + $0xa0] sm:$0xff]  ;;  %s4084_s29 = smov 1   ;;  %s4085_s19 = smov 127  }
  0x3e   : > { %v2905_v8 = vpack.c.bf16 %v335_v6, %v334_v5  ;;  %v319_v10 = vld [vmem:[%s6267_s1 + $0x18] sm:$0xff]  ;;  %2902 = vmatprep.subr.bf16.mxu0 %v2901_v3  ;;  %v337_v12 = vld [vmem:[%s6267_s1 + $0xa8] sm:$0xff]  ;;  %v320_v15 = vld [vmem:[%s6267_s1 + $0x20] sm:$0xff]  ;;  %s2733_s12 = sshll.u32 %s4235_s16, 6  ;;  %s2800_s21 = sshll.u32 %s4152_s28, 10 }
  0x3f   : > { %2904 = vmatpush3.bf16.msra.mxu0 %v2903_v7  ;;  %v2907_v13 = vpack.c.bf16 %v319_v10, %v318_v9  ;;  %v2909_v14 = vpack.c.bf16 %v337_v12, %v336_v11  ;;  %v321_v16 = vld [vmem:[%s6267_s1 + $0x28] sm:$0xff]  ;;  %v338_v17 = vld [vmem:[%s6267_s1 + $0xb0] sm:$0xff]  ;;  %v339_v18 = vld [vmem:[%s6267_s1 + $0xb8] sm:$0xff]  ;;  %s297_s17 = scalar_lea.vmem [#allocation5], %s2733_s12  ;;  %s2637_s28 = scalar_lea.sflag [#allocation4], %s4235_s16 }
  0x40   : > { %2906 = vmatprep.subr.bf16.mxu0 %v2905_v8  ;;  %v2911_v19 = vpack.c.bf16 %v321_v16, %v320_v15  ;;  %v2913_v20 = vpack.c.bf16 %v339_v18, %v338_v17  ;;  %v322_v21 = vld [vmem:[%s6267_s1 + $0x30] sm:$0xff]  ;;  %v323_v22 = vld [vmem:[%s6267_s1 + $0x38] sm:$0xff]  ;;  %v340_v23 = vld [vmem:[%s6267_s1 + $0xc0] sm:$0xff]  ;;  %s2651_s18 = sshll.u32 %s297_s17, 4  ;;  %p6427_p11 = scmp.ne.s32.totalorder %s6322_s13, 0  ;;  %s6216_s18 = int_to_ptr.vmem [resolvable:$true] %s2651_s18 }
  0x41   : > { %v341_v24 = vld [vmem:[%s6267_s1 + $0xc8] sm:$0xff]  ;;  %v2915_v26 = vpack.c.bf16 %v323_v22, %v322_v21  ;;  %v324_v28 = vld [vmem:[%s6267_s1 + $0x40] sm:$0xff]  ;;  %v342_v30 = vld [vmem:[%s6267_s1 + $0xd0] sm:$0xff] }
  0x42   : > { %v4300_v25 = vld [vmem:[%s4239_s15 + $0x8] sm:$0xff]  ;;  %v2917_v27 = vpack.c.bf16 %v341_v24, %v340_v23  ;;  %v343_v31 = vld [vmem:[%s6267_s1 + $0xd8] sm:$0xff]  ;;  %v326_v34 = vld [vmem:[%s6267_s1 + $0x50] sm:$0xff] }
  0x43   : > { %2908 = vmatpush3.bf16.msra.mxu0 %v2907_v13  ;;  %412 = vmatprep.mubr.f32.mxu0 %v4300_v25  ;;  %v325_v29 = vld [vmem:[%s6267_s1 + $0x48] sm:$0xff]  ;;  %v2921_v33 = vpack.c.bf16 %v343_v31, %v342_v30  ;;  %v327_v35 = vld [vmem:[%s6267_s1 + $0x58] sm:$0xff]  ;;  %v344_v36 = vld [vmem:[%s6267_s1 + $0xe0] sm:$0xff] }
  0x44   : > { %2910 = vmatprep.subr.bf16.mxu0 %v2909_v14  ;;  %v2919_v32 = vpack.c.bf16 %v325_v29, %v324_v28  ;;  %v345_v37 = vld [vmem:[%s6267_s1 + $0xe8] sm:$0xff]  ;;  %v2923_v38 = vpack.c.bf16 %v327_v35, %v326_v34  ;;  %v328_v40 = vld [vmem:[%s6267_s1 + $0x60] sm:$0xff]  ;;  %v346_v42 = vld [vmem:[%s6267_s1 + $0xf0] sm:$0xff] }
  0x45   : > { %v2925_v39 = vpack.c.bf16 %v345_v37, %v344_v36  ;;  %v329_v41 = vld [vmem:[%s6267_s1 + $0x68] sm:$0xff]  ;;  %v347_v43 = vld [vmem:[%s6267_s1 + $0xf8] sm:$0xff]  ;;  %v330_v46 = vld [vmem:[%s6267_s1 + $0x70] sm:$0xff] }
  0x46   : > { %v2927_v44 = vpack.c.bf16 %v329_v41, %v328_v40  ;;  %v2929_v45 = vpack.c.bf16 %v347_v43, %v346_v42  ;;  %v331_v47 = vld [vmem:[%s6267_s1 + $0x78] sm:$0xff]  ;;  %v4346_v49 = vld [vmem:[%s4239_s15] sm:$0xff]  ;;  %v4354_v51 = vld [vmem:[%s4239_s15 + $0x10] sm:$0xff] }
  0x47   : > { %2912 = vmatpush3.bf16.msra.mxu0 %v2911_v19  ;;  %v2931_v48 = vpack.c.bf16 %v331_v47, %v330_v46  ;;  %v4349_v50 = vld [vmem:[%s4239_s15 + $0x18] sm:$0xff]  ;;  %v4357_v52 = vld [vmem:[%s4239_s15 + $0x28] sm:$0xff]  ;;  %v4362_v53 = vld [vmem:[%s4239_s15 + $0x20] sm:$0xff] }
  0x48   : > { %2914 = vmatprep.subr.bf16.mxu0 %v2913_v20  ;;  %v4365_v54 = vld [vmem:[%s4239_s15 + $0x38] sm:$0xff]  ;;  %v4370_v55 = vld [vmem:[%s4239_s15 + $0x30] sm:$0xff]  ;;  %v4373_v56 = vld [vmem:[%s4239_s15 + $0x48] sm:$0xff] }
  0x49   : > { %v4378_v57 = vld [vmem:[%s4239_s15 + $0x40] sm:$0xff]  ;;  %v4381_v58 = vld [vmem:[%s4239_s15 + $0x58] sm:$0xff]  ;;  %v4386_v59 = vld [vmem:[%s4239_s15 + $0x50] sm:$0xff] }
  0x4a   : > { %v4389_v60 = vld [vmem:[%s4239_s15 + $0x68] sm:$0xff]  ;;  %v4394_v61 = vld [vmem:[%s4239_s15 + $0x60] sm:$0xff]  ;;  %v4397_v62 = vld [vmem:[%s4239_s15 + $0x78] sm:$0xff] }
  0x4b   : > { %2916 = vmatpush3.bf16.msra.mxu0 %v2915_v26  ;;  %v4402_v63 = vld [vmem:[%s4239_s15 + $0x70] sm:$0xff]  ;;  %v453_v0 = vld [vmem:[%s6268_s2] sm:$0xff]  ;;  %v616_v28 = vld [vmem:[%s6270_s4 + $0x8] sm:$0xff] }
  0x4c   : > { %2918 = vmatprep.subr.bf16.mxu0 %v2917_v27  ;;  %2889 = vmatprep.mubr.msk.f32.mxu1 %vm461_vm0, %v453_v0  ;;  %v618_v29 = vld [vmem:[%s6270_s4 + $0x18] sm:$0xff]  ;;  %v617_v34 = vld [vmem:[%s6270_s4 + $0x10] sm:$0xff]  ;;  %v620_v35 = vld [vmem:[%s6270_s4 + $0x28] sm:$0xff] }
  0x4d   : > { %v622_v36 = vld [vmem:[%s6270_s4 + $0x38] sm:$0xff]  ;;  %v454_v37 = vld [vmem:[%s6268_s2 + $0x8] sm:$0xff]  ;;  %v619_v41 = vld [vmem:[%s6270_s4 + $0x20] sm:$0xff] }
  0x4e   : > { %v2953_v40 = vpack.c.bf16 %v622_v36, %v620_v35  ;;  %v621_v42 = vld [vmem:[%s6270_s4 + $0x30] sm:$0xff]  ;;  %v624_v43 = vld [vmem:[%s6270_s4 + $0x48] sm:$0xff]  ;;  %v457_v47 = vld [vmem:[%s6268_s2 + $0x20] sm:$0xff] }
  0x4f   : > { %2920 = vmatpush3.bf16.msra.mxu0 %v2919_v32  ;;  %v2949_v32 = vpack.c.bf16 %v618_v29, %v616_v28  ;;  %v2955_v46 = vpack.c.bf16 %v621_v42, %v619_v41  ;;  %v623_v0 = vld [vmem:[%s6270_s4 + $0x40] sm:$0xff]  ;;  %v604_v28 = vld [vmem:[%s6269_s3 + $0x28] sm:$0xff] }
  0x50   : > { %2922 = vmatprep.subr.bf16.mxu0 %v2921_v33  ;;  %v615_v33 = vld [vmem:[%s6270_s4] sm:$0xff] }
  0x53   : > { %2924 = vmatpush3.bf16.msra.mxu0 %v2923_v38  ;;  %v2951_v38 = vpack.c.bf16 %v617_v34, %v615_v33  ;;  %v606_v34 = vld [vmem:[%s6269_s3 + $0x38] sm:$0xff] }
  0x54   : > { %2926 = vmatprep.subr.bf16.mxu0 %v2925_v39  ;;  %v455_v39 = vld [vmem:[%s6268_s2 + $0x10] sm:$0xff] }
  0x57   : > { %2928 = vmatpush3.bf16.msra.mxu0 %v2927_v44  ;;  %v626_v44 = vld [vmem:[%s6270_s4 + $0x58] sm:$0xff] }
  0x58   : > { %2930 = vmatprep.subr.bf16.mxu0 %v2929_v45  ;;  %v456_v45 = vld [vmem:[%s6268_s2 + $0x18] sm:$0xff] }
  0x5b   : > { %2932 = vmatpush3.bf16.msra.mxu0 %v2931_v48  ;;  %v2957_v48 = vpack.c.bf16 %v626_v44, %v624_v43 }
  0x5e   : > { %413 = vmatmul.mubr.f32.vlgmr.msra.gmra.mrb[0].mxu0 %v4346_v49 }
  0x5f   : > { %417 = vmatprep.mubr.f32.mxu0 %v4349_v50 }
  0x62   : > { %418 = vmatmul.mubr.f32.gmra.mrb[2].mxu0 %v4354_v51 }
  0x63   : > { %422 = vmatprep.mubr.f32.mxu0 %v4357_v52 }
  0x66   : > { %423 = vmatmul.mubr.f32.gmra.mrb[4].mxu0 %v4362_v53 }
  0x67   : > { %427 = vmatprep.mubr.f32.mxu0 %v4365_v54 }
  0x6a   : > { %428 = vmatmul.mubr.f32.gmra.mrb[6].mxu0 %v4370_v55 }
  0x6b   : > { %432 = vmatprep.mubr.f32.mxu0 %v4373_v56 }
  0x6e   : > { %433 = vmatmul.mubr.f32.gmra.mrb[8].mxu0 %v4378_v57 }
  0x6f   : > { %437 = vmatprep.mubr.f32.mxu0 %v4381_v58 }
  0x72   : > { %438 = vmatmul.mubr.f32.gmra.mrb[10].mxu0 %v4386_v59 }
  0x73   : > { %442 = vmatprep.mubr.f32.mxu0 %v4389_v60 }
  0x76   : > { %443 = vmatmul.mubr.f32.gmra.mrb[12].mxu0 %v4394_v61 }
  0x77   : > { %447 = vmatprep.mubr.f32.mxu0 %v4397_v62 }
  0x7a   : > { %448 = vmatmul.mubr.f32.gmra.mrb[14].mxu0 %v4402_v63 }
 0x131   : > { %v2833_v1 = vpop.f32.mrb[0].mxu0 }
 0x132   : > { %v2834_v2 = vpop.f32.mrb[1].mxu0 }
 0x133   : > { %v2835_v3 = vadd.f32 %v2834_v2, %v2833_v1  ;;  %v625_v1 = vld [vmem:[%s6270_s4 + $0x50] sm:$0xff]  ;;  %v458_v2 = vld [vmem:[%s6268_s2 + $0x28] sm:$0xff] }
 0x135   : > { %v2836_v4 = vpop.f32.mrb[2].mxu0 }
 0x136   : > { %v2837_v5 = vpop.f32.mrb[3].mxu0 }
 0x137   : > { %v2838_v6 = vadd.f32 %v2837_v5, %v2836_v4  ;;  %v459_v4 = vld [vmem:[%s6268_s2 + $0x30] sm:$0xff]  ;;  %v460_v5 = vld [vmem:[%s6268_s2 + $0x38] sm:$0xff] }
 0x139   : > { %v2839_v7 = vpop.f32.mrb[4].mxu0  ;;  %v2933_v8 = vpack.c.bf16 %v2838_v6, %v2835_v3  ;;  %v2959_v3 = vpack.c.bf16 %v625_v1, %v623_v0  ;;  %v628_v6 = vld [vmem:[%s6270_s4 + $0x68] sm:$0x3] }
 0x13a   : > { %v2840_v9 = vpop.f32.mrb[5].mxu0 }
 0x13b   : > { %v2841_v10 = vadd.f32 %v2840_v9, %v2839_v7  ;;  %2934 = vmatprep.subr.bf16.mxu1 %v2933_v8  ;;  %v627_v7 = vld [vmem:[%s6270_s4 + $0x60] sm:$0x3]  ;;  %v3323_v9 = vpack.i.bf16 %v4354_v51, %v4346_v49  ;;  %v3343_v49 = vpack.i.bf16 %v4349_v50, %v4300_v25  ;;  %v4506_v51 = vpack.i.bf16 %v4365_v54, %v4357_v52 }
 0x13c   : > { %2936 = vmatpush3.bf16.msra.mxu1 %v2933_v8  ;;  %v6276_v8 = vmov 0.0   ;;  %v3368_v52 = vpack.i.bf16 %v4300_v25, %v4362_v53  ;;  %v3373_v54 = vpack.i.bf16 %v4370_v55, %v4349_v50 }
 0x13d   : > { %v2842_v11 = vpop.f32.mrb[6].mxu0  ;;  %941 = vmatprep.mubr.f32.mxu0 %v6276_v8  ;;  %3324 = vrot.lane.b32.xlu0 %v3323_v9, %s4081_s20 }
 0x13e   : > { %v2843_v12 = vpop.f32.mrb[7].mxu0 }
 0x13f   : > { %v2844_v13 = vadd.f32 %v2843_v12, %v2842_v11  ;;  %v4492_v11 = vpack.i.bf16 %v4370_v55, %v4362_v53  ;;  %v4496_v12 = vpack.i.bf16 %v4402_v63, %v4394_v61  ;;  %v599_v53 = vld [vmem:[%s6269_s3] sm:$0xff]  ;;  %v600_v61 = vld [vmem:[%s6269_s3 + $0x8] sm:$0xff] }
 0x141   : > { %v2937_v14 = vpack.c.bf16 %v2844_v13, %v2841_v10  ;;  %v2845_v15 = vpop.f32.mrb[8].mxu0  ;;  %v4485_v10 = vpack.i.bf16 %v4386_v59, %v4378_v57  ;;  %3329 = vrot.lane.b32.xlu0 %v4492_v11, %s4081_s20  ;;  %v4513_v57 = vpack.i.bf16 %v4381_v58, %v4373_v56  ;;  %v4517_v59 = vpack.i.bf16 %v4397_v62, %v4389_v60  ;;  %v601_v13 = vld [vmem:[%s6269_s3 + $0x10] sm:$0xff] }
 0x142   : > { %v2846_v16 = vpop.f32.mrb[9].mxu0 }
 0x143   : > { %v2847_v17 = vadd.f32 %v2846_v16, %v2845_v15  ;;  %2938 = vmatprep.subr.bf16.mxu1 %v2937_v14  ;;  %3334 = vrot.lane.b32.xlu1 %v4485_v10, %s4081_s20 }
 0x144   : > { %2940 = vmatpush3.bf16.msra.mxu1 %v2937_v14 }
 0x145   : > { %v2848_v18 = vpop.f32.mrb[10].mxu0  ;;  %3344 = vrot.lane.b32.xlu0 %v3343_v49, %s4081_s20 }
 0x146   : > { %v2849_v19 = vpop.f32.mrb[11].mxu0 }
 0x147   : > { %v2850_v20 = vadd.f32 %v2849_v19, %v2848_v18  ;;  %3339 = vrot.lane.b32.xlu1 %v4496_v12, %s4081_s20  ;;  %v602_v19 = vld [vmem:[%s6269_s3 + $0x18] sm:$0xff] }
 0x149   : > { %v2941_v21 = vpack.c.bf16 %v2850_v20, %v2847_v17  ;;  %v2851_v22 = vpop.f32.mrb[12].mxu0  ;;  %3354 = vrot.lane.b32.xlu0 %v4513_v57, %s4081_s20 }
 0x14a   : > { %v2852_v23 = vpop.f32.mrb[13].mxu0 }
 0x14b   : > { %v2853_v24 = vadd.f32 %v2852_v23, %v2851_v22  ;;  %2942 = vmatprep.subr.bf16.mxu1 %v2941_v21  ;;  %3349 = vrot.lane.b32.xlu1 %v4506_v51, %s4081_s20 }
 0x14c   : > { %2944 = vmatpush3.bf16.msra.mxu1 %v2941_v21 }
 0x14d   : > { %v2854_v26 = vpop.f32.mrb[14].mxu0  ;;  %3364 = vrot.lane.b32.xlu0 %v3323_v9, %s4082_s22 }
 0x14e   : > { %v2855_v27 = vpop.f32.mrb[15].mxu0 }
 0x14f   : > { %v2856_v30 = vadd.f32 %v2855_v27, %v2854_v26  ;;  %3359 = vrot.lane.b32.xlu1 %v4517_v59, %s4081_s20 }
 0x151   : > { %v2945_v31 = vpack.c.bf16 %v2856_v30, %v2853_v24  ;;  %3374 = vrot.lane.b32.xlu0 %v3373_v54, %s4082_s22  ;;  %v603_v24 = vld [vmem:[%s6269_s3 + $0x20] sm:$0xff] }
 0x153   : > { %2946 = vmatprep.subr.bf16.mxu1 %v2945_v31  ;;  %3369 = vrot.lane.b32.xlu1 %v3368_v52, %s4082_s22 }
 0x154   : > { %2948 = vmatpush3.bf16.msra.mxu1 %v2945_v31  ;;  %v605_v31 = vld [vmem:[%s6269_s3 + $0x30] sm:$0xff] }
 0x155   : > { %2950 = vmatprep.subr.bf16.mxu1 %v2949_v32  ;;  %3384 = vrot.lane.b32.xlu0 %v4485_v10, %s4082_s22 }
 0x157   : > { %2890 = vmatmul.mubr.msk.f32.vlgmr.msra.gmra.mrb[0].mxu1 %vm461_vm0, %v454_v37  ;;  %3379 = vrot.lane.b32.xlu1 %v4506_v51, %s4082_s22 }
 0x158   : > { %2892 = vmatprep.mubr.msk.f32.mxu1 %vm461_vm0, %v455_v39  ;;  %2952 = vmatpush1.bf16.msra.mxu1 %v2951_v38  ;;  %v6275_v39 = vlaneseq }
 0x159   : > { %2954 = vmatprep.subr.bf16.mxu1 %v2953_v40  ;;  %3394 = vrot.lane.b32.xlu0 %v4496_v12, %s4082_s22 }
 0x15a   : > { %v4615_v44 = vand.u32 127, %v6275_v39  ;;  %v4933_v39 = vld [vmem:[%s4239_s15 + $0x10] sm:$0xff] }
 0x15b   : > { %2893 = vmatmul.mubr.msk.f32.gmra.mrb[2].mxu1 %vm461_vm0, %v456_v45  ;;  %3389 = vrot.lane.b32.xlu1 %v4513_v57, %s4082_s22  ;;  %6350 = vst [vmem:[#allocation33_spill] sm:$0xff] %v4933_v39 }
 0x15c   : > { %2895 = vmatprep.mubr.msk.f32.mxu1 %vm461_vm0, %v457_v47  ;;  %2956 = vmatpush1.bf16.msra.mxu1 %v2955_v46  ;;  %vm840_vm3 = vcmp.lt.s32.totalorder %v4615_v44, 17  ;;  %vm1050_vm4 = vcmp.lt.s32.totalorder %v4615_v44, 16  ;;  %vm1490_vm5 = vcmp.lt.s32.totalorder %v4615_v44, 1  ;;  %vm1812_vm6 = vcmp.lt.s32.totalorder %v4615_v44, 127 }
 0x15d   : > { %2958 = vmatprep.subr.bf16.mxu1 %v2957_v48  ;;  %3404 = vrot.lane.b32.xlu0 %v3323_v9, %s4083_s23  ;;  %vm1270_vm7 = vcmp.lt.s32.totalorder %v4615_v44, 15  ;;  %vm2032_vm8 = vcmp.lt.s32.totalorder %v4615_v44, 113  ;;  %vm2252_vm9 = vcmp.lt.s32.totalorder %v4615_v44, 112  ;;  %vm2472_vm10 = vcmp.lt.s32.totalorder %v4615_v44, 111  ;;  %v2787_v44 = vld [vmem:[%s6272_s6 + $0x108] sm:$0xff] }
 0x15f   : > { %2896 = vmatmul.mubr.msk.f32.gmra.mrb[4].mxu1 %vm461_vm0, %v458_v2  ;;  %3399 = vrot.lane.b32.xlu1 %v4517_v59, %s4082_s22 }
 0x160   : > { %2898 = vmatprep.mubr.msk.f32.mxu1 %vm461_vm0, %v459_v4  ;;  %2960 = vmatpush1.bf16.msra.mxu1 %v2959_v3 }
 0x161   : > { %2742 = vmatprep.subr.msk.mxu1 %vm654_vm1, %v628_v6  ;;  %3414 = vrot.lane.b32.xlu0 %v3323_v9, %s4084_s29 }
 0x163   : > { %2899 = vmatmul.mubr.msk.f32.gmra.mrb[6].mxu1 %vm461_vm0, %v460_v5  ;;  %3409 = vrot.lane.b32.xlu1 %v3343_v49, %s4083_s23 }
 0x164   : > { %2743 = vmatpush1.msk.msra.mxu1 %vm654_vm1, %v627_v7  ;;  %725 = vmatprep.mubr.f32.mxu1 %v6276_v8 }
 0x165   : > { %3424 = vrot.lane.b32.xlu0 %v4492_v11, %s4083_s23 }
 0x167   : > { %3419 = vrot.lane.b32.xlu1 %v3343_v49, %s4084_s29 }
 0x169   : > { %3434 = vrot.lane.b32.xlu0 %v4492_v11, %s4084_s29 }
 0x16b   : > { %3429 = vrot.lane.b32.xlu1 %v4506_v51, %s4083_s23 }
 0x16d   : > { %3444 = vrot.lane.b32.xlu0 %v4485_v10, %s4083_s23 }
 0x16f   : > { %3439 = vrot.lane.b32.xlu1 %v4506_v51, %s4084_s29 }
 0x171   : > { %3454 = vrot.lane.b32.xlu0 %v4485_v10, %s4084_s29 }
 0x173   : > { %3449 = vrot.lane.b32.xlu1 %v4513_v57, %s4083_s23 }
 0x175   : > { %3464 = vrot.lane.b32.xlu0 %v4496_v12, %s4083_s23 }
 0x177   : > { %3459 = vrot.lane.b32.xlu1 %v4513_v57, %s4084_s29 }
 0x179   : > { %3474 = vrot.lane.b32.xlu0 %v4496_v12, %s4084_s29 }
 0x17b   : > { %3469 = vrot.lane.b32.xlu1 %v4517_v59, %s4083_s23 }
 0x17d   : > { %3484 = vrot.lane.b32.xlu0 %v3323_v9, %s4085_s19 }
 0x17f   : > { %3479 = vrot.lane.b32.xlu1 %v4517_v59, %s4084_s29 }
 0x181   : > { %3494 = vrot.lane.b32.xlu0 %v4492_v11, %s4085_s19 }
 0x183   : > { %3489 = vrot.lane.b32.xlu1 %v3343_v49, %s4085_s19 }
 0x187   : > { %3499 = vrot.lane.b32.xlu1 %v4506_v51, %s4085_s19 }
 0x1af   : > { %v3325_v36 = vpop.permute.xlu0 %3324 }
 0x1b0   : > { %v3327_v40 = vunpack.i.h.bf16 %v3325_v36  ;;  %v3326_v41 = vunpack.i.l.bf16 %v3325_v36 }
 0x1b3   : > { %v3330_v38 = vpop.permute.xlu0 %3329 }
 0x1b4   : > { %v3332_v47 = vunpack.i.h.bf16 %v3330_v38  ;;  %v3331_v48 = vunpack.i.l.bf16 %v3330_v38 }
 0x1b5   : > { %v3335_v37 = vpop.permute.xlu1 %3334 }
 0x1b6   : > { %v3337_v11 = vunpack.i.h.bf16 %v3335_v37  ;;  %v3336_v49 = vunpack.i.l.bf16 %v3335_v37 }
 0x1b7   : > { %v3345_v43 = vpop.permute.xlu0 %3344 }
 0x1b8   : > { %v3347_v45 = vunpack.i.h.bf16 %v3345_v43  ;;  %v3346_v46 = vunpack.i.l.bf16 %v3345_v43 }
 0x1b9   : > { %v3340_v42 = vpop.permute.xlu1 %3339 }
 0x1ba   : > { %v857_v0 = vsel %vm840_vm3, %v3346_v46, %v3326_v41  ;;  %v858_v1 = vsel %vm840_vm3, %v3347_v45, %v3327_v40  ;;  %v841_v3 = vsel %vm840_vm3, %v3326_v41, %v3346_v46  ;;  %v842_v4 = vsel %vm840_vm3, %v3327_v40, %v3347_v45 }
 0x1bb   : > { %v2961_v7 = vpack.c.bf16 %v842_v4, %v841_v3  ;;  %v2963_v9 = vpack.c.bf16 %v858_v1, %v857_v0  ;;  %v3355_v54 = vpop.permute.xlu0 %3354 }
 0x1bd   : > { %v3350_v2 = vpop.permute.xlu1 %3349  ;;  %2962 = vmatprep.subr.bf16.mxu0 %v2961_v7 }
 0x1be   : > { %v3352_v5 = vunpack.i.h.bf16 %v3350_v2  ;;  %v3351_v6 = vunpack.i.l.bf16 %v3350_v2  ;;  %2964 = vmatpush1.bf16.msra.mxu0 %v2963_v9 }
 0x1c0   : > { %v859_v51 = vsel %vm840_vm3, %v3351_v6, %v3331_v48  ;;  %v860_v52 = vsel %vm840_vm3, %v3352_v5, %v3332_v47 }
 0x22a   : > { %v2891_v25 = vpop.f32.mrb[0].mxu1 }
 0x22b   : > { %v552_v50 = vpop.f32.mrb[1].mxu1  ;;  %v592_v56 = vmax.f32 %v2891_v25, 0.0  ;;  %v843_v25 = vsel %vm840_vm3, %v3331_v48, %v3351_v6 }
 0x22c   : > { %v591_v55 = vmax.f32 %v552_v50, 0.0  ;;  %v844_v50 = vsel %vm840_vm3, %v3332_v47, %v3352_v5 }
 0x22d   : > { %v608_v14 = vmul.f32 %v600_v61, %v592_v56  ;;  %v2965_v56 = vpack.c.bf16 %v844_v50, %v843_v25  ;;  %v3341_v61 = vunpack.i.l.bf16 %v3340_v42 }
 0x22e   : > { %v607_v58 = vmul.f32 %v599_v53, %v591_v55  ;;  %v2894_v60 = vpop.f32.mrb[2].mxu1  ;;  %v3357_v53 = vunpack.i.h.bf16 %v3355_v54  ;;  %v3356_v55 = vunpack.i.l.bf16 %v3355_v54 }
 0x22f   : > { %v562_v62 = vpop.f32.mrb[3].mxu1  ;;  %v594_v17 = vmax.f32 %v2894_v60, 0.0  ;;  %v3342_v60 = vunpack.i.h.bf16 %v3340_v42  ;;  %2966 = vmatprep.subr.bf16.mxu0 %v2965_v56 }
 0x230   : > { %2744 = vmatmul.mubr.msk.f32.vlgmr.msra.gmra.mrb[8].mxu1 %vm629_vm2, %v607_v58  ;;  %v593_v63 = vmax.f32 %v562_v62, 0.0  ;;  %v2967_v58 = vpack.c.bf16 %v860_v52, %v859_v51  ;;  %v862_v62 = vsel %vm840_vm3, %v3357_v53, %v3337_v11 }
 0x231   : > { %731 = vmatprep.mubr.f32.mxu1 %v6276_v8  ;;  %v610_v22 = vmul.f32 %v602_v19, %v594_v17 }
 0x232   : > { %v2897_v15 = vpop.f32.mrb[4].mxu1  ;;  %v609_v18 = vmul.f32 %v601_v13, %v593_v63  ;;  %v861_v63 = vsel %vm840_vm3, %v3356_v55, %v3336_v49  ;;  %2968 = vmatpush1.bf16.msra.mxu0 %v2967_v58  ;;  %v3360_v13 = vpop.permute.xlu1 %3359 }
 0x233   : > { %v572_v16 = vpop.f32.mrb[5].mxu1  ;;  %v596_v26 = vmax.f32 %v2897_v15, 0.0  ;;  %v846_v15 = vsel %vm840_vm3, %v3337_v11, %v3357_v53  ;;  %v3361_v17 = vunpack.i.l.bf16 %v3360_v13  ;;  %v2971_v19 = vpack.c.bf16 %v862_v62, %v861_v63 }
 0x234   : > { %2745 = vmatmul.mubr.msk.f32.gmra.mrb[10].mxu1 %vm629_vm2, %v608_v14  ;;  %v595_v23 = vmax.f32 %v572_v16, 0.0  ;;  %v845_v14 = vsel %vm840_vm3, %v3336_v49, %v3356_v55  ;;  %v3362_v16 = vunpack.i.h.bf16 %v3360_v13 }
 0x235   : > { %737 = vmatprep.mubr.f32.mxu1 %v6276_v8  ;;  %v612_v29 = vmul.f32 %v604_v28, %v596_v26 }
 0x236   : > { %v2900_v20 = vpop.f32.mrb[6].mxu1  ;;  %v611_v27 = vmul.f32 %v603_v24, %v595_v23  ;;  %v847_v23 = vsel %vm840_vm3, %v3341_v61, %v3361_v17  ;;  %v848_v24 = vsel %vm840_vm3, %v3342_v60, %v3362_v16 }
 0x237   : > { %v582_v21 = vpop.f32.mrb[7].mxu1  ;;  %v598_v32 = vmax.f32 %v2900_v20, 0.0  ;;  %v864_v20 = vsel %vm840_vm3, %v3362_v16, %v3342_v60  ;;  %v2973_v26 = vpack.c.bf16 %v848_v24, %v847_v23 }
 0x238   : > { %2746 = vmatmul.mubr.msk.f32.gmra.mrb[12].mxu1 %vm629_vm2, %v609_v18  ;;  %v597_v30 = vmax.f32 %v582_v21, 0.0  ;;  %v2969_v18 = vpack.c.bf16 %v846_v15, %v845_v14  ;;  %v863_v21 = vsel %vm840_vm3, %v3361_v17, %v3341_v61 }
 0x239   : > { %743 = vmatprep.mubr.f32.mxu1 %v6276_v8  ;;  %v614_v35 = vmul.f32 %v606_v34, %v598_v32 }
 0x23a   : > { %v613_v33 = vmul.f32 %v605_v31, %v597_v30  ;;  %2970 = vmatprep.subr.bf16.mxu0 %v2969_v18  ;;  %v3370_v30 = vpop.permute.xlu1 %3369 }
 0x23b   : > { %2972 = vmatpush1.bf16.msra.mxu0 %v2971_v19  ;;  %v3372_v32 = vunpack.i.h.bf16 %v3370_v30  ;;  %v3371_v34 = vunpack.i.l.bf16 %v3370_v30 }
 0x23c   : > { %2747 = vmatmul.mubr.msk.f32.gmra.mrb[14].mxu1 %vm629_vm2, %v610_v22  ;;  %v3365_v22 = vpop.permute.xlu0 %3364  ;;  %2974 = vmatprep.subr.bf16.mxu0 %v2973_v26 }
 0x23d   : > { %749 = vmatprep.mubr.f32.mxu1 %v6276_v8  ;;  %v3367_v28 = vunpack.i.h.bf16 %v3365_v22 }
 0x23e   : > { %v3380_v38 = vpop.permute.xlu1 %3379 }
 0x23f   : > { %v3382_v42 = vunpack.i.h.bf16 %v3380_v38  ;;  %v3381_v43 = vunpack.i.l.bf16 %v3380_v38 }
 0x240   : > { %2748 = vmatmul.mubr.msk.f32.gmra.mrb[16].mxu1 %vm629_vm2, %v611_v27  ;;  %v2975_v27 = vpack.c.bf16 %v864_v20, %v863_v21  ;;  %v3375_v31 = vpop.permute.xlu0 %3374 }
 0x241   : > { %755 = vmatprep.mubr.f32.mxu1 %v6276_v8  ;;  %v3377_v36 = vunpack.i.h.bf16 %v3375_v31  ;;  %v1069_v47 = vsel %vm1050_vm4, %v3381_v43, %v3371_v34  ;;  %v1053_v0 = vsel %vm1050_vm4, %v3371_v34, %v3381_v43 }
 0x242   : > { %2976 = vmatpush1.bf16.msra.mxu0 %v2975_v27  ;;  %v3390_v4 = vpop.permute.xlu1 %3389 }
 0x243   : > { %v1070_v48 = vsel %vm1050_vm4, %v3382_v42, %v3377_v36  ;;  %v1054_v1 = vsel %vm1050_vm4, %v3377_v36, %v3382_v42  ;;  %v3392_v6 = vunpack.i.h.bf16 %v3390_v4  ;;  %v3391_v7 = vunpack.i.l.bf16 %v3390_v4 }
 0x244   : > { %2749 = vmatmul.mubr.msk.f32.gmra.mrb[18].mxu1 %vm629_vm2, %v612_v29  ;;  %v3366_v29 = vunpack.i.l.bf16 %v3365_v22  ;;  %v2997_v2 = vpack.c.bf16 %v1054_v1, %v1053_v0  ;;  %v2999_v3 = vpack.c.bf16 %v1070_v48, %v1069_v47  ;;  %v3385_v5 = vpop.permute.xlu0 %3384 }
 0x245   : > { %761 = vmatprep.mubr.f32.mxu1 %v6276_v8  ;;  %v3387_v9 = vunpack.i.h.bf16 %v3385_v5  ;;  %v3386_v11 = vunpack.i.l.bf16 %v3385_v5  ;;  %v4986_v5 = vld [vmem:[%s4239_s15 + $0x40] sm:$0xff] }
 0x246   : > { %v1051_v40 = vsel %vm1050_vm4, %v3366_v29, %v3372_v32  ;;  %v3400_v52 = vpop.permute.xlu1 %3399  ;;  %6357 = vst [vmem:[#allocation40_spill] sm:$0xff] %v4986_v5 }
 0x247   : > { %v1072_v49 = vsel %vm1050_vm4, %v3392_v6, %v3387_v9  ;;  %v1071_v51 = vsel %vm1050_vm4, %v3391_v7, %v3386_v11  ;;  %v1055_v25 = vsel %vm1050_vm4, %v3386_v11, %v3391_v7  ;;  %v1056_v50 = vsel %vm1050_vm4, %v3387_v9, %v3392_v6  ;;  %v4977_v9 = vld [vmem:[%s4239_s15 + $0x58] sm:$0xff] }
 0x248   : > { %2750 = vmatmul.mubr.msk.f32.gmra.mrb[20].mxu1 %vm629_vm2, %v613_v33  ;;  %v3376_v33 = vunpack.i.l.bf16 %v3375_v31  ;;  %v3395_v54 = vpop.permute.xlu0 %3394  ;;  %v3402_v53 = vunpack.i.h.bf16 %v3400_v52  ;;  %v3401_v55 = vunpack.i.l.bf16 %v3400_v52  ;;  %v3001_v60 = vpack.c.bf16 %v1056_v50, %v1055_v25  ;;  %6356 = vst [vmem:[#allocation39_spill] sm:$0xff] %v4977_v9 }
 0x249   : > { %767 = vmatprep.mubr.f32.mxu1 %v6276_v8  ;;  %v3397_v56 = vunpack.i.h.bf16 %v3395_v54  ;;  %v3396_v58 = vunpack.i.l.bf16 %v3395_v54  ;;  %v3003_v61 = vpack.c.bf16 %v1072_v49, %v1071_v51 }
 0x24a   : > { %v1068_v37 = vsel %vm1050_vm4, %v3376_v33, %v3367_v28  ;;  %v1052_v41 = vsel %vm1050_vm4, %v3367_v28, %v3376_v33  ;;  %v4681_v14 = vpop.permute.xlu1 %3409 }
 0x24b   : > { %v2993_v45 = vpack.c.bf16 %v1052_v41, %v1051_v40  ;;  %v1074_v62 = vsel %vm1050_vm4, %v3402_v53, %v3397_v56  ;;  %v1073_v63 = vsel %vm1050_vm4, %v3401_v55, %v3396_v58  ;;  %v1057_v15 = vsel %vm1050_vm4, %v3396_v58, %v3401_v55 }
 0x24c   : > { %2751 = vmatmul.mubr.msk.f32.gmra.mrb[22].mxu1 %vm629_vm2, %v614_v35  ;;  %v1067_v35 = vsel %vm1050_vm4, %v3372_v32, %v3366_v29  ;;  %v4679_v13 = vpop.permute.xlu0 %3404  ;;  %v1058_v16 = vsel %vm1050_vm4, %v3397_v56, %v3402_v53  ;;  %v3007_v18 = vpack.c.bf16 %v1074_v62, %v1073_v63  ;;  %v4961_v56 = vld [vmem:[%s4239_s15 + $0x30] sm:$0xff] }
 0x24d   : > { %1152 = vmatprep.mubr.f32.mxu1 %v6276_v8  ;;  %v2995_v46 = vpack.c.bf16 %v1068_v37, %v1067_v35  ;;  %2994 = vmatprep.subr.bf16.mxu1 %v2993_v45  ;;  %v3005_v17 = vpack.c.bf16 %v1058_v16, %v1057_v15  ;;  %v4958_v16 = vld [vmem:[%s4239_s15 + $0x20] sm:$0xff]  ;;  %6354 = vst [vmem:[#allocation37_spill] sm:$0xff] %v4961_v56  ;;  %v4989_v8 = vld [vmem:[%s4239_s15 + $0x50] sm:$0xff] }
 0x24e   : > { %v4689_v20 = vpop.permute.xlu1 %3419  ;;  %6353 = vst [vmem:[#allocation36_spill] sm:$0xff] %v4958_v16  ;;  %v4965_v55 = vpack.i.bf16 %v4961_v56, %v4958_v16  ;;  %6358 = vst [vmem:[#allocation41_spill] sm:$0xff] %v4989_v8 }
 0x24f   : > { %2996 = vmatpush1.bf16.msra.mxu1 %v2995_v46 }
 0x250   : > { %2998 = vmatprep.subr.bf16.mxu1 %v2997_v2  ;;  %v4687_v19 = vpop.permute.xlu0 %3414  ;;  %v4974_v2 = vld [vmem:[%s4239_s15 + $0x48] sm:$0xff] }
 0x251   : > { %6355 = vst [vmem:[#allocation38_spill] sm:$0xff] %v4974_v2  ;;  %v4981_v41 = vpack.i.bf16 %v4977_v9, %v4974_v2 }
 0x252   : > { %v4693_v22 = vpop.permute.xlu1 %3429 }
 0x253   : > { %3000 = vmatpush1.bf16.msra.mxu1 %v2999_v3 }
 0x254   : > { %3002 = vmatprep.subr.bf16.mxu1 %v3001_v60  ;;  %v4691_v21 = vpop.permute.xlu0 %3424 }
 0x256   : > { %v4697_v24 = vpop.permute.xlu1 %3439 }
 0x257   : > { %3004 = vmatpush1.bf16.msra.mxu1 %v3003_v61 }
 0x258   : > { %3006 = vmatprep.subr.bf16.mxu1 %v3005_v17  ;;  %v4695_v23 = vpop.permute.xlu0 %3434 }
 0x25a   : > { %v4701_v27 = vpop.permute.xlu1 %3449 }
 0x25b   : > { %3008 = vmatpush1.bf16.msra.mxu1 %v3007_v18 }
 0x25c   : > { %v4699_v26 = vpop.permute.xlu0 %3444 }
 0x25e   : > { %v4705_v29 = vpop.permute.xlu1 %3459 }
 0x260   : > { %v4703_v28 = vpop.permute.xlu0 %3454 }
 0x262   : > { %v4709_v31 = vpop.permute.xlu1 %3469 }
 0x264   : > { %v4707_v30 = vpop.permute.xlu0 %3464 }
 0x266   : > { %v3480_v33 = vpop.permute.xlu1 %3479 }
 0x267   : > { %v3482_v36 = vunpack.i.h.bf16 %v3480_v33  ;;  %v3481_v37 = vunpack.i.l.bf16 %v3480_v33 }
 0x268   : > { %v3475_v32 = vpop.permute.xlu0 %3474 }
 0x269   : > { %v3477_v34 = vunpack.i.h.bf16 %v3475_v32  ;;  %v3476_v35 = vunpack.i.l.bf16 %v3475_v32 }
 0x26a   : > { %v3490_v43 = vpop.permute.xlu1 %3489 }
 0x26b   : > { %v4714_v38 = vsel %vm1490_vm5, %v3481_v37, %v3476_v35  ;;  %v4718_v40 = vsel %vm1490_vm5, %v3482_v36, %v3477_v34  ;;  %v3492_v47 = vunpack.i.h.bf16 %v3490_v43  ;;  %v3491_v48 = vunpack.i.l.bf16 %v3490_v43 }
 0x26c   : > { %6325 = vst [vmem:[#allocation8_spill] sm:$0xff] %v4714_v38  ;;  %6326 = vst [vmem:[#allocation9_spill] sm:$0xff] %v4718_v40  ;;  %v3485_v42 = vpop.permute.xlu0 %3484  ;;  %v4735_v3 = vsel %vm1490_vm5, %v3476_v35, %v3481_v37  ;;  %v4739_v4 = vsel %vm1490_vm5, %v3477_v34, %v3482_v36  ;;  %v4949_v37 = vld [vmem:[%s4239_s15 + $0x38] sm:$0xff] }
 0x26d   : > { %v3487_v45 = vunpack.i.h.bf16 %v3485_v42  ;;  %v3486_v46 = vunpack.i.l.bf16 %v3485_v42  ;;  %v4946_v42 = vld [vmem:[%s4239_s15 + $0x28] sm:$0xff]  ;;  %6352 = vst [vmem:[#allocation35_spill] sm:$0xff] %v4949_v37 }
 0x26e   : > { %6351 = vst [vmem:[#allocation34_spill] sm:$0xff] %v4946_v42  ;;  %v4953_v17 = vpack.i.bf16 %v4949_v37, %v4946_v42 }
 0x26f   : > { %v4725_v0 = vsel %vm1812_vm6, %v3486_v46, %v3491_v48  ;;  %v4729_v1 = vsel %vm1812_vm6, %v3487_v45, %v3492_v47  ;;  %v4745_v6 = vsel %vm1812_vm6, %v3491_v48, %v3486_v46  ;;  %v4749_v7 = vsel %vm1812_vm6, %v3492_v47, %v3487_v45 }
 0x270   : > { %6327 = vst [vmem:[#allocation10_spill] sm:$0xff] %v4725_v0  ;;  %6328 = vst [vmem:[#allocation11_spill] sm:$0xff] %v4729_v1 }
 0x271   : > { %6329 = vst [vmem:[#allocation12_spill] sm:$0xff] %v4745_v6  ;;  %6330 = vst [vmem:[#allocation13_spill] sm:$0xff] %v4749_v7 }
 0x303   : > { %v4753_v11 = vpop.f32.mrb[8].mxu1 }
 0x304   : > { %6331 = vst [vmem:[#allocation14_spill] sm:$0xff] %v4753_v11  ;;  %v4755_v49 = vpop.f32.mrb[9].mxu1 }
 0x305   : > { %6332 = vst [vmem:[#allocation15_spill] sm:$0xff] %v4755_v49 }
 0x307   : > { %v4757_v51 = vpop.f32.mrb[10].mxu1 }
 0x308   : > { %6333 = vst [vmem:[#allocation16_spill] sm:$0xff] %v4757_v51  ;;  %v4759_v52 = vpop.f32.mrb[11].mxu1  ;;  %v4763_v54 = vpack.i.bf16 %v4757_v51, %v4753_v11 }
 0x309   : > { %6334 = vst [vmem:[#allocation17_spill] sm:$0xff] %v4759_v52  ;;  %v4767_v25 = vpack.i.bf16 %v4759_v52, %v4755_v49 }
 0x30a   : > { %3504 = vrot.lane.b32.xlu0 %v4763_v54, %s4081_s20 }
 0x30b   : > { %3529 = vrot.lane.b32.xlu1 %v4767_v25, %s4082_s22  ;;  %v4773_v50 = vpop.f32.mrb[12].mxu1 }
 0x30c   : > { %6335 = vst [vmem:[#allocation18_spill] sm:$0xff] %v4773_v50  ;;  %v4775_v53 = vpop.f32.mrb[13].mxu1 }
 0x30d   : > { %6336 = vst [vmem:[#allocation19_spill] sm:$0xff] %v4775_v53 }
 0x30e   : > { %3509 = vrot.lane.b32.xlu0 %v4763_v54, %s4082_s22 }
 0x30f   : > { %3534 = vrot.lane.b32.xlu1 %v4767_v25, %s4083_s23  ;;  %v4785_v58 = vpop.f32.mrb[14].mxu1 }
 0x310   : > { %6337 = vst [vmem:[#allocation20_spill] sm:$0xff] %v4785_v58  ;;  %v4787_v60 = vpop.f32.mrb[15].mxu1  ;;  %v4791_v61 = vpack.i.bf16 %v4785_v58, %v4773_v50  ;;  %v5027_v50 = vpop.permute.xlu1 %3499 }
 0x311   : > { %6338 = vst [vmem:[#allocation21_spill] sm:$0xff] %v4787_v60  ;;  %v4795_v62 = vpack.i.bf16 %v4787_v60, %v4775_v53  ;;  %6364 = vst [vmem:[#allocation47_spill] sm:$0xff] %v5027_v50 }
 0x312   : > { %3514 = vrot.lane.b32.xlu0 %v4763_v54, %s4083_s23 }
 0x313   : > { %3539 = vrot.lane.b32.xlu1 %v4767_v25, %s4084_s29  ;;  %v4801_v63 = vpop.f32.mrb[16].mxu1 }
 0x314   : > { %6339 = vst [vmem:[#allocation22_spill] sm:$0xff] %v4801_v63  ;;  %v4803_v15 = vpop.f32.mrb[17].mxu1 }
 0x315   : > { %6340 = vst [vmem:[#allocation23_spill] sm:$0xff] %v4803_v15 }
 0x316   : > { %3519 = vrot.lane.b32.xlu0 %v4763_v54, %s4084_s29 }
 0x317   : > { %3544 = vrot.lane.b32.xlu1 %v4791_v61, %s4081_s20  ;;  %v4813_v18 = vpop.f32.mrb[18].mxu1 }
 0x318   : > { %6341 = vst [vmem:[#allocation24_spill] sm:$0xff] %v4813_v18  ;;  %v4815_v32 = vpop.f32.mrb[19].mxu1  ;;  %v4819_v33 = vpack.i.bf16 %v4813_v18, %v4801_v63  ;;  %v5013_v63 = vpop.permute.xlu0 %3494  ;;  %v5016_v18 = vld [vmem:[%s4239_s15 + $0x60] sm:$0xff] }
 0x319   : > { %6342 = vst [vmem:[#allocation25_spill] sm:$0xff] %v4815_v32  ;;  %v4823_v34 = vpack.i.bf16 %v4815_v32, %v4803_v15  ;;  %6361 = vst [vmem:[#allocation44_spill] sm:$0xff] %v5013_v63  ;;  %v5019_v15 = vld [vmem:[%s4239_s15 + $0x70] sm:$0xff] }
 0x31a   : > { %3524 = vrot.lane.b32.xlu0 %v4767_v25, %s4081_s20  ;;  %6362 = vst [vmem:[#allocation45_spill] sm:$0xff] %v5016_v18  ;;  %6363 = vst [vmem:[#allocation46_spill] sm:$0xff] %v5019_v15  ;;  %v5023_v32 = vpack.i.bf16 %v5019_v15, %v5016_v18 }
 0x31b   : > { %3564 = vrot.lane.b32.xlu1 %v4795_v62, %s4081_s20  ;;  %v4829_v35 = vpop.f32.mrb[20].mxu1 }
 0x31c   : > { %6343 = vst [vmem:[#allocation26_spill] sm:$0xff] %v4829_v35  ;;  %v4831_v36 = vpop.f32.mrb[21].mxu1 }
 0x31d   : > { %6344 = vst [vmem:[#allocation27_spill] sm:$0xff] %v4831_v36 }
 0x31e   : > { %3549 = vrot.lane.b32.xlu0 %v4791_v61, %s4082_s22 }
 0x31f   : > { %3569 = vrot.lane.b32.xlu1 %v4795_v62, %s4082_s22  ;;  %v4841_v43 = vpop.f32.mrb[22].mxu1 }
 0x320   : > { %6345 = vst [vmem:[#allocation28_spill] sm:$0xff] %v4841_v43  ;;  %v4843_v45 = vpop.f32.mrb[23].mxu1  ;;  %v4847_v46 = vpack.i.bf16 %v4841_v43, %v4829_v35  ;;  %v4993_v35 = vpack.i.bf16 %v4989_v8, %v4986_v5  ;;  %v5002_v43 = vld [vmem:[%s4239_s15 + $0x68] sm:$0xff] }
 0x321   : > { %6346 = vst [vmem:[#allocation29_spill] sm:$0xff] %v4843_v45  ;;  %v4851_v47 = vpack.i.bf16 %v4843_v45, %v4831_v36  ;;  %6359 = vst [vmem:[#allocation42_spill] sm:$0xff] %v5002_v43  ;;  %v5005_v36 = vld [vmem:[%s4239_s15 + $0x78] sm:$0xff] }
 0x322   : > { %3554 = vrot.lane.b32.xlu0 %v4791_v61, %s4083_s23  ;;  %6360 = vst [vmem:[#allocation43_spill] sm:$0xff] %v5005_v36  ;;  %v5009_v45 = vpack.i.bf16 %v5005_v36, %v5002_v43 }
 0x323   : > { %3574 = vrot.lane.b32.xlu1 %v4795_v62, %s4083_s23 }
 0x326   : > { %3559 = vrot.lane.b32.xlu0 %v4791_v61, %s4084_s29 }
 0x327   : > { %3579 = vrot.lane.b32.xlu1 %v4795_v62, %s4084_s29 }
 0x32a   : > { %3584 = vrot.lane.b32.xlu0 %v4819_v33, %s4081_s20 }
 0x32b   : > { %3609 = vrot.lane.b32.xlu1 %v4823_v34, %s4082_s22 }
 0x32e   : > { %3589 = vrot.lane.b32.xlu0 %v4819_v33, %s4082_s22 }
 0x32f   : > { %3614 = vrot.lane.b32.xlu1 %v4823_v34, %s4083_s23 }
 0x332   : > { %3594 = vrot.lane.b32.xlu0 %v4819_v33, %s4083_s23 }
 0x333   : > { %3619 = vrot.lane.b32.xlu1 %v4823_v34, %s4084_s29 }
 0x336   : > { %3599 = vrot.lane.b32.xlu0 %v4819_v33, %s4084_s29 }
 0x337   : > { %3624 = vrot.lane.b32.xlu1 %v4847_v46, %s4081_s20 }
 0x33a   : > { %3604 = vrot.lane.b32.xlu0 %v4823_v34, %s4081_s20 }
 0x33b   : > { %3649 = vrot.lane.b32.xlu1 %v4851_v47, %s4081_s20  ;;  %s4086_s20 = smov 113  }
 0x33e   : > { %3629 = vrot.lane.b32.xlu0 %v4847_v46, %s4082_s22 }
 0x33f   : > { %3654 = vrot.lane.b32.xlu1 %v4851_v47, %s4082_s22 }
 0x342   : > { %3634 = vrot.lane.b32.xlu0 %v4485_v10, %s4085_s19  ;;  %v4910_v10 = vld [vmem:[%s4239_s15 + $0x8] sm:$0xff] }
 0x343   : > { %3659 = vrot.lane.b32.xlu1 %v4513_v57, %s4085_s19  ;;  %6347 = vst [vmem:[#allocation30_spill] sm:$0xff] %v4910_v10  ;;  %v4913_v57 = vld [vmem:[%s4239_s15 + $0x18] sm:$0xff] }
 0x344   : > { %6348 = vst [vmem:[#allocation31_spill] sm:$0xff] %v4913_v57 }
 0x346   : > { %3639 = vrot.lane.b32.xlu0 %v4847_v46, %s4083_s23 }
 0x347   : > { %3669 = vrot.lane.b32.xlu1 %v4517_v59, %s4085_s19  ;;  %v4917_v59 = vpack.i.bf16 %v4913_v57, %v4910_v10 }
 0x34a   : > { %3644 = vrot.lane.b32.xlu0 %v4847_v46, %s4084_s29 }
 0x34b   : > { %3679 = vrot.lane.b32.xlu1 %v4767_v25, %s4085_s19 }
 0x34e   : > { %3664 = vrot.lane.b32.xlu0 %v4496_v12, %s4085_s19  ;;  %v4930_v12 = vld [vmem:[%s4239_s15] sm:$0xff]  ;;  %s4088_s15 = smov 111  }
 0x34f   : > { %3689 = vrot.lane.b32.xlu1 %v4795_v62, %s4085_s19  ;;  %6349 = vst [vmem:[#allocation32_spill] sm:$0xff] %v4930_v12  ;;  %v4937_v48 = vpack.i.bf16 %v4933_v39, %v4930_v12 }
 0x352   : > { %3674 = vrot.lane.b32.xlu0 %v4763_v54, %s4085_s19 }
 0x353   : > { %3699 = vrot.lane.b32.xlu1 %v4823_v34, %s4085_s19 }
 0x356   : > { %3684 = vrot.lane.b32.xlu0 %v4791_v61, %s4085_s19 }
 0x357   : > { %3714 = vrot.lane.b32.xlu1 %v4917_v59, %s4086_s20 }
 0x35a   : > { %3694 = vrot.lane.b32.xlu0 %v4819_v33, %s4085_s19 }
 0x35b   : > { %3724 = vrot.lane.b32.xlu1 %v4851_v47, %s4083_s23  ;;  %s4087_s23 = smov 112  }
 0x35e   : > { %3704 = vrot.lane.b32.xlu0 %v4847_v46, %s4085_s19 }
 0x35f   : > { %3729 = vrot.lane.b32.xlu1 %v4851_v47, %s4084_s29  ;;  %s4089_s29 = smov [#allocation5]  }
 0x362   : > { %3709 = vrot.lane.b32.xlu0 %v4937_v48, %s4086_s20 }
 0x363   : > { %3734 = vrot.lane.b32.xlu1 %v4917_v59, %s4087_s23 }
 0x366   : > { %3719 = vrot.lane.b32.xlu0 %v4937_v48, %s4087_s23 }
 0x367   : > { %3744 = vrot.lane.b32.xlu1 %v4953_v17, %s4086_s20 }
 0x36a   : > { %3739 = vrot.lane.b32.xlu0 %v4965_v55, %s4086_s20 }
 0x36b   : > { %3754 = vrot.lane.b32.xlu1 %v4953_v17, %s4087_s23 }
 0x36e   : > { %3749 = vrot.lane.b32.xlu0 %v4965_v55, %s4087_s23 }
 0x36f   : > { %3764 = vrot.lane.b32.xlu1 %v4981_v41, %s4086_s20 }
 0x372   : > { %3759 = vrot.lane.b32.xlu0 %v4993_v35, %s4086_s20 }
 0x373   : > { %3774 = vrot.lane.b32.xlu1 %v4981_v41, %s4087_s23 }
 0x376   : > { %3769 = vrot.lane.b32.xlu0 %v4993_v35, %s4087_s23 }
 0x377   : > { %3784 = vrot.lane.b32.xlu1 %v5009_v45, %s4086_s20 }
 0x37a   : > { %3779 = vrot.lane.b32.xlu0 %v5023_v32, %s4086_s20 }
 0x37b   : > { %3794 = vrot.lane.b32.xlu1 %v5009_v45, %s4087_s23 }
 0x37c   : > { %v3505_v58 = vpop.permute.xlu0 %3504 }
 0x37d   : > { %v3530_v53 = vpop.permute.xlu1 %3529 }
 0x37e   : > { %3789 = vrot.lane.b32.xlu0 %v5023_v32, %s4087_s23  ;;  %v3532_v11 = vunpack.i.h.bf16 %v3530_v53  ;;  %v3531_v51 = vunpack.i.l.bf16 %v3530_v53 }
 0x37f   : > { %3804 = vrot.lane.b32.xlu1 %v4851_v47, %s4085_s19  ;;  %s4013_s19 = sshll.u32 %s4089_s29, 4  ;;  %s4014_s19 = int_to_ptr.vmem [resolvable:$false] %s4013_s19 }
 0x380   : > { %v3510_v60 = vpop.permute.xlu0 %3509  ;;  %s4015_s8 = scalar_lea.vmem %s4014_s19, 2048  ;;  %p4016_p8 = scmp.lt.s32.totalorder %s6216_s18, %s4014_s19 }
 0x381   : > { %v3512_v49 = vunpack.i.h.bf16 %v3510_v60  ;;  %v3511_v52 = vunpack.i.l.bf16 %v3510_v60  ;;  %v5037_v15 = vpop.permute.xlu1 %3534 }
 0x382   : > { %3799 = vrot.lane.b32.xlu0 %v4763_v54, %s4086_s20 }
 0x383   : > { %v1075_v18 = vsel %vm1050_vm4, %v3531_v51, %v3511_v52  ;;  %v1076_v36 = vsel %vm1050_vm4, %v3532_v11, %v3512_v49  ;;  %3809 = vrot.lane.b32.xlu1 %v4767_v25, %s4086_s20  ;;  %v1059_v43 = vsel %vm1050_vm4, %v3511_v52, %v3531_v51  ;;  %v1060_v53 = vsel %vm1050_vm4, %v3512_v49, %v3532_v11 }
 0x384   : > { %v3011_v60 = vpack.c.bf16 %v1076_v36, %v1075_v18  ;;  %v5051_v0 = vpop.permute.xlu0 %3514  ;;  %v3009_v1 = vpack.c.bf16 %v1060_v53, %v1059_v43  ;;  %v3507_v49 = vunpack.i.h.bf16 %v3505_v58  ;;  %v3506_v52 = vunpack.i.l.bf16 %v3505_v58 }
 0x385   : > { %v5053_v8 = vpop.permute.xlu1 %3539 }
 0x386   : > { %3010 = vmatprep.subr.bf16.mxu1 %v3009_v1  ;;  %3814 = vrot.lane.b32.xlu0 %v4763_v54, %s4087_s23 }
 0x387   : > { %3012 = vmatpush1.bf16.msra.mxu1 %v3011_v60  ;;  %3819 = vrot.lane.b32.xlu1 %v4767_v25, %s4087_s23 }
 0x388   : > { %v5059_v5 = vpop.permute.xlu0 %3519 }
 0x389   : > { %v3545_v51 = vpop.permute.xlu1 %3544 }
 0x38a   : > { %3824 = vrot.lane.b32.xlu0 %v4791_v61, %s4086_s20  ;;  %v3547_v43 = vunpack.i.h.bf16 %v3545_v51  ;;  %v3546_v53 = vunpack.i.l.bf16 %v3545_v51 }
 0x38b   : > { %3829 = vrot.lane.b32.xlu1 %v4795_v62, %s4086_s20 }
 0x38c   : > { %v3525_v11 = vpop.permute.xlu0 %3524 }
 0x38d   : > { %v3527_v1 = vunpack.i.h.bf16 %v3525_v11  ;;  %v3526_v18 = vunpack.i.l.bf16 %v3525_v11  ;;  %v3565_v36 = vpop.permute.xlu1 %3564 }
 0x38e   : > { %v3567_v60 = vunpack.i.h.bf16 %v3565_v36  ;;  %v3566_v9 = vunpack.i.l.bf16 %v3565_v36  ;;  %3834 = vrot.lane.b32.xlu0 %v4791_v61, %s4087_s23 }
 0x38f   : > { %v866_v2 = vsel %vm840_vm3, %v3527_v1, %v3507_v49  ;;  %v865_v56 = vsel %vm840_vm3, %v3526_v18, %v3506_v52  ;;  %3839 = vrot.lane.b32.xlu1 %v4795_v62, %s4087_s23  ;;  %v849_v58 = vsel %vm840_vm3, %v3506_v52, %v3526_v18  ;;  %v850_v51 = vsel %vm840_vm3, %v3507_v49, %v3527_v1 }
 0x390   : > { %v2979_v11 = vpack.c.bf16 %v866_v2, %v865_v56  ;;  %v3550_v36 = vpop.permute.xlu0 %3549  ;;  %v2977_v16 = vpack.c.bf16 %v850_v51, %v849_v58  ;;  %v868_v6 = vsel %vm840_vm3, %v3567_v60, %v3547_v43  ;;  %v851_v39 = vsel %vm840_vm3, %v3546_v53, %v3566_v9 }
 0x391   : > { %v3552_v7 = vunpack.i.h.bf16 %v3550_v36  ;;  %v3551_v37 = vunpack.i.l.bf16 %v3550_v36  ;;  %v3570_v42 = vpop.permute.xlu1 %3569  ;;  %v867_v12 = vsel %vm840_vm3, %v3566_v9, %v3546_v53  ;;  %v852_v2 = vsel %vm840_vm3, %v3547_v43, %v3567_v60 }
 0x392   : > { %v3572_v57 = vunpack.i.h.bf16 %v3570_v42  ;;  %v3571_v52 = vunpack.i.l.bf16 %v3570_v42  ;;  %2978 = vmatprep.subr.bf16.mxu0 %v2977_v16  ;;  %3844 = vrot.lane.b32.xlu0 %v4819_v33, %s4086_s20  ;;  %v2981_v56 = vpack.c.bf16 %v852_v2, %v851_v39  ;;  %v2983_v18 = vpack.c.bf16 %v868_v6, %v867_v12 }
 0x393   : > { %2980 = vmatpush1.bf16.msra.mxu0 %v2979_v11  ;;  %3849 = vrot.lane.b32.xlu1 %v4823_v34, %s4086_s20  ;;  %v3406_v12 = vunpack.i.l.bf16 %v4679_v13  ;;  %v3412_v58 = vunpack.i.h.bf16 %v4681_v14  ;;  %v3411_v51 = vunpack.i.l.bf16 %v4681_v14 }
 0x394   : > { %v1078_v49 = vsel %vm1050_vm4, %v3572_v57, %v3552_v7  ;;  %v1077_v9 = vsel %vm1050_vm4, %v3571_v52, %v3551_v37  ;;  %v5093_v1 = vpop.permute.xlu0 %3554  ;;  %v1061_v16 = vsel %vm1050_vm4, %v3551_v37, %v3571_v52  ;;  %v1062_v42 = vsel %vm1050_vm4, %v3552_v7, %v3572_v57  ;;  %2982 = vmatprep.subr.bf16.mxu0 %v2981_v56 }
 0x395   : > { %v3015_v43 = vpack.c.bf16 %v1078_v49, %v1077_v9  ;;  %v5099_v53 = vpop.permute.xlu1 %3574  ;;  %v3013_v39 = vpack.c.bf16 %v1062_v42, %v1061_v16  ;;  %v3407_v57 = vunpack.i.h.bf16 %v4679_v13  ;;  %v3417_v9 = vunpack.i.h.bf16 %v4687_v19 }
 0x396   : > { %3854 = vrot.lane.b32.xlu0 %v4819_v33, %s4087_s23  ;;  %v3416_v13 = vunpack.i.l.bf16 %v4687_v19 }
 0x397   : > { %2984 = vmatpush1.bf16.msra.mxu0 %v2983_v18  ;;  %3014 = vmatprep.subr.bf16.mxu1 %v3013_v39 }
 0x398   : > { %3859 = vrot.lane.b32.xlu1 %v4823_v34, %s4087_s23  ;;  %v5105_v60 = vpop.permute.xlu0 %3559  ;;  %3016 = vmatpush1.bf16.msra.mxu1 %v3015_v43  ;;  %v3421_v43 = vunpack.i.l.bf16 %v4689_v20 }
 0x399   : > { %v5107_v37 = vpop.permute.xlu1 %3579 }
 0x39a   : > { %3864 = vrot.lane.b32.xlu0 %v4847_v46, %s4086_s20 }
 0x39c   : > { %3879 = vrot.lane.b32.xlu1 %v4851_v47, %s4086_s20  ;;  %v5113_v6 = vpop.permute.xlu0 %3584 }
 0x39d   : > { %v3610_v7 = vpop.permute.xlu1 %3609 }
 0x39e   : > { %3869 = vrot.lane.b32.xlu0 %v4847_v46, %s4087_s23  ;;  %v3612_v36 = vunpack.i.h.bf16 %v3610_v7  ;;  %v3611_v52 = vunpack.i.l.bf16 %v3610_v7  ;;  %v3422_v7 = vunpack.i.h.bf16 %v4689_v20  ;;  %v5162_v20 = vsel %vm1270_vm7, %v3411_v51, %v3406_v12 }
 0x3a0   : > { %3884 = vrot.lane.b32.xlu1 %v4851_v47, %s4087_s23  ;;  %v3590_v11 = vpop.permute.xlu0 %3589  ;;  %s6221_s23 = scalar_lea.hbm %s6273_s7, %s2800_s21 }
 0x3a1   : > { %v3592_v2 = vunpack.i.h.bf16 %v3590_v11  ;;  %v3591_v56 = vunpack.i.l.bf16 %v3590_v11  ;;  %v5123_v49 = vpop.permute.xlu1 %3614  ;;  %v3427_v11 = vunpack.i.h.bf16 %v4691_v21 }
 0x3a2   : > { %3874 = vrot.lane.b32.xlu0 %v4937_v48, %s4088_s15 }
 0x3a3   : > { %v1079_v14 = vsel %vm1050_vm4, %v3611_v52, %v3591_v56  ;;  %v1080_v16 = vsel %vm1050_vm4, %v3612_v36, %v3592_v2  ;;  %v1063_v42 = vsel %vm1050_vm4, %v3591_v56, %v3611_v52  ;;  %v1064_v18 = vsel %vm1050_vm4, %v3592_v2, %v3612_v36 }
 0x3a4   : > { %v3019_v39 = vpack.c.bf16 %v1080_v16, %v1079_v14  ;;  %3889 = vrot.lane.b32.xlu1 %v4917_v59, %s4088_s15  ;;  %v5141_v19 = vpop.permute.xlu0 %3594  ;;  %v3017_v48 = vpack.c.bf16 %v1064_v18, %v1063_v42  ;;  %v5149_v52 = vsel %vm1270_vm7, %v3406_v12, %v3411_v51  ;;  %v5153_v36 = vsel %vm1270_vm7, %v3407_v57, %v3412_v58 }
 0x3a5   : > { %v5145_v10 = vpop.permute.xlu1 %3619  ;;  %v3426_v2 = vunpack.i.l.bf16 %v4691_v21  ;;  %v3432_v59 = vunpack.i.h.bf16 %v4693_v22  ;;  %v3431_v56 = vunpack.i.l.bf16 %v4693_v22  ;;  %v5166_v14 = vsel %vm1270_vm7, %v3412_v58, %v3407_v57 }
 0x3a6   : > { %6365 = vst [vmem:[#allocation48_spill] sm:$0xff] %v5145_v10  ;;  %3018 = vmatprep.subr.bf16.mxu1 %v3017_v48  ;;  %3894 = vrot.lane.b32.xlu0 %v4965_v55, %s4088_s15  ;;  %v5170_v21 = vsel %vm1490_vm5, %v3421_v43, %v3416_v13  ;;  %v5178_v55 = vsel %vm1490_vm5, %v3422_v7, %v3417_v9  ;;  %v3436_v18 = vunpack.i.l.bf16 %v4695_v23  ;;  %v3586_v42 = vunpack.i.l.bf16 %v5113_v6 }
 0x3a7   : > { %3020 = vmatpush1.bf16.msra.mxu1 %v3019_v39  ;;  %v5184_v57 = vsel %vm1490_vm5, %v3416_v13, %v3421_v43  ;;  %v5188_v58 = vsel %vm1490_vm5, %v3417_v9, %v3422_v7  ;;  %v5196_v16 = vsel %vm1270_vm7, %v3432_v59, %v3427_v11  ;;  %v3437_v13 = vunpack.i.h.bf16 %v4695_v23 }
 0x3a8   : > { %3899 = vrot.lane.b32.xlu1 %v4953_v17, %s4088_s15  ;;  %v5174_v22 = vpop.permute.xlu0 %3599  ;;  %v5192_v17 = vsel %vm1270_vm7, %v3431_v56, %v3426_v2  ;;  %v3442_v9 = vunpack.i.h.bf16 %v4697_v24  ;;  %v3441_v43 = vunpack.i.l.bf16 %v4697_v24  ;;  %v3587_v23 = vunpack.i.h.bf16 %v5113_v6 }
 0x3a9   : > { %6366 = vst [vmem:[#allocation49_spill] sm:$0xff] %v5174_v22  ;;  %v3625_v12 = vpop.permute.xlu1 %3624  ;;  %v5233_v48 = vsel %vm1270_vm7, %v3427_v11, %v3432_v59  ;;  %v3446_v59 = vunpack.i.l.bf16 %v4699_v26 }
 0x3aa   : > { %3904 = vrot.lane.b32.xlu0 %v4993_v35, %s4088_s15  ;;  %v5212_v35 = vsel %vm1270_vm7, %v3426_v2, %v3431_v56  ;;  %v3627_v10 = vunpack.i.h.bf16 %v3625_v12 }
 0x3ac   : > { %3909 = vrot.lane.b32.xlu1 %v4981_v41, %s4088_s15  ;;  %v3605_v39 = vpop.permute.xlu0 %3604  ;;  %v3626_v41 = vunpack.i.l.bf16 %v3625_v12 }
 0x3ad   : > { %v3607_v51 = vunpack.i.h.bf16 %v3605_v39  ;;  %v3606_v24 = vunpack.i.l.bf16 %v3605_v39  ;;  %v3650_v50 = vpop.permute.xlu1 %3649  ;;  %v3447_v39 = vunpack.i.h.bf16 %v4699_v26 }
 0x3ae   : > { %v3652_v63 = vunpack.i.h.bf16 %v3650_v50  ;;  %v3651_v38 = vunpack.i.l.bf16 %v3650_v50  ;;  %3914 = vrot.lane.b32.xlu0 %v5023_v32, %s4088_s15 }
 0x3af   : > { %v870_v2 = vsel %vm840_vm3, %v3607_v51, %v3587_v23  ;;  %v869_v56 = vsel %vm840_vm3, %v3606_v24, %v3586_v42  ;;  %v853_v7 = vsel %vm840_vm3, %v3586_v42, %v3606_v24  ;;  %v854_v6 = vsel %vm840_vm3, %v3587_v23, %v3607_v51 }
 0x3b0   : > { %v2987_v12 = vpack.c.bf16 %v870_v2, %v869_v56  ;;  %3919 = vrot.lane.b32.xlu1 %v5009_v45, %s4088_s15  ;;  %v3630_v50 = vpop.permute.xlu0 %3629  ;;  %v2985_v32 = vpack.c.bf16 %v854_v6, %v853_v7  ;;  %v872_v40 = vsel %vm840_vm3, %v3652_v63, %v3627_v10  ;;  %v855_v51 = vsel %vm840_vm3, %v3626_v41, %v3651_v38 }
 0x3b1   : > { %v3632_v22 = vunpack.i.h.bf16 %v3630_v50  ;;  %v3631_v42 = vunpack.i.l.bf16 %v3630_v50  ;;  %v3655_v24 = vpop.permute.xlu1 %3654  ;;  %v871_v23 = vsel %vm840_vm3, %v3651_v38, %v3626_v41  ;;  %v856_v11 = vsel %vm840_vm3, %v3627_v10, %v3652_v63 }
 0x3b2   : > { %v3657_v2 = vunpack.i.h.bf16 %v3655_v24  ;;  %v3656_v45 = vunpack.i.l.bf16 %v3655_v24  ;;  %2986 = vmatprep.subr.bf16.mxu0 %v2985_v32  ;;  %3924 = vrot.lane.b32.xlu0 %v4763_v54, %s4088_s15  ;;  %v3452_v7 = vunpack.i.h.bf16 %v4701_v27  ;;  %v3451_v56 = vunpack.i.l.bf16 %v4701_v27 }
 0x3b3   : > { %2988 = vmatpush1.bf16.msra.mxu0 %v2987_v12  ;;  %v2989_v6 = vpack.c.bf16 %v856_v11, %v855_v51  ;;  %v5262_v27 = vsel %vm1490_vm5, %v3441_v43, %v3436_v18  ;;  %v2991_v10 = vpack.c.bf16 %v872_v40, %v871_v23  ;;  %v1494_v40 = vsel %vm1490_vm5, %v3437_v13, %v3442_v9 }
 0x3b4   : > { %v1082_v38 = vsel %vm1050_vm4, %v3657_v2, %v3632_v22  ;;  %v1081_v41 = vsel %vm1050_vm4, %v3656_v45, %v3631_v42  ;;  %3929 = vrot.lane.b32.xlu1 %v4767_v25, %s4088_s15  ;;  %v5254_v54 = vpop.permute.xlu0 %3634  ;;  %v1065_v26 = vsel %vm1050_vm4, %v3631_v42, %v3656_v45  ;;  %v1066_v63 = vsel %vm1050_vm4, %v3632_v22, %v3657_v2 }
 0x3b5   : > { %v3023_v12 = vpack.c.bf16 %v1082_v38, %v1081_v41  ;;  %2990 = vmatprep.subr.bf16.mxu0 %v2989_v6  ;;  %v5264_v50 = vpop.permute.xlu1 %3659  ;;  %v3021_v32 = vpack.c.bf16 %v1066_v63, %v1065_v26  ;;  %v5268_v25 = vsel %vm1490_vm5, %v3442_v9, %v3437_v13  ;;  %v3029_v22 = vpack.c.bf16 %v5233_v48, %v5212_v35 }
 0x3b6   : > { %3934 = vrot.lane.b32.xlu0 %v4791_v61, %s4088_s15  ;;  %v1493_v42 = vsel %vm1490_vm5, %v3436_v18, %v3441_v43  ;;  %v3457_v24 = vunpack.i.h.bf16 %v4703_v28  ;;  %v3456_v51 = vunpack.i.l.bf16 %v4703_v28  ;;  %v3462_v23 = vunpack.i.h.bf16 %v4705_v29  ;;  %v873_v61 = vld [vmem:[%s6272_s6] sm:$0xff] }
 0x3b7   : > { %v3461_v2 = vunpack.i.l.bf16 %v4705_v29  ;;  %2992 = vmatpush1.bf16.msra.mxu0 %v2991_v10  ;;  %3022 = vmatprep.subr.bf16.mxu1 %v3021_v32  ;;  %v2752_v28 = vld [vmem:[%s6272_s6 + $0x20] sm:$0xff]  ;;  %v3031_v13 = vpack.c.bf16 %v5196_v16, %v5192_v17  ;;  %v1275_v29 = vsel %vm1270_vm7, %v3446_v59, %v3451_v56  ;;  %v1276_v9 = vsel %vm1270_vm7, %v3447_v39, %v3452_v7 }
 0x3b8   : > { %3939 = vrot.lane.b32.xlu1 %v4795_v62, %s4088_s15  ;;  %v5287_v18 = vpop.permute.xlu0 %3639  ;;  %3024 = vmatpush1.bf16.msra.mxu1 %v3023_v12  ;;  %v3467_v43 = vunpack.i.h.bf16 %v4707_v30  ;;  %v3466_v62 = vunpack.i.l.bf16 %v4707_v30  ;;  %v3472_v48 = vunpack.i.h.bf16 %v4709_v31  ;;  %v3471_v35 = vunpack.i.l.bf16 %v4709_v31 }
 0x3b9   : > { %v6367_v45 = vpack.c.bf16 %v5153_v36, %v5149_v52  ;;  %v5305_v11 = vpop.permute.xlu1 %3669  ;;  %v6368_v17 = vpack.c.bf16 %v5188_v58, %v5184_v57  ;;  %v1291_v16 = vsel %vm1270_vm7, %v3451_v56, %v3446_v59  ;;  %v1292_v30 = vsel %vm1270_vm7, %v3452_v7, %v3447_v39 }
 0x3ba   : > { %3944 = vrot.lane.b32.xlu0 %v4819_v33, %s4088_s15  ;;  %942 = vmatmul.mubr.f32.vlgmr.msra.gmra.mrb[16].mxu0 %v873_v61  ;;  %v3061_v31 = vpack.c.bf16 %v1494_v40, %v1493_v42  ;;  %v5318_v52 = vsel %vm1490_vm5, %v3461_v2, %v3456_v51  ;;  %v5322_v36 = vsel %vm1490_vm5, %v3462_v23, %v3457_v24  ;;  %v3516_v33 = vunpack.i.l.bf16 %v5051_v0 }
 0x3bb   : > { %3026 = vmatprep.subr.bf16.mxu0 %v6367_v45  ;;  %3058 = vmatprep.subr.bf16.mxu1 %v6368_v17  ;;  %v6369_v57 = vpack.c.bf16 %v5166_v14, %v5162_v20  ;;  %v3063_v58 = vpack.c.bf16 %v5268_v25, %v5262_v27  ;;  %v3033_v59 = vpack.c.bf16 %v1276_v9, %v1275_v29  ;;  %v3517_v20 = vunpack.i.h.bf16 %v5051_v0 }
 0x3bc   : > { %1153 = vmatmul.mubr.f32.vlgmr.msra.gmra.mrb[24].mxu1 %v2752_v28  ;;  %3949 = vrot.lane.b32.xlu1 %v4823_v34, %s4088_s15  ;;  %v5332_v39 = vpop.permute.xlu0 %3644  ;;  %v1495_v7 = vsel %vm1490_vm5, %v3456_v51, %v3461_v2  ;;  %v1496_v56 = vsel %vm1490_vm5, %v3457_v24, %v3462_v23  ;;  %v6370_v14 = vpack.c.bf16 %v5178_v55, %v5170_v21  ;;  %v6371_v26 = vmov 0.0   ;;  %v874_v55 = vld [vmem:[%s6272_s6 + $0x8] sm:$0xff] }
 0x3bd   : > { %3028 = vmatpush1.bf16.msra.mxu0 %v6369_v57  ;;  %v5342_v6 = vpop.permute.xlu1 %3679  ;;  %v3035_v38 = vpack.c.bf16 %v1292_v30, %v1291_v16  ;;  %v1277_v34 = vsel %vm1270_vm7, %v3466_v62, %v3471_v35  ;;  %v1278_v41 = vsel %vm1270_vm7, %v3467_v43, %v3472_v48  ;;  %947 = vmatprep.mubr.f32.mxu0 %v6371_v26  ;;  %v3536_v0 = vunpack.i.l.bf16 %v5037_v15 }
 0x3be   : > { %3030 = vmatprep.subr.bf16.mxu0 %v3029_v22  ;;  %3060 = vmatpush1.bf16.msra.mxu1 %v6370_v14  ;;  %v1293_v63 = vsel %vm1270_vm7, %v3471_v35, %v3466_v62  ;;  %v3522_v27 = vunpack.i.h.bf16 %v5059_v5  ;;  %v3521_v21 = vunpack.i.l.bf16 %v5059_v5  ;;  %v1294_v10 = vsel %vm1270_vm7, %v3472_v48, %v3467_v43  ;;  %v2753_v5 = vld [vmem:[%s6272_s6 + $0x28] sm:$0xff]  ;;  %v2754_v48 = vld [vmem:[%s6272_s6 + $0x30] sm:$0xff] }
 0x3bf   : > { %3062 = vmatprep.subr.bf16.mxu1 %v3061_v31  ;;  %3954 = vrot.lane.b32.xlu0 %v4847_v46, %s4088_s15  ;;  %v3537_v12 = vunpack.i.h.bf16 %v5037_v15  ;;  %v3065_v32 = vpack.c.bf16 %v1496_v56, %v1495_v7  ;;  %v3067_v25 = vpack.c.bf16 %v5322_v36, %v5318_v52  ;;  %v5370_v46 = vsel %vm1270_vm7, %v3536_v0, %v3516_v33 }
 0x3c0   : > { %1158 = vmatprep.mubr.f32.mxu1 %v6371_v26  ;;  %v3542_v22 = vunpack.i.h.bf16 %v5053_v8  ;;  %v3541_v42 = vunpack.i.l.bf16 %v5053_v8  ;;  %3959 = vrot.lane.b32.xlu1 %v4851_v47, %s4088_s15  ;;  %v5376_v15 = vpop.permute.xlu0 %3664  ;;  %v3037_v40 = vpack.c.bf16 %v1278_v41, %v1277_v34  ;;  %v1279_v23 = vsel %vm1270_vm7, %v3516_v33, %v3536_v0  ;;  %v6373_v41 = vld [vmem:[#allocation49_spill] sm:$0xff]  ;;  %s4009_s15 = scalar_lea.vmem %s6216_s18, 1024 }
 0x3c1   : > { %3032 = vmatpush1.bf16.msra.mxu0 %v3031_v13  ;;  %v5380_v24 = vsel %vm1270_vm7, %v3537_v12, %v3517_v20  ;;  %v5382_v51 = vpop.permute.xlu1 %3689  ;;  %v1280_v8 = vsel %vm1270_vm7, %v3517_v20, %v3537_v12  ;;  %v3557_v61 = vunpack.i.h.bf16 %v5093_v1  ;;  %v3577_v28 = vunpack.i.h.bf16 %v5099_v53  ;;  %1159 = vmatmul.mubr.f32.gmra.mrb[26].mxu1 %v2753_v5  ;;  %v875_v13 = vld [vmem:[%s6272_s6 + $0x10] sm:$0xff]  ;;  %v6377_v12 = vld [vmem:[#allocation44_spill] sm:$0xff]  ;;  %p4010_p6 = scmp.ne.s32.totalorder %s6216_s18, %s4009_s15  ;;  %p4017_p10 = scmp.lt.s32.totalorder %s4015_s8, %s4009_s15 }
 0x3c2   : > { %3034 = vmatprep.subr.bf16.mxu0 %v3033_v59  ;;  %3064 = vmatpush1.bf16.msra.mxu1 %v3063_v58  ;;  %v5390_v47 = vsel %vm1490_vm5, %v3541_v42, %v3521_v21  ;;  %v5394_v2 = vsel %vm1490_vm5, %v3542_v22, %v3522_v27  ;;  %v3556_v29 = vunpack.i.l.bf16 %v5093_v1  ;;  %v3576_v9 = vunpack.i.l.bf16 %v5099_v53  ;;  %v876_v58 = vld [vmem:[%s6272_s6 + $0x18] sm:$0xff] }
 0x3c3   : > { %948 = vmatmul.mubr.f32.gmra.mrb[18].mxu0 %v874_v55  ;;  %3066 = vmatprep.subr.bf16.mxu1 %v3065_v32  ;;  %v1499_v43 = vsel %vm1490_vm5, %v3521_v21, %v3541_v42  ;;  %v1500_v62 = vsel %vm1490_vm5, %v3522_v27, %v3542_v22  ;;  %v3562_v35 = vunpack.i.h.bf16 %v5105_v60  ;;  %v3561_v45 = vunpack.i.l.bf16 %v5105_v60  ;;  %v6374_v27 = vld [vmem:[#allocation9_spill] sm:$0xff]  ;;  %v6375_v21 = vld [vmem:[#allocation8_spill] sm:$0xff]  ;;  %p4011_p12 = pnand %p4010_p6, %p6427_p11  ;;  %p4018_p0 = por %p4017_p10, %p4016_p8 }
 0x3c4   : > { %953 = vmatprep.mubr.f32.mxu0 %v6371_v26  ;;  %v3582_v1 = vunpack.i.h.bf16 %v5107_v37  ;;  %v3581_v53 = vunpack.i.l.bf16 %v5107_v37  ;;  %v5415_v17 = vpop.permute.xlu0 %3674  ;;  %1164 = vmatprep.mubr.f32.mxu1 %v6371_v26  ;;  %v3043_v16 = vpack.c.bf16 %v5380_v24, %v5370_v46  ;;  %v3039_v31 = vpack.c.bf16 %v1294_v10, %v1293_v63  ;;  %v6378_v46 = vld [vmem:[#allocation48_spill] sm:$0xff] }
 0x3c5   : > { %3036 = vmatpush1.bf16.msra.mxu0 %v3035_v38  ;;  %v5420_v30 = vpop.permute.xlu1 %3699  ;;  %v3041_v52 = vpack.c.bf16 %v1280_v8, %v1279_v23  ;;  %v3075_v60 = vpack.c.bf16 %v5394_v2, %v5390_v47  ;;  %v1298_v37 = vsel %vm1270_vm7, %v3577_v28, %v3557_v61  ;;  %v6372_v36 = vpack.c.bf16 %v4739_v4, %v4735_v3  ;;  %v2755_v3 = vld [vmem:[%s6272_s6 + $0x38] sm:$0xff]  ;;  %p4012_p13 = pneg %p4011_p12 }
 0x3c6   : > { %3038 = vmatprep.subr.bf16.mxu0 %v3037_v40  ;;  %3068 = vmatpush1.bf16.msra.mxu1 %v3067_v25  ;;  %v3073_v57 = vpack.c.bf16 %v1500_v62, %v1499_v43  ;;  %v3597_v33 = vunpack.i.h.bf16 %v5141_v19  ;;  %v3596_v59 = vunpack.i.l.bf16 %v5141_v19  ;;  %v1281_v7 = vsel %vm1270_vm7, %v3556_v29, %v3576_v9 }
 0x3c7   : > { %954 = vmatmul.mubr.f32.gmra.mrb[20].mxu0 %v875_v13  ;;  %3070 = vmatprep.subr.bf16.mxu1 %v6372_v36  ;;  %v1282_v56 = vsel %vm1270_vm7, %v3557_v61, %v3577_v28  ;;  %v1297_v4 = vsel %vm1270_vm7, %v3576_v9, %v3556_v29  ;;  %v1501_v19 = vsel %vm1490_vm5, %v3561_v45, %v3581_v53  ;;  %v3617_v38 = vunpack.i.h.bf16 %v5123_v49  ;;  %v6379_v28 = vld [vmem:[#allocation47_spill] sm:$0xff]  ;;  %p4019_p2 = pnand %p4018_p0, %p4012_p13 }
 0x3c8   : > { %1165 = vmatmul.mubr.f32.gmra.mrb[28].mxu1 %v2754_v48  ;;  %959 = vmatprep.mubr.f32.mxu0 %v6371_v26  ;;  %v5444_v20 = vpop.permute.xlu0 %3684  ;;  %v1502_v14 = vsel %vm1490_vm5, %v3562_v35, %v3582_v1  ;;  %v3616_v34 = vunpack.i.l.bf16 %v5123_v49  ;;  %v3602_v63 = vunpack.i.h.bf16 %v6373_v41  ;;  %v3601_v0 = vunpack.i.l.bf16 %v6373_v41  ;;  %v6381_v41 = vld [vmem:[#allocation31_spill] sm:$0xff] }
 0x3c9   : > { %3040 = vmatpush1.bf16.msra.mxu0 %v3039_v31  ;;  %1170 = vmatprep.mubr.f32.mxu1 %v6371_v26  ;;  %v6376_v55 = vpack.c.bf16 %v6374_v27, %v6375_v21  ;;  %v5458_v10 = vpop.permute.xlu1 %3714  ;;  %v3497_v32 = vunpack.i.h.bf16 %v6377_v12  ;;  %v1518_v25 = vsel %vm1490_vm5, %v3582_v1, %v3562_v35  ;;  %v1517_v5 = vsel %vm1490_vm5, %v3581_v53, %v3561_v45 }
 0x3ca   : > { %3042 = vmatprep.subr.bf16.mxu0 %v3041_v52  ;;  %v3045_v49 = vpack.c.bf16 %v1282_v56, %v1281_v7  ;;  %v3622_v22 = vunpack.i.h.bf16 %v6378_v46  ;;  %v3621_v42 = vunpack.i.l.bf16 %v6378_v46  ;;  %v1283_v40 = vsel %vm1270_vm7, %v3596_v59, %v3616_v34 }
 0x3cb   : > { %3072 = vmatpush1.bf16.msra.mxu1 %v6376_v55  ;;  %960 = vmatmul.mubr.f32.gmra.mrb[22].mxu0 %v876_v58  ;;  %v1284_v24 = vsel %vm1270_vm7, %v3597_v33, %v3617_v38  ;;  %v3496_v23 = vunpack.i.l.bf16 %v6377_v12  ;;  %v1299_v8 = vsel %vm1270_vm7, %v3616_v34, %v3596_v59  ;;  %v1300_v47 = vsel %vm1270_vm7, %v3617_v38, %v3597_v33  ;;  %v6380_v34 = vld [vmem:[#allocation30_spill] sm:$0xff]  ;;  %v2762_v12 = vld [vmem:[%s6272_s6 + $0x60] sm:$0xff] }
 0x3cc   : > { %3074 = vmatprep.subr.bf16.mxu1 %v3073_v57  ;;  %1171 = vmatmul.mubr.f32.gmra.mrb[30].mxu1 %v2755_v3  ;;  %v5477_v2 = vpop.permute.xlu0 %3694  ;;  %v3077_v61 = vpack.c.bf16 %v1502_v14, %v1501_v19  ;;  %v3502_v13 = vunpack.i.h.bf16 %v6379_v28  ;;  %v3047_v29 = vpack.c.bf16 %v1298_v37, %v1297_v4  ;;  %v1503_v43 = vsel %vm1490_vm5, %v3601_v0, %v3621_v42 }
 0x3cd   : > { %3044 = vmatpush1.bf16.msra.mxu0 %v3043_v16  ;;  %1372 = vmatprep.mubr.f32.mxu0 %v6371_v26  ;;  %v3725_v9 = vpop.permute.xlu1 %3724  ;;  %v1504_v62 = vsel %vm1490_vm5, %v3602_v63, %v3622_v22  ;;  %v3641_v48 = vunpack.i.l.bf16 %v5287_v18  ;;  %v3049_v1 = vpack.c.bf16 %v1284_v24, %v1283_v40  ;;  %v3501_v53 = vunpack.i.l.bf16 %v6379_v28  ;;  %v2757_v24 = vld [vmem:[%s6272_s6 + $0x40] sm:$0xff] }
 0x3ce   : > { %3046 = vmatprep.subr.bf16.mxu0 %v3045_v49  ;;  %1592 = vmatprep.mubr.f32.mxu1 %v6371_v26  ;;  %v3727_v35 = vunpack.i.h.bf16 %v3725_v9  ;;  %v3726_v45 = vunpack.i.l.bf16 %v3725_v9  ;;  %v3079_v16 = vpack.c.bf16 %v1518_v25, %v1517_v5  ;;  %v3051_v31 = vpack.c.bf16 %v1300_v47, %v1299_v8  ;;  %v6382_v8 = vld [vmem:[#allocation32_spill] sm:$0xff]  ;;  %v6383_v47 = vld [vmem:[#allocation33_spill] sm:$0xff]  ;;  %v6385_v9 = vld [vmem:[#allocation35_spill] sm:$0xff] }
 0x3cf   : > { %3076 = vmatpush1.bf16.msra.mxu1 %v3075_v60  ;;  %v3642_v52 = vunpack.i.h.bf16 %v5287_v18  ;;  %v1519_v60 = vsel %vm1490_vm5, %v3621_v42, %v3601_v0  ;;  %v1520_v37 = vsel %vm1490_vm5, %v3622_v22, %v3602_v63  ;;  %v3081_v57 = vpack.c.bf16 %v1504_v62, %v1503_v43 }
 0x3d0   : > { %3078 = vmatprep.subr.bf16.mxu1 %v3077_v61  ;;  %v5492_v36 = vpop.permute.xlu0 %3704  ;;  %v1285_v58 = vsel %vm1270_vm7, %v3641_v48, %v3726_v45  ;;  %v3647_v33 = vunpack.i.h.bf16 %v5332_v39  ;;  %v3646_v59 = vunpack.i.l.bf16 %v5332_v39  ;;  %v1301_v3 = vsel %vm1270_vm7, %v3726_v45, %v3641_v48 }
 0x3d1   : > { %3048 = vmatpush1.bf16.msra.mxu0 %v3047_v29  ;;  %v1302_v18 = vsel %vm1270_vm7, %v3727_v35, %v3642_v52  ;;  %v3730_v7 = vpop.permute.xlu1 %3729  ;;  %v1286_v56 = vsel %vm1270_vm7, %v3642_v52, %v3727_v35  ;;  %v3083_v38 = vpack.c.bf16 %v1520_v37, %v1519_v60  ;;  %v3089_v39 = vpack.c.bf16 %v6381_v41, %v6380_v34  ;;  %v6384_v29 = vld [vmem:[#allocation34_spill] sm:$0xff]  ;;  %v6389_v52 = vld [vmem:[#allocation36_spill] sm:$0xff]  ;;  %v6390_v60 = vld [vmem:[#allocation37_spill] sm:$0xff] }
 0x3d2   : > { %3050 = vmatprep.subr.bf16.mxu0 %v3049_v1  ;;  %v3732_v4 = vunpack.i.h.bf16 %v3730_v7  ;;  %v3731_v19 = vunpack.i.l.bf16 %v3730_v7  ;;  %v3053_v14 = vpack.c.bf16 %v1286_v56, %v1285_v58  ;;  %v3055_v25 = vpack.c.bf16 %v1302_v18, %v1301_v3  ;;  %v6392_v58 = vld [vmem:[#allocation39_spill] sm:$0xff]  ;;  %v6393_v3 = vld [vmem:[#allocation40_spill] sm:$0xff]  ;;  %v6396_v41 = vld [vmem:[#allocation10_spill] sm:$0xff] }
 0x3d3   : > { %3080 = vmatpush1.bf16.msra.mxu1 %v3079_v16  ;;  %v5520_v22 = vsel %vm1812_vm6, %v3496_v23, %v3501_v53  ;;  %v5526_v42 = vsel %vm1812_vm6, %v3497_v32, %v3502_v13  ;;  %v1831_v40 = vsel %vm1812_vm6, %v3501_v53, %v3496_v23  ;;  %v3091_v61 = vpack.c.bf16 %v6383_v47, %v6382_v8  ;;  %v6387_v53 = vld [vmem:[#allocation12_spill] sm:$0xff] }
 0x3d4   : > { %3082 = vmatprep.subr.bf16.mxu1 %v3081_v57  ;;  %v1522_v63 = vsel %vm1490_vm5, %v3732_v4, %v3647_v33  ;;  %v1521_v0 = vsel %vm1490_vm5, %v3731_v19, %v3646_v59  ;;  %v5510_v27 = vpop.permute.xlu0 %3709  ;;  %v1505_v21 = vsel %vm1490_vm5, %v3646_v59, %v3731_v19  ;;  %v1506_v55 = vsel %vm1490_vm5, %v3647_v33, %v3732_v4  ;;  %v6391_v57 = vld [vmem:[#allocation38_spill] sm:$0xff]  ;;  %v6394_v4 = vld [vmem:[#allocation41_spill] sm:$0xff] }
 0x3d5   : > { %3052 = vmatpush1.bf16.msra.mxu0 %v3051_v31  ;;  %v3087_v5 = vpack.c.bf16 %v1522_v63, %v1521_v0  ;;  %v5516_v49 = vpop.permute.xlu1 %3734  ;;  %v3085_v46 = vpack.c.bf16 %v1506_v55, %v1505_v21  ;;  %v1832_v28 = vsel %vm1812_vm6, %v3502_v13, %v3497_v32  ;;  %v3093_v43 = vpack.c.bf16 %v6385_v9, %v6384_v29  ;;  %v6386_v13 = vld [vmem:[#allocation13_spill] sm:$0xff]  ;;  %v6398_v21 = vld [vmem:[#allocation42_spill] sm:$0xff]  ;;  %v6399_v55 = vld [vmem:[#allocation43_spill] sm:$0xff] }
 0x3d6   : > { %3054 = vmatprep.subr.bf16.mxu0 %v3053_v14  ;;  %v3637_v62 = vunpack.i.h.bf16 %v5254_v54  ;;  %v3636_v23 = vunpack.i.l.bf16 %v5254_v54  ;;  %v3662_v48 = vunpack.i.h.bf16 %v5264_v50  ;;  %v3661_v35 = vunpack.i.l.bf16 %v5264_v50  ;;  %v2758_v31 = vld [vmem:[%s6272_s6 + $0x48] sm:$0xff] }
 0x3d7   : > { %3084 = vmatpush1.bf16.msra.mxu1 %v3083_v38  ;;  %v3127_v32 = vpack.c.bf16 %v5526_v42, %v5520_v22  ;;  %v6388_v54 = vpack.c.bf16 %v6386_v13, %v6387_v53  ;;  %v3666_v50 = vunpack.i.l.bf16 %v5376_v15  ;;  %v3125_v16 = vpack.c.bf16 %v1832_v28, %v1831_v40  ;;  %v2763_v0 = vld [vmem:[%s6272_s6 + $0x68] sm:$0xff]  ;;  %v6401_v42 = vld [vmem:[#allocation46_spill] sm:$0xff] }
 0x3d8   : > { %3086 = vmatprep.subr.bf16.mxu1 %v3085_v46  ;;  %v5545_v45 = vpop.permute.xlu0 %3719  ;;  %v3095_v37 = vpack.c.bf16 %v6390_v60, %v6389_v52  ;;  %v3097_v33 = vpack.c.bf16 %v6392_v58, %v6391_v57  ;;  %v3667_v59 = vunpack.i.h.bf16 %v5376_v15  ;;  %v1833_v7 = vsel %vm1812_vm6, %v3661_v35, %v3636_v23  ;;  %v6395_v15 = vld [vmem:[#allocation11_spill] sm:$0xff]  ;;  %v6400_v22 = vld [vmem:[#allocation45_spill] sm:$0xff]  ;;  %v2764_v13 = vld [vmem:[%s6272_s6 + $0x70] sm:$0xff] }
 0x3d9   : > { %3056 = vmatpush1.bf16.msra.mxu0 %v3055_v25  ;;  %v5547_v1 = vpop.permute.xlu1 %3744  ;;  %v1834_v56 = vsel %vm1812_vm6, %v3662_v48, %v3637_v62  ;;  %v3099_v19 = vpack.c.bf16 %v6394_v4, %v6393_v3  ;;  %v3671_v14 = vunpack.i.l.bf16 %v5305_v11  ;;  %v3677_v38 = vunpack.i.h.bf16 %v5415_v17  ;;  %v2760_v52 = vld [vmem:[%s6272_s6 + $0x58] sm:$0xff] }
 0x3da   : > { %3090 = vmatprep.subr.bf16.mxu0 %v3089_v39  ;;  %v3676_v34 = vunpack.i.l.bf16 %v5415_v17  ;;  %v6397_v39 = vpack.c.bf16 %v6395_v15, %v6396_v41  ;;  %v3101_v25 = vpack.c.bf16 %v6399_v55, %v6398_v21  ;;  %v1817_v17 = vsel %vm1812_vm6, %v3636_v23, %v3661_v35  ;;  %v6403_v55 = vld [vmem:[#allocation15_spill] sm:$0xff] }
 0x3db   : > { %3088 = vmatpush1.bf16.msra.mxu1 %v3087_v5  ;;  %v1818_v5 = vsel %vm1812_vm6, %v3637_v62, %v3662_v48  ;;  %v3672_v46 = vunpack.i.h.bf16 %v5305_v11  ;;  %v3103_v40 = vpack.c.bf16 %v6401_v42, %v6400_v22  ;;  %v3681_v8 = vunpack.i.l.bf16 %v5342_v6  ;;  %v2759_v11 = vld [vmem:[%s6272_s6 + $0x50] sm:$0xff] }
 0x3dc   : > { %3122 = vmatprep.subr.bf16.mxu1 %v6388_v54  ;;  %1373 = vmatmul.mubr.f32.vlgmr.msra.gmra.mrb[24].mxu0 %v2757_v24  ;;  %v5567_v18 = vpop.permute.xlu0 %3739  ;;  %v3682_v24 = vunpack.i.h.bf16 %v5342_v6  ;;  %v5600_v47 = vsel %vm1812_vm6, %v3666_v50, %v3671_v14  ;;  %v3686_v6 = vunpack.i.l.bf16 %v5444_v20  ;;  %v1835_v9 = vsel %vm1812_vm6, %v3671_v14, %v3666_v50 }
 0x3dd   : > { %3092 = vmatpush1.bf16.msra.mxu0 %v3091_v61  ;;  %1378 = vmatprep.mubr.f32.mxu0 %v6371_v26  ;;  %v5581_v63 = vpop.permute.xlu1 %3754  ;;  %v3129_v61 = vpack.c.bf16 %v1834_v56, %v1833_v7  ;;  %v5609_v28 = vsel %vm1812_vm6, %v3667_v59, %v3672_v46  ;;  %v3131_v62 = vpack.c.bf16 %v1818_v5, %v1817_v17  ;;  %v3687_v35 = vunpack.i.h.bf16 %v5444_v20 }
 0x3de   : > { %1593 = vmatmul.mubr.f32.vlgmr.msra.gmra.mrb[32].mxu1 %v2762_v12  ;;  %3094 = vmatprep.subr.bf16.mxu0 %v3093_v43  ;;  %v1836_v43 = vsel %vm1812_vm6, %v3672_v46, %v3667_v59  ;;  %v5620_v23 = vsel %vm1812_vm6, %v3676_v34, %v3681_v8  ;;  %v5624_v48 = vsel %vm1812_vm6, %v3677_v38, %v3682_v24  ;;  %v3692_v53 = vunpack.i.h.bf16 %v5382_v51 }
 0x3df   : > { %3124 = vmatpush1.bf16.msra.mxu1 %v6397_v39  ;;  %1598 = vmatprep.mubr.f32.mxu1 %v6371_v26  ;;  %v3691_v54 = vunpack.i.l.bf16 %v5382_v51  ;;  %v3697_v50 = vunpack.i.h.bf16 %v5477_v2  ;;  %v3135_v20 = vpack.c.bf16 %v5609_v28, %v5600_v47  ;;  %v1837_v51 = vsel %vm1812_vm6, %v3681_v8, %v3676_v34  ;;  %v6405_v28 = vld [vmem:[#allocation16_spill] sm:$0xff] }
 0x3e0   : > { %3126 = vmatprep.subr.bf16.mxu1 %v3125_v16  ;;  %1379 = vmatmul.mubr.f32.gmra.mrb[26].mxu0 %v2758_v31  ;;  %v5612_v29 = vpop.permute.xlu0 %3749  ;;  %v3696_v16 = vunpack.i.l.bf16 %v5477_v2  ;;  %v3133_v31 = vpack.c.bf16 %v1836_v43, %v1835_v9  ;;  %v3139_v2 = vpack.c.bf16 %v5624_v48, %v5620_v23  ;;  %v3701_v60 = vunpack.i.l.bf16 %v5420_v30 }
 0x3e1   : > { %3096 = vmatpush1.bf16.msra.mxu0 %v3095_v37  ;;  %1384 = vmatprep.mubr.f32.mxu0 %v6371_v26  ;;  %v5627_v12 = vpop.permute.xlu1 %3764  ;;  %v5651_v37 = vsel %vm1812_vm6, %v3686_v6, %v3691_v54  ;;  %v1838_v58 = vsel %vm1812_vm6, %v3682_v24, %v3677_v38  ;;  %v1839_v7 = vsel %vm1812_vm6, %v3691_v54, %v3686_v6  ;;  %v3711_v14 = vunpack.i.l.bf16 %v5510_v27  ;;  %v6406_v6 = vld [vmem:[#allocation14_spill] sm:$0xff] }
 0x3e2   : > { %1599 = vmatmul.mubr.f32.gmra.mrb[34].mxu1 %v2763_v0  ;;  %3098 = vmatprep.subr.bf16.mxu0 %v3097_v33  ;;  %v5659_v33 = vsel %vm1812_vm6, %v3687_v35, %v3692_v53  ;;  %v1840_v56 = vsel %vm1812_vm6, %v3692_v53, %v3687_v35  ;;  %v5674_v3 = vsel %vm1812_vm6, %v3696_v16, %v3701_v60  ;;  %v3717_v38 = vunpack.i.h.bf16 %v5458_v10  ;;  %v6408_v35 = vld [vmem:[#allocation21_spill] sm:$0xff] }
 0x3e3   : > { %3128 = vmatpush1.bf16.msra.mxu1 %v3127_v32  ;;  %1604 = vmatprep.mubr.f32.mxu1 %v6371_v26  ;;  %v3702_v32 = vunpack.i.h.bf16 %v5420_v30  ;;  %v2765_v30 = vld [vmem:[%s6272_s6 + $0x78] sm:$0xff]  ;;  %v3722_v34 = vunpack.i.h.bf16 %v5545_v45  ;;  %v3721_v15 = vunpack.i.l.bf16 %v5545_v45  ;;  %v3137_v41 = vpack.c.bf16 %v1838_v58, %v1837_v51 }
 0x3e4   : > { %3130 = vmatprep.subr.bf16.mxu1 %v3129_v61  ;;  %1385 = vmatmul.mubr.f32.gmra.mrb[28].mxu0 %v2759_v11  ;;  %v5653_v57 = vpop.permute.xlu0 %3759  ;;  %v3143_v39 = vpack.c.bf16 %v5659_v33, %v5651_v37  ;;  %v3716_v0 = vunpack.i.l.bf16 %v5458_v10  ;;  %v3141_v5 = vpack.c.bf16 %v1840_v56, %v1839_v7  ;;  %v1841_v45 = vsel %vm1812_vm6, %v3701_v60, %v3696_v16  ;;  %v6412_v7 = vld [vmem:[#allocation18_spill] sm:$0xff] }
 0x3e5   : > { %3100 = vmatpush1.bf16.msra.mxu0 %v3099_v19  ;;  %1390 = vmatprep.mubr.f32.mxu0 %v6371_v26  ;;  %v5662_v59 = vpop.permute.xlu1 %3774  ;;  %v5678_v4 = vsel %vm1812_vm6, %v3697_v50, %v3702_v32  ;;  %v3712_v19 = vunpack.i.h.bf16 %v5510_v27  ;;  %v6402_v27 = vld [vmem:[#allocation17_spill] sm:$0xff]  ;;  %v3737_v46 = vunpack.i.h.bf16 %v5516_v49  ;;  %v3736_v22 = vunpack.i.l.bf16 %v5516_v49 }
 0x3e6   : > { %1605 = vmatmul.mubr.f32.gmra.mrb[36].mxu1 %v2764_v13  ;;  %3102 = vmatprep.subr.bf16.mxu0 %v3101_v25  ;;  %v6404_v25 = vpack.c.bf16 %v6402_v27, %v6403_v55  ;;  %v3147_v17 = vpack.c.bf16 %v5678_v4, %v5674_v3  ;;  %v1842_v42 = vsel %vm1812_vm6, %v3702_v32, %v3697_v50  ;;  %v3741_v11 = vunpack.i.l.bf16 %v5567_v18  ;;  %v6409_v13 = vld [vmem:[#allocation19_spill] sm:$0xff] }
 0x3e7   : > { %3132 = vmatpush1.bf16.msra.mxu1 %v3131_v62  ;;  %1610 = vmatprep.mubr.f32.mxu1 %v6371_v26  ;;  %v5708_v24 = vsel %vm2032_vm8, %v3711_v14, %v3716_v0  ;;  %v5712_v8 = vsel %vm2032_vm8, %v3712_v19, %v3717_v38  ;;  %v5716_v49 = vsel %vm2032_vm8, %v3716_v0, %v3711_v14  ;;  %v3706_v62 = vunpack.i.l.bf16 %v5492_v36 }
 0x3e8   : > { %3134 = vmatprep.subr.bf16.mxu1 %v3133_v31  ;;  %1391 = vmatmul.mubr.f32.gmra.mrb[30].mxu0 %v2760_v52  ;;  %v5689_v21 = vpop.permute.xlu0 %3769  ;;  %v5720_v47 = vsel %vm2252_vm9, %v3721_v15, %v3736_v22  ;;  %v5724_v61 = vsel %vm2252_vm9, %v3722_v34, %v3737_v46  ;;  %v6407_v9 = vpack.c.bf16 %v6405_v28, %v6406_v6  ;;  %v3742_v23 = vunpack.i.h.bf16 %v5567_v18 }
 0x3e9   : > { %3104 = vmatpush1.bf16.msra.mxu0 %v3103_v40  ;;  %1715 = vmatprep.mubr.f32.mxu0 %v6371_v26  ;;  %v5700_v10 = vpop.permute.xlu1 %3784  ;;  %v3707_v40 = vunpack.i.h.bf16 %v5492_v36  ;;  %v5732_v43 = vsel %vm2032_vm8, %v3717_v38, %v3712_v19  ;;  %v6410_v53 = vpack.c.bf16 %v6408_v35, %v6409_v13  ;;  %v5743_v54 = vsel %vm2252_vm9, %v3736_v22, %v3721_v15  ;;  %v6414_v38 = vld [vmem:[#allocation25_spill] sm:$0xff]  ;;  %v6421_v13 = vld [vmem:[#allocation27_spill] sm:$0xff] }
 0x3ea   : > { %1611 = vmatmul.mubr.f32.gmra.mrb[38].mxu1 %v2765_v30  ;;  %3106 = vmatprep.subr.bf16.mxu0 %v6404_v25  ;;  %v5747_v50 = vsel %vm2252_vm9, %v3737_v46, %v3722_v34  ;;  %v3155_v16 = vpack.c.bf16 %v5712_v8, %v5708_v24  ;;  %v3751_v18 = vunpack.i.l.bf16 %v5612_v29  ;;  %v3145_v31 = vpack.c.bf16 %v1842_v42, %v1841_v45  ;;  %v6411_v30 = vld [vmem:[#allocation20_spill] sm:$0xff]  ;;  %v6415_v34 = vld [vmem:[#allocation23_spill] sm:$0xff] }
 0x3eb   : > { %3136 = vmatpush1.bf16.msra.mxu1 %v3135_v20  ;;  %1914 = vmatprep.mubr.f32.mxu1 %v6371_v26  ;;  %v3746_v20 = vunpack.i.l.bf16 %v5547_v1  ;;  %v3187_v52 = vpack.c.bf16 %v5724_v61, %v5720_v47  ;;  %v3747_v51 = vunpack.i.h.bf16 %v5547_v1  ;;  %v3752_v60 = vunpack.i.h.bf16 %v5612_v29 }
 0x3ec   : > { %3138 = vmatprep.subr.bf16.mxu1 %v3137_v41  ;;  %v5736_v48 = vpop.permute.xlu0 %3779  ;;  %v3153_v37 = vpack.c.bf16 %v5732_v43, %v5716_v49  ;;  %v3756_v33 = vunpack.i.l.bf16 %v5581_v63  ;;  %v6413_v56 = vpack.c.bf16 %v6411_v30, %v6412_v7  ;;  %v3185_v1 = vpack.c.bf16 %v5747_v50, %v5743_v54 }
 0x3ed   : > { %3108 = vmatpush1.bf16.msra.mxu0 %v6407_v9  ;;  %v5753_v32 = vpop.permute.xlu1 %3794  ;;  %v5763_v58 = vsel %vm2032_vm8, %v3741_v11, %v3746_v20  ;;  %v5774_v29 = vsel %vm2032_vm8, %v3742_v23, %v3747_v51  ;;  %v3767_v19 = vunpack.i.h.bf16 %v5627_v12  ;;  %v6416_v15 = vpack.c.bf16 %v6414_v38, %v6415_v34 }
 0x3ee   : > { %3110 = vmatprep.subr.bf16.mxu0 %v6410_v53  ;;  %v5788_v41 = vsel %vm2032_vm8, %v3747_v51, %v3742_v23  ;;  %v5792_v0 = vsel %vm2252_vm9, %v3751_v18, %v3756_v33  ;;  %v3766_v27 = vunpack.i.l.bf16 %v5627_v12  ;;  %v3762_v55 = vunpack.i.h.bf16 %v5653_v57 }
 0x3ef   : > { %3140 = vmatpush1.bf16.msra.mxu1 %v3139_v2  ;;  %v3757_v2 = vunpack.i.h.bf16 %v5581_v63  ;;  %v5784_v63 = vsel %vm2032_vm8, %v3746_v20, %v3741_v11  ;;  %v3761_v25 = vunpack.i.l.bf16 %v5653_v57  ;;  %v5803_v42 = vsel %vm2252_vm9, %v3756_v33, %v3751_v18  ;;  %v6417_v57 = vld [vmem:[#allocation24_spill] sm:$0xff] }
 0x3f0   : > { %3142 = vmatprep.subr.bf16.mxu1 %v3141_v5  ;;  %v5777_v14 = vpop.permute.xlu0 %3789  ;;  %v3777_v49 = vunpack.i.h.bf16 %v5662_v59  ;;  %v3772_v12 = vunpack.i.h.bf16 %v5689_v21  ;;  %v3771_v11 = vunpack.i.l.bf16 %v5689_v21  ;;  %v3776_v9 = vunpack.i.l.bf16 %v5662_v59  ;;  %v6420_v21 = vld [vmem:[#allocation29_spill] sm:$0xff]  ;;  %v2767_v33 = vld [vmem:[%s6272_s6 + $0x80] sm:$0xff] }
 0x3f1   : > { %3112 = vmatpush1.bf16.msra.mxu0 %v6413_v56  ;;  %v3805_v5 = vpop.permute.xlu1 %3804  ;;  %v5799_v45 = vsel %vm2252_vm9, %v3752_v60, %v3757_v2  ;;  %v5813_v6 = vsel %vm2252_vm9, %v3757_v2, %v3752_v60  ;;  %v6422_v53 = vpack.c.bf16 %v6420_v21, %v6421_v13  ;;  %v5831_v59 = vsel %vm2032_vm8, %v3761_v25, %v3766_v27 }
 0x3f2   : > { %3114 = vmatprep.subr.bf16.mxu0 %v6416_v15  ;;  %v3807_v46 = vunpack.i.h.bf16 %v3805_v5  ;;  %v3806_v22 = vunpack.i.l.bf16 %v3805_v5  ;;  %v5835_v50 = vsel %vm2032_vm8, %v3762_v55, %v3767_v19  ;;  %v5850_v60 = vsel %vm2032_vm8, %v3766_v27, %v3761_v25 }
 0x3f3   : > { %3144 = vmatpush1.bf16.msra.mxu1 %v3143_v39  ;;  %v6418_v39 = vld [vmem:[#allocation22_spill] sm:$0xff]  ;;  %v5854_v2 = vsel %vm2032_vm8, %v3767_v19, %v3762_v55  ;;  %v3191_v3 = vpack.c.bf16 %v5799_v45, %v5792_v0  ;;  %v5860_v36 = vsel %vm2252_vm9, %v3771_v11, %v3776_v9  ;;  %v5864_v4 = vsel %vm2252_vm9, %v3772_v12, %v3777_v49 }
 0x3f4   : > { %3146 = vmatprep.subr.bf16.mxu1 %v3145_v31  ;;  %v6419_v28 = vpack.c.bf16 %v6417_v57, %v6418_v39  ;;  %v1828_v43 = vsel %vm1812_vm6, %v3707_v40, %v3807_v46  ;;  %v1827_v23 = vsel %vm1812_vm6, %v3706_v62, %v3806_v22  ;;  %v5822_v35 = vpop.permute.xlu0 %3799  ;;  %v1843_v54 = vsel %vm1812_vm6, %v3806_v22, %v3706_v62 }
 0x3f5   : > { %v3151_v20 = vpack.c.bf16 %v1828_v43, %v1827_v23  ;;  %v5840_v18 = vpop.permute.xlu1 %3809  ;;  %v1844_v62 = vsel %vm1812_vm6, %v3807_v46, %v3707_v40  ;;  %v3159_v31 = vpack.c.bf16 %v5774_v29, %v5763_v58  ;;  %v6424_v40 = vld [vmem:[#allocation26_spill] sm:$0xff]  ;;  %v3157_v30 = vpack.c.bf16 %v5788_v41, %v5784_v63 }
 0x3f6   : > { %3116 = vmatpush1.bf16.msra.mxu0 %v6419_v28  ;;  %v3149_v51 = vpack.c.bf16 %v1844_v62, %v1843_v54  ;;  %v3163_v7 = vpack.c.bf16 %v5835_v50, %v5831_v59  ;;  %v3782_v56 = vunpack.i.h.bf16 %v5736_v48  ;;  %v3781_v29 = vunpack.i.l.bf16 %v5736_v48  ;;  %v2771_v48 = vld [vmem:[%s6272_s6 + $0xa0] sm:$0xff]  ;;  %v2769_v43 = vld [vmem:[%s6272_s6 + $0x90] sm:$0xff] }
 0x3f7   : > { %3118 = vmatprep.subr.bf16.mxu0 %v6422_v53  ;;  %3148 = vmatpush1.bf16.msra.mxu1 %v3147_v17  ;;  %v6423_v17 = vld [vmem:[#allocation28_spill] sm:$0xff]  ;;  %v3189_v38 = vpack.c.bf16 %v5813_v6, %v5803_v42  ;;  %v3787_v34 = vunpack.i.h.bf16 %v5700_v10  ;;  %v3786_v15 = vunpack.i.l.bf16 %v5700_v10  ;;  %v3791_v63 = vunpack.i.l.bf16 %v5777_v14  ;;  %v2773_v62 = vld [vmem:[%s6272_s6 + $0xb0] sm:$0xff] }
 0x3f8   : > { %v6425_v58 = vpack.c.bf16 %v6423_v17, %v6424_v40  ;;  %3150 = vmatprep.subr.bf16.mxu1 %v3149_v51  ;;  %v5878_v19 = vpop.permute.xlu0 %3814  ;;  %v3161_v27 = vpack.c.bf16 %v5854_v2, %v5850_v60  ;;  %v3792_v55 = vunpack.i.h.bf16 %v5777_v14  ;;  %v2273_v10 = vsel %vm2252_vm9, %v3776_v9, %v3771_v11  ;;  %v2772_v11 = vld [vmem:[%s6272_s6 + $0xa8] sm:$0xff] }
 0x3f9   : > { %v5885_v41 = vpop.permute.xlu1 %3819  ;;  %v2274_v25 = vsel %vm2252_vm9, %v3777_v49, %v3772_v12  ;;  %v3797_v5 = vunpack.i.h.bf16 %v5753_v32  ;;  %v3796_v46 = vunpack.i.l.bf16 %v5753_v32  ;;  %v3801_v22 = vunpack.i.l.bf16 %v5822_v35 }
 0x3fa   : > { %3120 = vmatpush1.bf16.msra.mxu0 %v6425_v58  ;;  %v3811_v42 = vunpack.i.l.bf16 %v5840_v18  ;;  %v5912_v14 = vsel %vm2032_vm8, %v3781_v29, %v3786_v15  ;;  %v5916_v32 = vsel %vm2032_vm8, %v3782_v56, %v3787_v34  ;;  %v3802_v49 = vunpack.i.h.bf16 %v5822_v35 }
 0x3fb   : > { %3154 = vmatprep.subr.bf16.mxu0 %v3153_v37  ;;  %3152 = vmatpush1.bf16.msra.mxu1 %v3151_v20  ;;  %v3195_v37 = vpack.c.bf16 %v5864_v4, %v5860_v36  ;;  %v3812_v12 = vunpack.i.h.bf16 %v5840_v18  ;;  %v5924_v8 = vsel %vm2252_vm9, %v3791_v63, %v3796_v46  ;;  %v2055_v57 = vsel %vm2032_vm8, %v3786_v15, %v3781_v29 }
 0x3fc   : > { %3186 = vmatprep.subr.bf16.mxu1 %v3185_v1  ;;  %v2768_v1 = vld [vmem:[%s6272_s6 + $0x88] sm:$0xff]  ;;  %v5920_v24 = vpop.permute.xlu0 %3824  ;;  %v2056_v39 = vsel %vm2032_vm8, %v3787_v34, %v3782_v56  ;;  %v5941_v28 = vsel %vm2252_vm9, %v3792_v55, %v3797_v5  ;;  %v2275_v47 = vsel %vm2252_vm9, %v3796_v46, %v3791_v63  ;;  %v2276_v61 = vsel %vm2252_vm9, %v3797_v5, %v3792_v55  ;;  %v2774_v34 = vld [vmem:[%s6272_s6 + $0xb8] sm:$0xff] }
 0x3fd   : > { %1716 = vmatmul.mubr.f32.vlgmr.msra.gmra.mrb[32].mxu0 %v2767_v33  ;;  %v3817_v6 = vunpack.i.h.bf16 %v5878_v19  ;;  %v3193_v9 = vpack.c.bf16 %v2274_v25, %v2273_v10  ;;  %v2057_v23 = vsel %vm2032_vm8, %v3811_v42, %v3801_v22  ;;  %v3816_v35 = vunpack.i.l.bf16 %v5878_v19 }
 0x3fe   : > { %3156 = vmatpush1.bf16.msra.mxu0 %v3155_v16  ;;  %1721 = vmatprep.mubr.f32.mxu0 %v6371_v26  ;;  %v5929_v16 = vpop.permute.xlu1 %3829  ;;  %v3822_v21 = vunpack.i.h.bf16 %v5885_v41  ;;  %v3821_v13 = vunpack.i.l.bf16 %v5885_v41  ;;  %v2058_v54 = vsel %vm2032_vm8, %v3812_v12, %v3802_v49  ;;  %v3199_v20 = vpack.c.bf16 %v5941_v28, %v5924_v8 }
 0x3ff   : > { %1915 = vmatmul.mubr.f32.vlgmr.msra.gmra.mrb[40].mxu1 %v2771_v48  ;;  %3158 = vmatprep.subr.bf16.mxu0 %v3157_v30  ;;  %v3197_v51 = vpack.c.bf16 %v2276_v61, %v2275_v47  ;;  %v3827_v60 = vunpack.i.h.bf16 %v5920_v24  ;;  %v3826_v2 = vunpack.i.l.bf16 %v5920_v24  ;;  %v3832_v17 = vunpack.i.h.bf16 %v5929_v16 }
 0x400   : > { %3188 = vmatpush1.bf16.msra.mxu1 %v3187_v52  ;;  %1920 = vmatprep.mubr.f32.mxu1 %v6371_v26  ;;  %v3167_v52 = vpack.c.bf16 %v5916_v32, %v5912_v14  ;;  %v5959_v53 = vpop.permute.xlu0 %3834  ;;  %v3831_v40 = vunpack.i.l.bf16 %v5929_v16  ;;  %v2042_v0 = vsel %vm2032_vm8, %v3802_v49, %v3812_v12  ;;  %v2041_v45 = vsel %vm2032_vm8, %v3801_v22, %v3811_v42 }
 0x401   : > { %3190 = vmatprep.subr.bf16.mxu1 %v3189_v38  ;;  %1722 = vmatmul.mubr.f32.gmra.mrb[34].mxu0 %v2768_v1  ;;  %v3169_v58 = vpack.c.bf16 %v2058_v54, %v2057_v23  ;;  %v2262_v33 = vsel %vm2252_vm9, %v3817_v6, %v3822_v21  ;;  %v2277_v56 = vsel %vm2252_vm9, %v3821_v13, %v3816_v35  ;;  %v3837_v50 = vunpack.i.h.bf16 %v5959_v53 }
 0x402   : > { %3160 = vmatpush1.bf16.msra.mxu0 %v3159_v31  ;;  %1727 = vmatprep.mubr.f32.mxu0 %v6371_v26  ;;  %v5968_v18 = vpop.permute.xlu1 %3839  ;;  %v3165_v31 = vpack.c.bf16 %v2056_v39, %v2055_v57  ;;  %v2278_v59 = vsel %vm2252_vm9, %v3822_v21, %v3817_v6  ;;  %v2261_v15 = vsel %vm2252_vm9, %v3816_v35, %v3821_v13 }
 0x403   : > { %1921 = vmatmul.mubr.f32.gmra.mrb[42].mxu1 %v2772_v11  ;;  %3162 = vmatprep.subr.bf16.mxu0 %v3161_v27  ;;  %v3842_v29 = vunpack.i.h.bf16 %v5968_v18  ;;  %v3841_v19 = vunpack.i.l.bf16 %v5968_v18  ;;  %v2059_v63 = vsel %vm2032_vm8, %v3831_v40, %v3826_v2  ;;  %v2060_v41 = vsel %vm2032_vm8, %v3832_v17, %v3827_v60 }
 0x404   : > { %3192 = vmatpush1.bf16.msra.mxu1 %v3191_v3  ;;  %1926 = vmatprep.mubr.f32.mxu1 %v6371_v26  ;;  %v2770_v3 = vld [vmem:[%s6272_s6 + $0x98] sm:$0xff]  ;;  %v3845_v30 = vpop.permute.xlu0 %3844  ;;  %v2044_v55 = vsel %vm2032_vm8, %v3827_v60, %v3832_v17  ;;  %v3201_v25 = vpack.c.bf16 %v2278_v59, %v2277_v56  ;;  %v2043_v5 = vsel %vm2032_vm8, %v3826_v2, %v3831_v40 }
 0x405   : > { %3194 = vmatprep.subr.bf16.mxu1 %v3193_v9  ;;  %1728 = vmatmul.mubr.f32.gmra.mrb[36].mxu0 %v2769_v43  ;;  %v3847_v36 = vunpack.i.h.bf16 %v3845_v30  ;;  %v3846_v4 = vunpack.i.l.bf16 %v3845_v30  ;;  %v2280_v22 = vsel %vm2252_vm9, %v3842_v29, %v3837_v50  ;;  %v3203_v42 = vpack.c.bf16 %v2262_v33, %v2261_v15 }
 0x406   : > { %3164 = vmatpush1.bf16.msra.mxu0 %v3163_v7  ;;  %1733 = vmatprep.mubr.f32.mxu0 %v6371_v26  ;;  %v3836_v7 = vunpack.i.l.bf16 %v5959_v53  ;;  %v3850_v38 = vpop.permute.xlu1 %3849  ;;  %v3173_v49 = vpack.c.bf16 %v2060_v41, %v2059_v63  ;;  %v3175_v11 = vpack.c.bf16 %v2044_v55, %v2043_v5  ;;  %v2264_v57 = vsel %vm2252_vm9, %v3837_v50, %v3842_v29 }
 0x407   : > { %1927 = vmatmul.mubr.f32.gmra.mrb[44].mxu1 %v2773_v62  ;;  %3166 = vmatprep.subr.bf16.mxu0 %v3165_v31  ;;  %v3852_v48 = vunpack.i.h.bf16 %v3850_v38  ;;  %v3851_v27 = vunpack.i.l.bf16 %v3850_v38 }
 0x408   : > { %3196 = vmatpush1.bf16.msra.mxu1 %v3195_v37  ;;  %1932 = vmatprep.mubr.f32.mxu1 %v6371_v26  ;;  %v3171_v37 = vpack.c.bf16 %v2042_v0, %v2041_v45  ;;  %v3855_v10 = vpop.permute.xlu0 %3854  ;;  %v2279_v46 = vsel %vm2252_vm9, %v3841_v19, %v3836_v7  ;;  %v2263_v39 = vsel %vm2252_vm9, %v3836_v7, %v3841_v19 }
 0x409   : > { %3198 = vmatprep.subr.bf16.mxu1 %v3197_v51  ;;  %1734 = vmatmul.mubr.f32.gmra.mrb[38].mxu0 %v2770_v3  ;;  %v3857_v1 = vunpack.i.h.bf16 %v3855_v10  ;;  %v3856_v14 = vunpack.i.l.bf16 %v3855_v10  ;;  %v2061_v8 = vsel %vm2032_vm8, %v3851_v27, %v3846_v4  ;;  %v2062_v16 = vsel %vm2032_vm8, %v3852_v48, %v3847_v36 }
 0x40a   : > { %3168 = vmatpush1.bf16.msra.mxu0 %v3167_v52  ;;  %2134 = vmatprep.mubr.f32.mxu0 %v6371_v26  ;;  %v3860_v32 = vpop.permute.xlu1 %3859  ;;  %v3205_v47 = vpack.c.bf16 %v2280_v22, %v2279_v46  ;;  %v2046_v61 = vsel %vm2032_vm8, %v3847_v36, %v3852_v48  ;;  %v2045_v52 = vsel %vm2032_vm8, %v3846_v4, %v3851_v27  ;;  %v2776_v27 = vld [vmem:[%s6272_s6 + $0xc0] sm:$0xff] }
 0x40b   : > { %1933 = vmatmul.mubr.f32.gmra.mrb[46].mxu1 %v2774_v34  ;;  %3170 = vmatprep.subr.bf16.mxu0 %v3169_v58  ;;  %v3862_v12 = vunpack.i.h.bf16 %v3860_v32  ;;  %v3861_v24 = vunpack.i.l.bf16 %v3860_v32  ;;  %v3177_v23 = vpack.c.bf16 %v2062_v16, %v2061_v8  ;;  %v3207_v13 = vpack.c.bf16 %v2264_v57, %v2263_v39  ;;  %v2777_v8 = vld [vmem:[%s6272_s6 + $0xc8] sm:$0xff] }
 0x40c   : > { %3200 = vmatpush1.bf16.msra.mxu1 %v3199_v20  ;;  %2354 = vmatprep.mubr.f32.mxu1 %v6371_v26  ;;  %v3865_v28 = vpop.permute.xlu0 %3864  ;;  %v3179_v20 = vpack.c.bf16 %v2046_v61, %v2045_v52 }
 0x40d   : > { %3202 = vmatprep.subr.bf16.mxu1 %v3201_v25  ;;  %v3867_v6 = vunpack.i.h.bf16 %v3865_v28  ;;  %v3866_v9 = vunpack.i.l.bf16 %v3865_v28  ;;  %v2281_v35 = vsel %vm2252_vm9, %v3861_v24, %v3856_v14  ;;  %v2282_v21 = vsel %vm2252_vm9, %v3862_v12, %v3857_v1 }
 0x40e   : > { %3172 = vmatpush1.bf16.msra.mxu0 %v3171_v37  ;;  %v3880_v43 = vpop.permute.xlu1 %3879  ;;  %v2266_v18 = vsel %vm2252_vm9, %v3857_v1, %v3862_v12  ;;  %v2265_v62 = vsel %vm2252_vm9, %v3856_v14, %v3861_v24  ;;  %v3209_v51 = vpack.c.bf16 %v2282_v21, %v2281_v35  ;;  %v2778_v21 = vld [vmem:[%s6272_s6 + $0xd0] sm:$0xff] }
 0x40f   : > { %3174 = vmatprep.subr.bf16.mxu0 %v3173_v49  ;;  %v3882_v53 = vunpack.i.h.bf16 %v3880_v43  ;;  %v3881_v54 = vunpack.i.l.bf16 %v3880_v43  ;;  %v3211_v58 = vpack.c.bf16 %v2266_v18, %v2265_v62 }
 0x410   : > { %3204 = vmatpush1.bf16.msra.mxu1 %v3203_v42  ;;  %v3870_v31 = vpop.permute.xlu0 %3869  ;;  %v2781_v42 = vld [vmem:[%s6272_s6 + $0xe0] sm:$0xff] }
 0x411   : > { %3206 = vmatprep.subr.bf16.mxu1 %v3205_v47  ;;  %v2048_v60 = vsel %vm2032_vm8, %v3867_v6, %v3882_v53  ;;  %v2047_v2 = vsel %vm2032_vm8, %v3866_v9, %v3881_v54  ;;  %v3872_v17 = vunpack.i.h.bf16 %v3870_v31  ;;  %v3871_v40 = vunpack.i.l.bf16 %v3870_v31 }
 0x412   : > { %3176 = vmatpush1.bf16.msra.mxu0 %v3175_v11  ;;  %v3885_v0 = vpop.permute.xlu1 %3884  ;;  %v2063_v45 = vsel %vm2032_vm8, %v3881_v54, %v3866_v9  ;;  %v2064_v3 = vsel %vm2032_vm8, %v3882_v53, %v3867_v6  ;;  %v3183_v59 = vpack.c.bf16 %v2048_v60, %v2047_v2 }
 0x413   : > { %3178 = vmatprep.subr.bf16.mxu0 %v3177_v23  ;;  %v3887_v33 = vunpack.i.h.bf16 %v3885_v0  ;;  %v3886_v30 = vunpack.i.l.bf16 %v3885_v0  ;;  %v3181_v56 = vpack.c.bf16 %v2064_v3, %v2063_v45  ;;  %v2782_v23 = vld [vmem:[%s6272_s6 + $0xe8] sm:$0xff]  ;;  %v2779_v45 = vld [vmem:[%s6272_s6 + $0xd8] sm:$0xff] }
 0x414   : > { %3208 = vmatpush1.bf16.msra.mxu1 %v3207_v13  ;;  %v3875_v50 = vpop.permute.xlu0 %3874 }
 0x415   : > { %3210 = vmatprep.subr.bf16.mxu1 %v3209_v51  ;;  %v2268_v7 = vsel %vm2252_vm9, %v3872_v17, %v3887_v33  ;;  %v2267_v29 = vsel %vm2252_vm9, %v3871_v40, %v3886_v30  ;;  %v3877_v19 = vunpack.i.h.bf16 %v3875_v50  ;;  %v3876_v38 = vunpack.i.l.bf16 %v3875_v50 }
 0x416   : > { %3180 = vmatpush1.bf16.msra.mxu0 %v3179_v20  ;;  %v3215_v34 = vpack.c.bf16 %v2268_v7, %v2267_v29  ;;  %v3890_v15 = vpop.permute.xlu1 %3889  ;;  %v2283_v63 = vsel %vm2252_vm9, %v3886_v30, %v3871_v40  ;;  %v2284_v41 = vsel %vm2252_vm9, %v3887_v33, %v3872_v17  ;;  %v2783_v40 = vld [vmem:[%s6272_s6 + $0xf0] sm:$0xff] }
 0x417   : > { %3182 = vmatprep.subr.bf16.mxu0 %v3181_v56  ;;  %v3892_v36 = vunpack.i.h.bf16 %v3890_v15  ;;  %v3891_v4 = vunpack.i.l.bf16 %v3890_v15  ;;  %v3213_v48 = vpack.c.bf16 %v2284_v41, %v2283_v63 }
 0x418   : > { %3212 = vmatpush1.bf16.msra.mxu1 %v3211_v58  ;;  %v3895_v37 = vpop.permute.xlu0 %3894 }
 0x419   : > { %v2474_v55 = vsel %vm2472_vm10, %v3877_v19, %v3892_v36  ;;  %v2473_v10 = vsel %vm2472_vm10, %v3876_v38, %v3891_v4  ;;  %3214 = vmatprep.subr.bf16.mxu1 %v3213_v48  ;;  %v3897_v25 = vunpack.i.h.bf16 %v3895_v37  ;;  %v3896_v5 = vunpack.i.l.bf16 %v3895_v37 }
 0x41a   : > { %3184 = vmatpush1.bf16.msra.mxu0 %v3183_v59  ;;  %v3219_v46 = vpack.c.bf16 %v2474_v55, %v2473_v10  ;;  %v3900_v22 = vpop.permute.xlu1 %3899  ;;  %v2489_v1 = vsel %vm2472_vm10, %v3891_v4, %v3876_v38  ;;  %v2490_v14 = vsel %vm2472_vm10, %v3892_v36, %v3877_v19 }
 0x41b   : > { %v3902_v32 = vunpack.i.h.bf16 %v3900_v22  ;;  %v3901_v49 = vunpack.i.l.bf16 %v3900_v22  ;;  %v3217_v12 = vpack.c.bf16 %v2490_v14, %v2489_v1 }
 0x41c   : > { %3216 = vmatpush1.bf16.msra.mxu1 %v3215_v34  ;;  %v3905_v24 = vpop.permute.xlu0 %3904  ;;  %v2784_v34 = vld [vmem:[%s6272_s6 + $0xf8] sm:$0xff] }
 0x41d   : > { %2135 = vmatmul.mubr.f32.vlgmr.msra.gmra.mrb[40].mxu0 %v2776_v27  ;;  %v2476_v16 = vsel %vm2472_vm10, %v3897_v25, %v3902_v32  ;;  %v2475_v11 = vsel %vm2472_vm10, %v3896_v5, %v3901_v49  ;;  %3218 = vmatprep.subr.bf16.mxu0 %v3217_v12  ;;  %v3907_v57 = vunpack.i.h.bf16 %v3905_v24  ;;  %v3906_v39 = vunpack.i.l.bf16 %v3905_v24 }
 0x41e   : > { %2140 = vmatprep.mubr.f32.mxu0 %v6371_v26  ;;  %v3223_v28 = vpack.c.bf16 %v2476_v16, %v2475_v11  ;;  %3249 = vmatprep.subr.bf16.mxu1 %v3217_v12  ;;  %v3910_v47 = vpop.permute.xlu1 %3909  ;;  %v2491_v61 = vsel %vm2472_vm10, %v3901_v49, %v3896_v5  ;;  %v2492_v52 = vsel %vm2472_vm10, %v3902_v32, %v3897_v25 }
 0x41f   : > { %2355 = vmatmul.mubr.f32.vlgmr.msra.gmra.mrb[48].mxu1 %v2781_v42  ;;  %3220 = vmatpush1.bf16.msra.mxu0 %v3219_v46  ;;  %v3912_v6 = vunpack.i.h.bf16 %v3910_v47  ;;  %v3911_v9 = vunpack.i.l.bf16 %v3910_v47  ;;  %v3221_v43 = vpack.c.bf16 %v2492_v52, %v2491_v61 }
 0x420   : > { %3257 = vmatpush1.bf16.msra.mxu1 %v3219_v46  ;;  %2360 = vmatprep.mubr.f32.mxu1 %v6371_v26  ;;  %v3915_v35 = vpop.permute.xlu0 %3914 }
 0x421   : > { %2141 = vmatmul.mubr.f32.gmra.mrb[42].mxu0 %v2777_v8  ;;  %v2478_v13 = vsel %vm2472_vm10, %v3907_v57, %v3912_v6  ;;  %v2477_v53 = vsel %vm2472_vm10, %v3906_v39, %v3911_v9  ;;  %3222 = vmatprep.subr.bf16.mxu0 %v3221_v43  ;;  %v3917_v54 = vunpack.i.h.bf16 %v3915_v35  ;;  %v3916_v20 = vunpack.i.l.bf16 %v3915_v35 }
 0x422   : > { %2146 = vmatprep.mubr.f32.mxu0 %v6371_v26  ;;  %3250 = vmatprep.subr.bf16.mxu1 %v3221_v43  ;;  %v3227_v18 = vpack.c.bf16 %v2478_v13, %v2477_v53  ;;  %v3920_v62 = vpop.permute.xlu1 %3919  ;;  %v2493_v31 = vsel %vm2472_vm10, %v3911_v9, %v3906_v39  ;;  %v2494_v51 = vsel %vm2472_vm10, %v3912_v6, %v3907_v57 }
 0x423   : > { %2361 = vmatmul.mubr.f32.gmra.mrb[50].mxu1 %v2782_v23  ;;  %3224 = vmatpush1.bf16.msra.mxu0 %v3223_v28  ;;  %v3922_v60 = vunpack.i.h.bf16 %v3920_v62  ;;  %v3921_v2 = vunpack.i.l.bf16 %v3920_v62  ;;  %v3225_v17 = vpack.c.bf16 %v2494_v51, %v2493_v31  ;;  %v2786_v31 = vld [vmem:[%s6272_s6 + $0x100] sm:$0xff]  ;;  %v2788_v51 = vld [vmem:[%s6272_s6 + $0x110] sm:$0xff] }
 0x424   : > { %3258 = vmatpush1.bf16.msra.mxu1 %v3223_v28  ;;  %2366 = vmatprep.mubr.f32.mxu1 %v6371_v26  ;;  %v3925_v0 = vpop.permute.xlu0 %3924 }
 0x425   : > { %2147 = vmatmul.mubr.f32.gmra.mrb[44].mxu0 %v2778_v21  ;;  %v2480_v3 = vsel %vm2472_vm10, %v3917_v54, %v3922_v60  ;;  %v2479_v58 = vsel %vm2472_vm10, %v3916_v20, %v3921_v2  ;;  %3226 = vmatprep.subr.bf16.mxu0 %v3225_v17  ;;  %v3927_v33 = vunpack.i.h.bf16 %v3925_v0  ;;  %v3926_v30 = vunpack.i.l.bf16 %v3925_v0  ;;  %v966_v0 = vld [vmem:[%s6271_s5] ss:$8 sm:$0x3] }
 0x426   : > { %2152 = vmatprep.mubr.f32.mxu0 %v6371_v26  ;;  %3251 = vmatprep.subr.bf16.mxu1 %v3225_v17  ;;  %v3231_v56 = vpack.c.bf16 %v2480_v3, %v2479_v58  ;;  %v3930_v59 = vpop.permute.xlu1 %3929  ;;  %v2495_v50 = vsel %vm2472_vm10, %v3921_v2, %v3916_v20  ;;  %v2496_v7 = vsel %vm2472_vm10, %v3922_v60, %v3917_v54  ;;  %v2789_v60 = vld [vmem:[%s6272_s6 + $0x118] sm:$0xff]  ;;  %v6426_v2 = vlaneseq }
 0x427   : > { %2367 = vmatmul.mubr.f32.gmra.mrb[52].mxu1 %v2783_v40  ;;  %3228 = vmatpush1.bf16.msra.mxu0 %v3227_v18  ;;  %v3932_v29 = vunpack.i.h.bf16 %v3930_v59  ;;  %v3931_v19 = vunpack.i.l.bf16 %v3930_v59  ;;  %v3229_v38 = vpack.c.bf16 %v2496_v7, %v2495_v50 }
 0x428   : > { %3259 = vmatpush1.bf16.msra.mxu1 %v3227_v18  ;;  %2372 = vmatprep.mubr.f32.mxu1 %v6371_v26  ;;  %v3935_v15 = vpop.permute.xlu0 %3934  ;;  %v969_v17 = vshrl.u32 %v6426_v2, 7 }
 0x429   : > { %2153 = vmatmul.mubr.f32.gmra.mrb[46].mxu0 %v2779_v45  ;;  %v2482_v63 = vsel %vm2472_vm10, %v3927_v33, %v3932_v29  ;;  %v2481_v41 = vsel %vm2472_vm10, %v3926_v30, %v3931_v19  ;;  %3230 = vmatprep.subr.bf16.mxu0 %v3229_v38  ;;  %v3937_v36 = vunpack.i.h.bf16 %v3935_v15  ;;  %v3936_v4 = vunpack.i.l.bf16 %v3935_v15 }
 0x42a   : > { %2574 = vmatprep.mubr.f32.mxu0 %v6371_v26  ;;  %3252 = vmatprep.subr.bf16.mxu1 %v3229_v38  ;;  %v3235_v48 = vpack.c.bf16 %v2482_v63, %v2481_v41  ;;  %v3940_v27 = vpop.permute.xlu1 %3939  ;;  %v2497_v37 = vsel %vm2472_vm10, %v3931_v19, %v3926_v30  ;;  %v2498_v55 = vsel %vm2472_vm10, %v3932_v29, %v3927_v33  ;;  %v6170_v40 = vsub.s32 0, %v969_v17 }
 0x42b   : > { %2373 = vmatmul.mubr.f32.gmra.mrb[54].mxu1 %v2784_v34  ;;  %3232 = vmatpush1.bf16.msra.mxu0 %v3231_v56  ;;  %v3942_v10 = vunpack.i.h.bf16 %v3940_v27  ;;  %v3941_v25 = vunpack.i.l.bf16 %v3940_v27  ;;  %v3233_v5 = vpack.c.bf16 %v2498_v55, %v2497_v37  ;;  %v6175_v45 = vsub.s32 1, %v969_v17 }
 0x42c   : > { %3260 = vmatpush1.bf16.msra.mxu1 %v3231_v56  ;;  %2586 = vmatprep.mubr.f32.mxu1 %v6371_v26  ;;  %v3945_v46 = vpop.permute.xlu0 %3944  ;;  %v971_v3 = vrot.slane %v966_v0, %v6170_v40 }
 0x42d   : > { %v2484_v22 = vsel %vm2472_vm10, %v3937_v36, %v3942_v10  ;;  %v2483_v42 = vsel %vm2472_vm10, %v3936_v4, %v3941_v25  ;;  %3234 = vmatprep.subr.bf16.mxu0 %v3233_v5  ;;  %3253 = vmatprep.subr.bf16.mxu1 %v3233_v5  ;;  %v3947_v1 = vunpack.i.h.bf16 %v3945_v46  ;;  %v3946_v14 = vunpack.i.l.bf16 %v3945_v46 }
 0x42e   : > { %v3239_v32 = vpack.c.bf16 %v2484_v22, %v2483_v42  ;;  %v3950_v49 = vpop.permute.xlu1 %3949  ;;  %v2499_v12 = vsel %vm2472_vm10, %v3941_v25, %v3936_v4  ;;  %v2500_v24 = vsel %vm2472_vm10, %v3942_v10, %v3937_v36  ;;  %v975_v33 = vrot.slane %v966_v0, %v6175_v45 }
 0x42f   : > { %3236 = vmatpush1.bf16.msra.mxu0 %v3235_v48  ;;  %v3952_v8 = vunpack.i.h.bf16 %v3950_v49  ;;  %v3951_v16 = vunpack.i.l.bf16 %v3950_v49  ;;  %v3237_v11 = vpack.c.bf16 %v2500_v24, %v2499_v12 }
 0x430   : > { %3261 = vmatpush1.bf16.msra.mxu1 %v3235_v48 }
 0x431   : > { %v3955_v57 = vpop.permute.xlu0 %3954  ;;  %v2486_v39 = vsel %vm2472_vm10, %v3947_v1, %v3952_v8  ;;  %v2485_v28 = vsel %vm2472_vm10, %v3946_v14, %v3951_v16  ;;  %3238 = vmatprep.subr.bf16.mxu0 %v3237_v11  ;;  %3254 = vmatprep.subr.bf16.mxu1 %v3237_v11  ;;  %v2501_v9 = vsel %vm2472_vm10, %v3951_v16, %v3946_v14 }
 0x432   : > { %v3957_v47 = vunpack.i.h.bf16 %v3955_v57  ;;  %v3956_v61 = vunpack.i.l.bf16 %v3955_v57  ;;  %v3243_v52 = vpack.c.bf16 %v2486_v39, %v2485_v28  ;;  %v3960_v6 = vpop.permute.xlu1 %3959  ;;  %v2502_v43 = vsel %vm2472_vm10, %v3952_v8, %v3947_v1 }
 0x433   : > { %3240 = vmatpush1.bf16.msra.mxu0 %v3239_v32  ;;  %v3962_v23 = vunpack.i.h.bf16 %v3960_v6  ;;  %v3961_v35 = vunpack.i.l.bf16 %v3960_v6  ;;  %v3241_v21 = vpack.c.bf16 %v2502_v43, %v2501_v9  ;;  %v2761_v43 = vld [vmem:[%s6271_s5 + $0x2] ss:$8 sm:$0x3] }
 0x434   : > { %3262 = vmatpush1.bf16.msra.mxu1 %v3239_v32 }
 0x435   : > { %v2488_v13 = vsel %vm2472_vm10, %v3957_v47, %v3962_v23  ;;  %v2487_v53 = vsel %vm2472_vm10, %v3956_v61, %v3961_v35  ;;  %3242 = vmatprep.subr.bf16.mxu0 %v3241_v21  ;;  %3255 = vmatprep.subr.bf16.mxu1 %v3241_v21  ;;  %v2503_v54 = vsel %vm2472_vm10, %v3961_v35, %v3956_v61 }
 0x436   : > { %v3247_v20 = vpack.c.bf16 %v2488_v13, %v2487_v53  ;;  %v2504_v18 = vsel %vm2472_vm10, %v3962_v23, %v3957_v47  ;;  %v2766_v23 = vld [vmem:[%s6271_s5 + $0x3] ss:$8 sm:$0x3]  ;;  %v1403_v35 = vrot.slane %v2761_v43, %v6170_v40  ;;  %v1407_v21 = vrot.slane %v2761_v43, %v6175_v45 }
 0x437   : > { %3244 = vmatpush1.bf16.msra.mxu0 %v3243_v52  ;;  %v3245_v62 = vpack.c.bf16 %v2504_v18, %v2503_v54  ;;  %v1623_v13 = vrot.slane %v2766_v23, %v6170_v40  ;;  %v1627_v54 = vrot.slane %v2766_v23, %v6175_v45 }
 0x438   : > { %3263 = vmatpush1.bf16.msra.mxu1 %v3243_v52 }
 0x439   : > { %3246 = vmatprep.subr.bf16.mxu0 %v3245_v62  ;;  %3256 = vmatprep.subr.bf16.mxu1 %v3245_v62 }
 0x43b   : > { %3248 = vmatpush1.bf16.msra.mxu0 %v3247_v20 }
 0x43c   : > { %3264 = vmatpush1.bf16.msra.mxu1 %v3247_v20 }
 0x43e   : > { %2575 = vmatmul.mubr.f32.vlgmr.msra.gmra.mrb[48].mxu0 %v2786_v31 }
 0x43f   : > { %2587 = vmatmul.mubr.f32.vlgmr.msra.gmra.mrb[56].mxu1 %v2788_v51  ;;  %2580 = vmatprep.mubr.f32.mxu0 %v6371_v26 }
 0x440   : > { %2592 = vmatprep.mubr.f32.mxu1 %v6371_v26  ;;  %v2756_v26 = vld [vmem:[%s6271_s5 + $0x1] ss:$8 sm:$0x3] }
 0x441   : > { %v1183_v58 = vrot.slane %v2756_v26, %v6170_v40  ;;  %v1187_v30 = vrot.slane %v2756_v26, %v6175_v45 }
 0x442   : > { %2581 = vmatmul.mubr.f32.gmra.mrb[50].mxu0 %v2787_v44 }
 0x443   : > { %2593 = vmatmul.mubr.f32.gmra.mrb[58].mxu1 %v2789_v60 }
 0x48d   : > { %v943_v56 = vpop.f32.mrb[16].mxu0 }
 0x48e   : > { %v978_v59 = vmul.f32 %v971_v3, %v943_v56  ;;  %v945_v7 = vpop.f32.mrb[17].mxu0 }
 0x48f   : > { %v1154_v50 = vpop.f32.mrb[24].mxu1  ;;  %v979_v19 = vmul.f32 %v975_v33, %v945_v7 }
 0x490   : > { %v1190_v29 = vmul.f32 %v1183_v58, %v1154_v50  ;;  %v1156_v38 = vpop.f32.mrb[25].mxu1 }
 0x491   : > { %v1191_v34 = vmul.f32 %v1187_v30, %v1156_v38 }
 0x492   : > { %v1198_v15 = vadd.f32 %v1190_v29, %v978_v59 }
 0x493   : > { %v1199_v63 = vadd.f32 %v1191_v34, %v979_v19 }
 0x494   : > { %v1160_v4 = vpop.f32.mrb[26].mxu1 }
 0x495   : > { %v1192_v27 = vmul.f32 %v1183_v58, %v1160_v4  ;;  %v1162_v55 = vpop.f32.mrb[27].mxu1 }
 0x496   : > { %v949_v41 = vpop.f32.mrb[18].mxu0  ;;  %v1193_v10 = vmul.f32 %v1187_v30, %v1162_v55 }
 0x497   : > { %v980_v36 = vmul.f32 %v971_v3, %v949_v41  ;;  %v951_v48 = vpop.f32.mrb[19].mxu0 }
 0x498   : > { %v981_v37 = vmul.f32 %v975_v33, %v951_v48 }
 0x499   : > { %v1200_v25 = vadd.f32 %v1192_v27, %v980_v36 }
 0x49a   : > { %v955_v5 = vpop.f32.mrb[20].mxu0  ;;  %v1201_v46 = vadd.f32 %v1193_v10, %v981_v37 }
 0x49b   : > { %v982_v22 = vmul.f32 %v971_v3, %v955_v5  ;;  %v1166_v42 = vpop.f32.mrb[28].mxu1  ;;  %v957_v1 = vpop.f32.mrb[21].mxu0 }
 0x49c   : > { %v1194_v14 = vmul.f32 %v1183_v58, %v1166_v42  ;;  %v983_v32 = vmul.f32 %v975_v33, %v957_v1  ;;  %v1168_v49 = vpop.f32.mrb[29].mxu1 }
 0x49d   : > { %v1195_v12 = vmul.f32 %v1187_v30, %v1168_v49 }
 0x49e   : > { %v1202_v24 = vadd.f32 %v1194_v14, %v982_v22  ;;  %v961_v8 = vpop.f32.mrb[22].mxu0 }
 0x49f   : > { %v1203_v16 = vadd.f32 %v1195_v12, %v983_v32  ;;  %v984_v11 = vmul.f32 %v971_v3, %v961_v8  ;;  %v1172_v57 = vpop.f32.mrb[30].mxu1  ;;  %v963_v39 = vpop.f32.mrb[23].mxu0 }
 0x4a0   : > { %v1196_v28 = vmul.f32 %v1183_v58, %v1172_v57  ;;  %v985_v47 = vmul.f32 %v975_v33, %v963_v39  ;;  %v1174_v61 = vpop.f32.mrb[31].mxu1 }
 0x4a1   : > { %v1197_v52 = vmul.f32 %v1187_v30, %v1174_v61 }
 0x4a2   : > { %v1204_v6 = vadd.f32 %v1196_v28, %v984_v11 }
 0x4a3   : > { %v1205_v9 = vadd.f32 %v1197_v52, %v985_v47 }
 0x4af   : > { %v1374_v53 = vpop.f32.mrb[24].mxu0 }
 0x4b0   : > { %v1410_v20 = vmul.f32 %v1403_v35, %v1374_v53  ;;  %v1376_v18 = vpop.f32.mrb[25].mxu0 }
 0x4b1   : > { %v1411_v62 = vmul.f32 %v1407_v21, %v1376_v18  ;;  %v1594_v31 = vpop.f32.mrb[32].mxu1 }
 0x4b2   : > { %v1418_v51 = vadd.f32 %v1410_v20, %v1198_v15  ;;  %v1630_v44 = vmul.f32 %v1623_v13, %v1594_v31  ;;  %v1596_v60 = vpop.f32.mrb[33].mxu1 }
 0x4b3   : > { %v1419_v2 = vadd.f32 %v1411_v62, %v1199_v63  ;;  %v1631_v17 = vmul.f32 %v1627_v54, %v1596_v60  ;;  %v1380_v0 = vpop.f32.mrb[26].mxu0 }
 0x4b4   : > { %v1412_v26 = vmul.f32 %v1403_v35, %v1380_v0  ;;  %v1382_v3 = vpop.f32.mrb[27].mxu0  ;;  %v1638_v58 = vadd.f32 %v1630_v44, %v1418_v51 }
 0x4b5   : > { %v1413_v33 = vmul.f32 %v1407_v21, %v1382_v3  ;;  %v1600_v30 = vpop.f32.mrb[34].mxu1  ;;  %v1639_v56 = vadd.f32 %v1631_v17, %v1419_v2 }
 0x4b6   : > { %v1420_v59 = vadd.f32 %v1412_v26, %v1200_v25  ;;  %v1632_v50 = vmul.f32 %v1623_v13, %v1600_v30  ;;  %v1602_v7 = vpop.f32.mrb[35].mxu1 }
 0x4b7   : > { %v1421_v29 = vadd.f32 %v1413_v33, %v1201_v46  ;;  %v1633_v19 = vmul.f32 %v1627_v54, %v1602_v7  ;;  %v1386_v38 = vpop.f32.mrb[28].mxu0 }
 0x4b8   : > { %v1414_v34 = vmul.f32 %v1403_v35, %v1386_v38  ;;  %v1388_v41 = vpop.f32.mrb[29].mxu0  ;;  %v1640_v15 = vadd.f32 %v1632_v50, %v1420_v59 }
 0x4b9   : > { %v1415_v36 = vmul.f32 %v1407_v21, %v1388_v41  ;;  %v1606_v4 = vpop.f32.mrb[36].mxu1  ;;  %v1641_v63 = vadd.f32 %v1633_v19, %v1421_v29 }
 0x4ba   : > { %v1422_v48 = vadd.f32 %v1414_v34, %v1202_v24  ;;  %v1634_v27 = vmul.f32 %v1623_v13, %v1606_v4  ;;  %v1608_v37 = vpop.f32.mrb[37].mxu1  ;;  %v2775_v24 = vld [vmem:[%s6271_s5 + $0x5] ss:$8 sm:$0x3] }
 0x4bb   : > { %v1423_v55 = vadd.f32 %v1415_v36, %v1203_v16  ;;  %v1635_v10 = vmul.f32 %v1627_v54, %v1608_v37  ;;  %v1392_v5 = vpop.f32.mrb[30].mxu0  ;;  %v1945_v16 = vrot.slane %v2775_v24, %v6170_v40  ;;  %v1949_v47 = vrot.slane %v2775_v24, %v6175_v45  ;;  %v2785_v37 = vld [vmem:[%s6271_s5 + $0x7] ss:$8 sm:$0x3] }
 0x4bc   : > { %v1416_v22 = vmul.f32 %v1403_v35, %v1392_v5  ;;  %v1394_v42 = vpop.f32.mrb[31].mxu0  ;;  %v1642_v25 = vadd.f32 %v1634_v27, %v1422_v48  ;;  %v2780_v48 = vld [vmem:[%s6271_s5 + $0x6] ss:$8 sm:$0x3]  ;;  %v2385_v5 = vrot.slane %v2785_v37, %v6170_v40 }
 0x4bd   : > { %v1417_v1 = vmul.f32 %v1407_v21, %v1394_v42  ;;  %v1612_v14 = vpop.f32.mrb[38].mxu1  ;;  %v1643_v46 = vadd.f32 %v1635_v10, %v1423_v55  ;;  %v2165_v27 = vrot.slane %v2780_v48, %v6170_v40  ;;  %v2169_v55 = vrot.slane %v2780_v48, %v6175_v45 }
 0x4be   : > { %v1424_v32 = vadd.f32 %v1416_v22, %v1204_v6  ;;  %v1636_v49 = vmul.f32 %v1623_v13, %v1612_v14  ;;  %v1614_v12 = vpop.f32.mrb[39].mxu1 }
 0x4bf   : > { %v1425_v8 = vadd.f32 %v1417_v1, %v1205_v9  ;;  %v1637_v11 = vmul.f32 %v1627_v54, %v1614_v12 }
 0x4c0   : > { %v1644_v57 = vadd.f32 %v1636_v49, %v1424_v32 }
 0x4c1   : > { %v1645_v39 = vadd.f32 %v1637_v11, %v1425_v8 }
 0x4d0   : > { %v1717_v28 = vpop.f32.mrb[32].mxu0 }
 0x4d1   : > { %v1740_v61 = vadd.f32 %v1717_v28, %v1638_v58  ;;  %v1719_v52 = vpop.f32.mrb[33].mxu0 }
 0x4d2   : > { %v1741_v43 = vadd.f32 %v1719_v52, %v1639_v56  ;;  %v1916_v23 = vpop.f32.mrb[40].mxu1 }
 0x4d3   : > { %v1952_v6 = vmul.f32 %v1945_v16, %v1916_v23  ;;  %v1918_v35 = vpop.f32.mrb[41].mxu1 }
 0x4d4   : > { %v1953_v21 = vmul.f32 %v1949_v47, %v1918_v35  ;;  %v1723_v9 = vpop.f32.mrb[34].mxu0 }
 0x4d5   : > { %v1960_v13 = vadd.f32 %v1952_v6, %v1740_v61  ;;  %v1742_v53 = vadd.f32 %v1723_v9, %v1640_v15  ;;  %v1725_v54 = vpop.f32.mrb[35].mxu0 }
 0x4d6   : > { %v1961_v20 = vadd.f32 %v1953_v21, %v1741_v43  ;;  %v1743_v18 = vadd.f32 %v1725_v54, %v1641_v63  ;;  %v1922_v62 = vpop.f32.mrb[42].mxu1 }
 0x4d7   : > { %v1954_v31 = vmul.f32 %v1945_v16, %v1922_v62  ;;  %v1924_v51 = vpop.f32.mrb[43].mxu1 }
 0x4d8   : > { %v1955_v44 = vmul.f32 %v1949_v47, %v1924_v51  ;;  %v1729_v60 = vpop.f32.mrb[36].mxu0 }
 0x4d9   : > { %v1962_v2 = vadd.f32 %v1954_v31, %v1742_v53  ;;  %v1744_v17 = vadd.f32 %v1729_v60, %v1642_v25  ;;  %v1731_v0 = vpop.f32.mrb[37].mxu0  ;;  %v2389_v25 = vrot.slane %v2785_v37, %v6175_v45 }
 0x4da   : > { %v1963_v26 = vadd.f32 %v1955_v44, %v1743_v18  ;;  %v1745_v3 = vadd.f32 %v1731_v0, %v1643_v46  ;;  %v1928_v58 = vpop.f32.mrb[44].mxu1 }
 0x4db   : > { %v1956_v33 = vmul.f32 %v1945_v16, %v1928_v58  ;;  %v1930_v30 = vpop.f32.mrb[45].mxu1 }
 0x4dc   : > { %v1957_v56 = vmul.f32 %v1949_v47, %v1930_v30  ;;  %v1735_v59 = vpop.f32.mrb[38].mxu0 }
 0x4dd   : > { %v1964_v50 = vadd.f32 %v1956_v33, %v1744_v17  ;;  %v1746_v7 = vadd.f32 %v1735_v59, %v1644_v57  ;;  %v1737_v29 = vpop.f32.mrb[39].mxu0 }
 0x4de   : > { %v1965_v19 = vadd.f32 %v1957_v56, %v1745_v3  ;;  %v1747_v38 = vadd.f32 %v1737_v29, %v1645_v39  ;;  %v1934_v34 = vpop.f32.mrb[46].mxu1 }
 0x4df   : > { %v1958_v41 = vmul.f32 %v1945_v16, %v1934_v34  ;;  %v1936_v15 = vpop.f32.mrb[47].mxu1 }
 0x4e0   : > { %v1959_v36 = vmul.f32 %v1949_v47, %v1936_v15 }
 0x4e1   : > { %v1966_v4 = vadd.f32 %v1958_v41, %v1746_v7 }
 0x4e2   : > { %v1967_v63 = vadd.f32 %v1959_v36, %v1747_v38 }
 0x4f0   : > { %v2136_v10 = vpop.f32.mrb[40].mxu0 }
 0x4f1   : > { %v2172_v22 = vmul.f32 %v2165_v27, %v2136_v10  ;;  %v2138_v42 = vpop.f32.mrb[41].mxu0 }
 0x4f2   : > { %v2173_v1 = vmul.f32 %v2169_v55, %v2138_v42  ;;  %v2356_v46 = vpop.f32.mrb[48].mxu1 }
 0x4f3   : > { %v2180_v14 = vadd.f32 %v2172_v22, %v1960_v13  ;;  %v2392_v49 = vmul.f32 %v2385_v5, %v2356_v46  ;;  %v2358_v12 = vpop.f32.mrb[49].mxu1 }
 0x4f4   : > { %v2181_v32 = vadd.f32 %v2173_v1, %v1961_v20  ;;  %v2393_v8 = vmul.f32 %v2389_v25, %v2358_v12  ;;  %v2142_v11 = vpop.f32.mrb[42].mxu0 }
 0x4f5   : > { %v2400_v57 = vadd.f32 %v2392_v49, %v2180_v14  ;;  %v2174_v39 = vmul.f32 %v2165_v27, %v2142_v11  ;;  %v2144_v24 = vpop.f32.mrb[43].mxu0 }
 0x4f6   : > { %v2401_v16 = vadd.f32 %v2393_v8, %v2181_v32  ;;  %v2175_v28 = vmul.f32 %v2169_v55, %v2144_v24  ;;  %v2362_v61 = vpop.f32.mrb[50].mxu1 }
 0x4f7   : > { %v2182_v47 = vadd.f32 %v2174_v39, %v1962_v2  ;;  %v2394_v43 = vmul.f32 %v2385_v5, %v2362_v61  ;;  %v2364_v23 = vpop.f32.mrb[51].mxu1 }
 0x4f8   : > { %v2183_v52 = vadd.f32 %v2175_v28, %v1963_v26  ;;  %v2148_v6 = vpop.f32.mrb[44].mxu0  ;;  %v2395_v35 = vmul.f32 %v2389_v25, %v2364_v23 }
 0x4f9   : > { %v2176_v21 = vmul.f32 %v2165_v27, %v2148_v6  ;;  %v2150_v9 = vpop.f32.mrb[45].mxu0  ;;  %v2402_v13 = vadd.f32 %v2394_v43, %v2182_v47 }
 0x4fa   : > { %v2177_v53 = vmul.f32 %v2169_v55, %v2150_v9  ;;  %v2403_v54 = vadd.f32 %v2395_v35, %v2183_v52  ;;  %v2368_v18 = vpop.f32.mrb[52].mxu1 }
 0x4fb   : > { %v2184_v20 = vadd.f32 %v2176_v21, %v1964_v50  ;;  %v2396_v31 = vmul.f32 %v2385_v5, %v2368_v18  ;;  %v2370_v51 = vpop.f32.mrb[53].mxu1 }
 0x4fc   : > { %v2185_v62 = vadd.f32 %v2177_v53, %v1965_v19  ;;  %v2154_v44 = vpop.f32.mrb[46].mxu0  ;;  %v2397_v60 = vmul.f32 %v2389_v25, %v2370_v51  ;;  %v2790_v19 = vld [vmem:[%s6271_s5 + $0x10] ss:$8 sm:$0x3] }
 0x4fd   : > { %v2178_v17 = vmul.f32 %v2165_v27, %v2154_v44  ;;  %v2156_v2 = vpop.f32.mrb[47].mxu0  ;;  %v2404_v0 = vadd.f32 %v2396_v31, %v2184_v20  ;;  %v2605_v38 = vrot.slane %v2790_v19, %v6170_v40  ;;  %v2609_v34 = vrot.slane %v2790_v19, %v6175_v45 }
 0x4fe   : > { %v2179_v26 = vmul.f32 %v2169_v55, %v2156_v2  ;;  %v2405_v3 = vadd.f32 %v2397_v60, %v2185_v62  ;;  %v2374_v33 = vpop.f32.mrb[54].mxu1 }
 0x4ff   : > { %v2186_v58 = vadd.f32 %v2178_v17, %v1966_v4  ;;  %v2398_v56 = vmul.f32 %v2385_v5, %v2374_v33  ;;  %v2376_v59 = vpop.f32.mrb[55].mxu1 }
 0x500   : > { %v2187_v30 = vadd.f32 %v2179_v26, %v1967_v63  ;;  %v2399_v7 = vmul.f32 %v2389_v25, %v2376_v59 }
 0x501   : > { %v2406_v29 = vadd.f32 %v2398_v56, %v2186_v58 }
 0x502   : > { %v2407_v50 = vadd.f32 %v2399_v7, %v2187_v30 }
 0x511   : > { %v2576_v41 = vpop.f32.mrb[48].mxu0 }
 0x512   : > { %v2612_v15 = vmul.f32 %v2605_v38, %v2576_v41  ;;  %v2588_v36 = vpop.f32.mrb[56].mxu1  ;;  %v2578_v4 = vpop.f32.mrb[49].mxu0 }
 0x513   : > { %v2616_v48 = vmul.f32 %v2605_v38, %v2588_v36  ;;  %v2613_v63 = vmul.f32 %v2609_v34, %v2578_v4  ;;  %v2590_v27 = vpop.f32.mrb[57].mxu1 }
 0x514   : > { %v2620_v37 = vadd.f32 %v2612_v15, %v2400_v57  ;;  %v2617_v55 = vmul.f32 %v2609_v34, %v2590_v27 }
 0x515   : > { %v2624_v10 = vadd.f32 %v2616_v48, %v2404_v0  ;;  %v2621_v5 = vadd.f32 %v2613_v63, %v2401_v16  ;;  %v2582_v22 = vpop.f32.mrb[50].mxu0 }
 0x516   : > { %2628 = vst [vmem:[%s297_s17] sm:$0xff] %v2620_v37  ;;  %v2625_v40 = vadd.f32 %v2617_v55, %v2405_v3  ;;  %v2614_v42 = vmul.f32 %v2605_v38, %v2582_v22  ;;  %v2594_v45 = vpop.f32.mrb[58].mxu1  ;;  %v2584_v25 = vpop.f32.mrb[51].mxu0 }
 0x517   : > { %2632 = vst [vmem:[%s297_s17 + $0x20] sm:$0xff] %v2624_v10  ;;  %2629 = vst [vmem:[%s297_s17 + $0x8] sm:$0xff] %v2621_v5  ;;  %v2618_v1 = vmul.f32 %v2605_v38, %v2594_v45  ;;  %v2615_v14 = vmul.f32 %v2609_v34, %v2584_v25  ;;  %v2596_v46 = vpop.f32.mrb[59].mxu1 }
 0x518   : > { %2633 = vst [vmem:[%s297_s17 + $0x28] sm:$0xff] %v2625_v40  ;;  %v2622_v32 = vadd.f32 %v2614_v42, %v2402_v13  ;;  %v2619_v49 = vmul.f32 %v2609_v34, %v2596_v46 }
 0x519   : > { %v2626_v12 = vadd.f32 %v2618_v1, %v2406_v29  ;;  %v2623_v8 = vadd.f32 %v2615_v14, %v2403_v54 }
 0x51a   : > { %2630 = vst [vmem:[%s297_s17 + $0x10] sm:$0xff] %v2622_v32  ;;  %v2627_v11 = vadd.f32 %v2619_v49, %v2407_v50 }
 0x51b   : > { %2634 = vst [vmem:[%s297_s17 + $0x30] sm:$0xff] %v2626_v12  ;;  %2631 = vst [vmem:[%s297_s17 + $0x18] sm:$0xff] %v2623_v8 }
 0x51c   : > { %2635 = vst [vmem:[%s297_s17 + $0x38] sm:$0xff] %v2627_v11 }
 0x51d   : > { %4022 = shalt.err (!%p4019_p2)
}
 0x51e   : > { %s4023_s11 = scalar_lea.hbm %s6221_s23, 1024  ;;  %s4027_s21 = scalar_lea.hbm %s6273_s7, 2048 }
 0x51f   : > { %p4024_p4 = scmp.ne.s32.totalorder %s6221_s23, %s4023_s11  ;;  %p4028_p9 = scmp.lt.u32.totalorder %s6221_s23, %s6273_s7 }
 0x520   : > { %p4029_p1 = scmp.lt.u32.totalorder %s4027_s21, %s4023_s11  ;;  %p4031_p6 = scmp.lt.u32.totalorder %s4023_s11, %s6221_s23 }
 0x521   : > { %p4025_p5 = pnand %p4024_p4, %p6427_p11 }
 0x522   : > { %p4030_p3 = por %p4029_p1, %p4028_p9 }
 0x523   : > { %p4026_p7 = pneg %p4025_p5 }
 0x524   : > { %p4032_p12 = por %p4031_p6, %p4030_p3 }
 0x526   : > { %p4033_p13 = pnand %p4032_p12, %p4026_p7 }
 0x528   : > { %4036 = shalt.err (!%p4033_p13)
}
 0x529   : > { %s4090_s15 = smov 256  }
 0x52a   : > { %3267 = dma.vmem_to_hbm [thread:$0]  (%p6427_p11), %s6216_s18, 1024, %s6221_s23, %s2637_s28, %s4090_s15, %s4090_s15, %s4082_s22  }
 0x52b PF: > { %s2666_s29 = sand.u32 1, %s4063_s24   ;;  %p6428_p8 = scmp.ne.s32.totalorder %s6323_s14, 0 }
 0x52c   : > { %p6429_p10 = scmp.ge.s32.totalorder %s4075_s27, 2  ;;  %s2667_s19 = scalar_lea.sflag [#allocation4], %s2666_s29 }
 0x52e   : > { %p3274_p0 = pnand %p6429_p10, %p6428_p8 }
 0x530   : > { %4058 = dma.done.wait (!%p3274_p0), %s2667_s19, 1024  }
 0x531   : > { %4060 = vsyncadd (!%p3274_p0), %s2667_s19, 4294966272  ;;  %p20_p2 = scmp.ge.s32.totalorder %s4156_s30, 4   ;;  %s6430_s24 = smov %s4067_s25 }
 0x532   : > { %s6431_s25 = smov %s4071_s26  ;;  %s6432_s26 = smov %s4168_s10 }
 0x533   : > { %s6433_s27 = smov %s4156_s30  ;;  %22 = sbr.rel (!%p20_p2) target bundleno = 5 (0x5), region = 108 }
 0x53a   :  { %2672 = vsyncpa [#allocation3], 1 }
 0x53b   :  { %2674 = vsyncpa [#allocation3 + $0x1], 1 }
 0x53c   :  { %2675 = vsyncpa [#allocation4], 1 }
 0x53d   :  { %2677 = vsyncpa [#allocation4 + $0x1], 1 }

</bundles_post_ra>
